<compile_context>
chip_gen: v6e
topology: v6e:2x2x1
jax: 0.10.0
libtpu: 0.0.40
codegen_flags: <defaults>
</compile_context>

<pallas_src>
import functools

import jax
import jax.numpy as jnp
from jax import lax
from jax.experimental import pallas as pl
from jax.experimental.pallas import tpu as pltpu

# ---- model hyperparameters (mirror BaseModel / DNNEGRec.__init__) ----------
EMBED_DIM    = 48
ATTR_FNUM    = 3
ITEM_FNUM    = 1 + ATTR_FNUM              # 4
HIST_FNUM    = 2 + ATTR_FNUM              # 5
ITM_EMB_DIM  = ITEM_FNUM * EMBED_DIM      # 192  (== the :192 align slice)
HIST_EMB_DIM = HIST_FNUM * EMBED_DIM      # 240
MODULE_INP   = ITM_EMB_DIM + HIST_EMB_DIM # 432
MAX_HIST_LEN = 8
LLM_DIM      = 64                         # args.llm_input_dim
LLM_HIDDEN   = 1024                       # hard-coded hidden_dim in DNNEGRec
CTR_MID      = (LLM_HIDDEN + 192) // 2    # 608
DEEP_ARCH    = (128, 64)                  # args.dnn_deep_arch
KD_TEMP      = 1.0                        # args.kd_temperature
ITEM_NUM, ATTR_NUM, RATING_NUM = 50, 20, 5
BATCH        = 8


# ----------------------------- Pallas kernel --------------------------------
def _dnnegrec_kernel(hist_ref, item_ref, llmh_ref, labels_ref,
                     w_llm_ref,
                     w_c1_ref, b_c1_ref, w_c2_ref, b_c2_ref,
                     w_d0i_ref, w_d0u_ref, w_d0f_ref, b_d0_ref,
                     w_d1_ref, b_d1_ref,
                     w_fc_ref, b_fc_ref,
                     probs_ref, bce_ref, align_ref,
                     *, inv_temp, inv_batch):
    f32 = jnp.float32
    bf16 = jnp.bfloat16

    # user_behavior = torch.mean(user_behavior, dim=1)
    # -> sum * (1/L): keeps the divide off the VALU (fp32 data, fp32 math)
    ub = hist_ref[...].sum(axis=1) * (1.0 / MAX_HIST_LEN)       # (B, HIST_EMB_DIM)
    item = item_ref[...]                                        # (B, 192)  f32
    llm_h = llmh_ref[...]                                       # (B, 1024) bf16

    # llm_fe = self.llm_linear(llm_hiddens_output)   (no bias)   bf16 MXU, f32 acc
    llm_fe = jnp.dot(llm_h, w_llm_ref[...], preferred_element_type=f32)   # (B, 64) f32

    # llm_to_ctr_mlp: Linear -> LeakyReLU(0.01) -> Linear (elementwise in f32)
    h = jnp.dot(llm_h, w_c1_ref[...], preferred_element_type=f32) + b_c1_ref[...]
    h = jnp.where(h >= 0.0, h, 0.01 * h)
    toctr = (jnp.dot(h.astype(bf16), w_c2_ref[...], preferred_element_type=f32)
             + b_c2_ref[...])                                              # (B, 192) f32

    # cal_infonce_loss(align_input, toctr, toctr, kd_temperature)
    # align_input = inp_concat[:, :192] == item_emb (itm_emb_dim == 192 here)
    # rsqrt -> EUP slot; multiply by inv_temp instead of elementwise divide.
    n1 = item * lax.rsqrt(1e-8 + jnp.sum(item * item, axis=-1, keepdims=True))
    n2 = toctr * lax.rsqrt(1e-8 + jnp.sum(toctr * toctr, axis=-1, keepdims=True))
    nume = -jnp.sum(n1 * n2, axis=-1, keepdims=True) * inv_temp            # (B, 1)
    sim = lax.dot_general(n1, n2, (((1,), (1,)), ((), ())),
                          preferred_element_type=f32) * inv_temp           # (B, B)
    m = jnp.max(sim, axis=-1, keepdims=True)                               # stable LSE
    deno = m + jnp.log(jnp.sum(jnp.exp(sim - m), axis=-1, keepdims=True))  # (B, 1)
    align_ref[...] = jnp.sum(nume + deno, axis=0, keepdims=True)           # (1, 1)

    # deep_part MLP on inp_concat = [item | ub | llm_fe]
    # (concat folded into split bf16 matmuls: identical to concat(...) @ W_deep0)
    d = (jnp.dot(item.astype(bf16),   w_d0i_ref[...], preferred_element_type=f32)
         + jnp.dot(ub.astype(bf16),     w_d0u_ref[...], preferred_element_type=f32)
         + jnp.dot(llm_fe.astype(bf16), w_d0f_ref[...], preferred_element_type=f32)
         + b_d0_ref[...])
    d = jnp.maximum(d, 0.0)                                                # ReLU (+Dropout eval=id)
    d = jnp.dot(d.astype(bf16), w_d1_ref[...], preferred_element_type=f32) + b_d1_ref[...]
    d = jnp.maximum(d, 0.0)

    # dnn_fc_out + get_ctr_output: sigmoid, clamp, BCE (mean)  -- all f32
    logits = (jnp.dot(d.astype(bf16), w_fc_ref[...], preferred_element_type=f32)
              + b_fc_ref[...])                                             # (B, 1)
    p = jnp.clip(jax.nn.sigmoid(logits), 1e-7, 1.0 - 1e-7)
    probs_ref[...] = p
    y = labels_ref[...]
    bce = -(y * jnp.log(p) + (1.0 - y) * jnp.log(1.0 - p))
    bce_ref[...] = jnp.sum(bce, axis=0, keepdims=True) * inv_batch         # (1, 1)


# ------------------------------- wrapper -------------------------------------
def dnnegrec_forward(params, hist_emb, item_emb, llm_hidden, labels):
    B = item_emb.shape[0]
    bf16 = jnp.bfloat16
    (w_llm, w_c1, b_c1, w_c2, b_c2,
     w_d0i, w_d0u, w_d0f, b_d0,
     w_d1, b_d1, w_fc, b_fc) = params

    # bf16 weights / LLM hiddens -> halve the dominant weight-DMA bytes.
    # Biases and loss-path tensors stay fp32 (f32 accumulation in all dots).
    kparams = (w_llm.astype(bf16),
               w_c1.astype(bf16), b_c1, w_c2.astype(bf16), b_c2,
               w_d0i.astype(bf16), w_d0u.astype(bf16), w_d0f.astype(bf16), b_d0,
               w_d1.astype(bf16), b_d1,
               w_fc.astype(bf16), b_fc)
    llm_hidden_bf16 = llm_hidden.astype(bf16)

    kern = functools.partial(_dnnegrec_kernel,
                             inv_temp=1.0 / KD_TEMP, inv_batch=1.0 / float(B))
    vmem = pl.BlockSpec(memory_space=pltpu.MemorySpace.VMEM)
    n_in = 4 + len(kparams)
    probs, bce, align = pl.pallas_call(
        kern,
        out_shape=(jax.ShapeDtypeStruct((B, 1), jnp.float32),
                   jax.ShapeDtypeStruct((1, 1), jnp.float32),
                   jax.ShapeDtypeStruct((1, 1), jnp.float32)),
        in_specs=[vmem] * n_in,
        out_specs=(vmem, vmem, vmem),
    )(hist_emb, item_emb, llm_hidden_bf16, labels, *kparams)
    # TODO(synk): loss_generation comes from a pretrained AutoModelForCausalLM
    # (+ tokenizer-dependent label masking); no Pallas equivalent — returned as 0.
    loss_generation = jnp.float32(0.0)
    outputs = {"logits": probs, "labels": labels, "loss": bce[0, 0]}
    return outputs, loss_generation, align[0, 0]


# ------------------------------- main -----------------------------------------
if __name__ == "__main__":
    key = jax.random.PRNGKey(0)
    ks = jax.random.split(key, 24)

    def init(k, shape, scale=0.02):
        return scale * jax.random.normal(k, shape, dtype=jnp.float32)

    # embedding tables (BaseModel.__init__)
    item_table = init(ks[0], (ITEM_NUM + 1, EMBED_DIM))
    attr_table = init(ks[1], (ATTR_NUM + 1, EMBED_DIM))
    rating_table = init(ks[2], (RATING_NUM + 1, EMBED_DIM))

    # DNNEGRec parameters (kept fp32 here; wrapper casts weights to bf16)
    w_llm = init(ks[3], (LLM_HIDDEN, LLM_DIM))                      # llm_linear (bias=False)
    w_c1 = init(ks[4], (LLM_HIDDEN, CTR_MID))                       # llm_to_ctr_mlp[0]
    b_c1 = init(ks[5], (1, CTR_MID))
    w_c2 = init(ks[6], (CTR_MID, 192))                              # llm_to_ctr_mlp[2]
    b_c2 = init(ks[7], (1, 192))
    # TODO(synk): MLP class definition not provided; assumed Linear->ReLU->Dropout stack.
    w_d0 = init(ks[8], (MODULE_INP + LLM_DIM, DEEP_ARCH[0]))        # deep_part layer 0
    b_d0 = init(ks[9], (1, DEEP_ARCH[0]))
    w_d1 = init(ks[10], (DEEP_ARCH[0], DEEP_ARCH[1]))               # deep_part layer 1
    b_d1 = init(ks[11], (1, DEEP_ARCH[1]))
    w_fc = init(ks[12], (DEEP_ARCH[1], 1))                          # dnn_fc_out
    b_fc = init(ks[13], (1, 1))
    # split the first deep-layer weight along its input rows (== concat order)
    w_d0_item = w_d0[:ITM_EMB_DIM]
    w_d0_ub = w_d0[ITM_EMB_DIM:ITM_EMB_DIM + HIST_EMB_DIM]
    w_d0_fe = w_d0[ITM_EMB_DIM + HIST_EMB_DIM:]

    params = (w_llm,
              w_c1, b_c1, w_c2, b_c2,
              w_d0_item, w_d0_ub, w_d0_fe, b_d0,
              w_d1, b_d1,
              w_fc, b_fc)

    # ---- synthetic batch (process_input glue) ----
    B, L = BATCH, MAX_HIST_LEN
    hist_iid = jax.random.randint(ks[14], (B, L), 0, ITEM_NUM + 1)
    hist_aid = jax.random.randint(ks[15], (B, L, ATTR_FNUM), 0, ATTR_NUM + 1)
    hist_rate = jax.random.randint(ks[16], (B, L), 0, RATING_NUM + 1)
    iid = jax.random.randint(ks[17], (B,), 0, ITEM_NUM + 1)
    aid = jax.random.randint(ks[18], (B, ATTR_FNUM), 0, ATTR_NUM + 1)
    labels = jax.random.bernoulli(ks[19], 0.5, (B, 1)).astype(jnp.float32)
    # TODO(synk): llm_hiddens_output normally comes from the pretrained causal LM;
    # substituted with a deterministic synthetic hidden-state tensor.
    llm_hidden = jax.random.normal(ks[20], (B, LLM_HIDDEN), dtype=jnp.float32)

    # embedding lookups + field concat (glue, matches process_input)
    hist_item_emb = item_table[hist_iid]                                   # (B, L, 48)
    hist_attr_emb = attr_table[hist_aid].reshape(B, L, EMBED_DIM * ATTR_FNUM)
    hist_rate_emb = rating_table[hist_rate]                                # (B, L, 48)
    hist_emb = jnp.concatenate([hist_item_emb, hist_attr_emb, hist_rate_emb], axis=-1)  # (B, L, 240)
    iid_emb = item_table[iid]                                              # (B, 48)
    attr_emb = attr_table[aid].reshape(B, EMBED_DIM * ATTR_FNUM)           # (B, 144)
    item_emb = jnp.concatenate([iid_emb, attr_emb], axis=-1)               # (B, 192)

    fwd = jax.jit(dnnegrec_forward)
    outputs, loss_gen, loss_align = fwd(params, hist_emb, item_emb, llm_hidden, labels)
    jax.block_until_ready((outputs["logits"], outputs["loss"], loss_align))
    print("KERNEL_OK")
</pallas_src>

<mosaic_0001>
module attributes {stable_mosaic.version = 11 : i64} {
  func.func @_dnnegrec_kernel(%arg0: memref<8x8x240xf32, #tpu.memory_space<vmem>>, %arg1: memref<8x192xf32, #tpu.memory_space<vmem>>, %arg2: memref<8x1024xbf16, #tpu.memory_space<vmem>>, %arg3: memref<8x1xf32, #tpu.memory_space<vmem>>, %arg4: memref<1024x64xbf16, #tpu.memory_space<vmem>>, %arg5: memref<1024x608xbf16, #tpu.memory_space<vmem>>, %arg6: memref<1x608xf32, #tpu.memory_space<vmem>>, %arg7: memref<608x192xbf16, #tpu.memory_space<vmem>>, %arg8: memref<1x192xf32, #tpu.memory_space<vmem>>, %arg9: memref<192x128xbf16, #tpu.memory_space<vmem>>, %arg10: memref<240x128xbf16, #tpu.memory_space<vmem>>, %arg11: memref<64x128xbf16, #tpu.memory_space<vmem>>, %arg12: memref<1x128xf32, #tpu.memory_space<vmem>>, %arg13: memref<128x64xbf16, #tpu.memory_space<vmem>>, %arg14: memref<1x64xf32, #tpu.memory_space<vmem>>, %arg15: memref<64x1xbf16, #tpu.memory_space<vmem>>, %arg16: memref<1x1xf32, #tpu.memory_space<vmem>>, %arg17: memref<8x1xf32, #tpu.memory_space<vmem>>, %arg18: memref<1x1xf32, #tpu.memory_space<vmem>>, %arg19: memref<1x1xf32, #tpu.memory_space<vmem>>) attributes {dimension_semantics = [], scalar_prefetch = 0 : i64, scratch_operands = 0 : i64, tpu.core_type = #tpu.core_type<tc>} {
    %c0 = arith.constant 0 : index
    %c0_0 = arith.constant 0 : index
    %c0_1 = arith.constant 0 : index
    %0 = vector.load %arg0[%c0, %c0_0, %c0_1] : memref<8x8x240xf32, #tpu.memory_space<vmem>>, vector<8x8x240xf32>
    %cst = arith.constant dense<0.000000e+00> : vector<8x240xf32>
    %1 = vector.multi_reduction <add>, %0, %cst [1] : vector<8x8x240xf32> to vector<8x240xf32>
    %cst_2 = arith.constant 1.250000e-01 : f32
    %2 = vector.broadcast %cst_2 : f32 to vector<8x240xf32>
    %3 = arith.mulf %1, %2 : vector<8x240xf32>
    %c0_3 = arith.constant 0 : index
    %c0_4 = arith.constant 0 : index
    %4 = vector.load %arg1[%c0_3, %c0_4] : memref<8x192xf32, #tpu.memory_space<vmem>>, vector<8x192xf32>
    %c0_5 = arith.constant 0 : index
    %c0_6 = arith.constant 0 : index
    %5 = vector.load %arg2[%c0_5, %c0_6] : memref<8x1024xbf16, #tpu.memory_space<vmem>>, vector<8x1024xbf16>
    %c0_7 = arith.constant 0 : index
    %c0_8 = arith.constant 0 : index
    %6 = vector.load %arg4[%c0_7, %c0_8] : memref<1024x64xbf16, #tpu.memory_space<vmem>>, vector<1024x64xbf16>
    %cst_9 = arith.constant dense<0.000000e+00> : vector<8x64xf32>
    %7 = tpu.matmul %5, %6, %cst_9 {dimension_numbers = #tpu.dot_dimension_numbers<[1], [0], [0], [1], [0, 0, 1, 1], [], []>} : vector<8x1024xbf16>, vector<1024x64xbf16>, vector<8x64xf32> -> vector<8x64xf32>
    %c0_10 = arith.constant 0 : index
    %c0_11 = arith.constant 0 : index
    %8 = vector.load %arg5[%c0_10, %c0_11] : memref<1024x608xbf16, #tpu.memory_space<vmem>>, vector<1024x608xbf16>
    %cst_12 = arith.constant dense<0.000000e+00> : vector<8x608xf32>
    %9 = tpu.matmul %5, %8, %cst_12 {dimension_numbers = #tpu.dot_dimension_numbers<[1], [0], [0], [1], [0, 0, 1, 1], [], []>} : vector<8x1024xbf16>, vector<1024x608xbf16>, vector<8x608xf32> -> vector<8x608xf32>
    %c0_13 = arith.constant 0 : index
    %c0_14 = arith.constant 0 : index
    %10 = vector.load %arg6[%c0_13, %c0_14] : memref<1x608xf32, #tpu.memory_space<vmem>>, vector<1x608xf32>
    %11 = vector.broadcast %10 : vector<1x608xf32> to vector<8x608xf32>
    %12 = arith.addf %9, %11 : vector<8x608xf32>
    %cst_15 = arith.constant 0.000000e+00 : f32
    %13 = vector.broadcast %cst_15 : f32 to vector<8x608xf32>
    %14 = arith.cmpf oge, %12, %13 : vector<8x608xf32>
    %cst_16 = arith.constant 0.00999999977 : f32
    %15 = vector.broadcast %cst_16 : f32 to vector<8x608xf32>
    %16 = arith.mulf %15, %12 : vector<8x608xf32>
    %17 = arith.select %14, %12, %16 : vector<8x608xi1>, vector<8x608xf32>
    %18 = arith.truncf %17 : vector<8x608xf32> to vector<8x608xbf16>
    %c0_17 = arith.constant 0 : index
    %c0_18 = arith.constant 0 : index
    %19 = vector.load %arg7[%c0_17, %c0_18] : memref<608x192xbf16, #tpu.memory_space<vmem>>, vector<608x192xbf16>
    %cst_19 = arith.constant dense<0.000000e+00> : vector<8x192xf32>
    %20 = tpu.matmul %18, %19, %cst_19 {dimension_numbers = #tpu.dot_dimension_numbers<[1], [0], [0], [1], [0, 0, 1, 1], [], []>} : vector<8x608xbf16>, vector<608x192xbf16>, vector<8x192xf32> -> vector<8x192xf32>
    %c0_20 = arith.constant 0 : index
    %c0_21 = arith.constant 0 : index
    %21 = vector.load %arg8[%c0_20, %c0_21] : memref<1x192xf32, #tpu.memory_space<vmem>>, vector<1x192xf32>
    %22 = vector.broadcast %21 : vector<1x192xf32> to vector<8x192xf32>
    %23 = arith.addf %20, %22 : vector<8x192xf32>
    %24 = arith.mulf %4, %4 : vector<8x192xf32>
    %cst_22 = arith.constant dense<0.000000e+00> : vector<8xf32>
    %25 = vector.multi_reduction <add>, %24, %cst_22 [1] : vector<8x192xf32> to vector<8xf32>
    %26 = vector.shape_cast %25 : vector<8xf32> to vector<8x1xf32>
    %cst_23 = arith.constant 9.99999993E-9 : f32
    %27 = vector.broadcast %cst_23 : f32 to vector<8x1xf32>
    %28 = arith.addf %27, %26 : vector<8x1xf32>
    %29 = math.rsqrt %28 : vector<8x1xf32>
    %30 = vector.broadcast %29 : vector<8x1xf32> to vector<8x192xf32>
    %31 = arith.mulf %4, %30 : vector<8x192xf32>
    %32 = arith.mulf %23, %23 : vector<8x192xf32>
    %cst_24 = arith.constant dense<0.000000e+00> : vector<8xf32>
    %33 = vector.multi_reduction <add>, %32, %cst_24 [1] : vector<8x192xf32> to vector<8xf32>
    %34 = vector.shape_cast %33 : vector<8xf32> to vector<8x1xf32>
    %cst_25 = arith.constant 9.99999993E-9 : f32
    %35 = vector.broadcast %cst_25 : f32 to vector<8x1xf32>
    %36 = arith.addf %35, %34 : vector<8x1xf32>
    %37 = math.rsqrt %36 : vector<8x1xf32>
    %38 = vector.broadcast %37 : vector<8x1xf32> to vector<8x192xf32>
    %39 = arith.mulf %23, %38 : vector<8x192xf32>
    %40 = arith.mulf %31, %39 : vector<8x192xf32>
    %cst_26 = arith.constant dense<0.000000e+00> : vector<8xf32>
    %41 = vector.multi_reduction <add>, %40, %cst_26 [1] : vector<8x192xf32> to vector<8xf32>
    %42 = vector.shape_cast %41 : vector<8xf32> to vector<8x1xf32>
    %cst_27 = arith.constant 0.000000e+00 : f32
    %43 = vector.broadcast %cst_27 : f32 to vector<8x1xf32>
    %44 = arith.subf %43, %42 : vector<8x1xf32>
    %cst_28 = arith.constant 1.000000e+00 : f32
    %45 = vector.broadcast %cst_28 : f32 to vector<8x1xf32>
    %46 = arith.mulf %44, %45 : vector<8x1xf32>
    %cst_29 = arith.constant dense<0.000000e+00> : vector<8x8xf32>
    %47 = tpu.matmul %31, %39, %cst_29 {dimension_numbers = #tpu.dot_dimension_numbers<[1], [1], [0], [0], [0, 0, 1, 0], [], []>} : vector<8x192xf32>, vector<8x192xf32>, vector<8x8xf32> -> vector<8x8xf32>
    %cst_30 = arith.constant 1.000000e+00 : f32
    %48 = vector.broadcast %cst_30 : f32 to vector<8x8xf32>
    %49 = arith.mulf %47, %48 : vector<8x8xf32>
    %cst_31 = arith.constant dense<0xFF800000> : vector<8xf32>
    %50 = vector.multi_reduction <maximumf>, %49, %cst_31 [1] : vector<8x8xf32> to vector<8xf32>
    %51 = vector.shape_cast %50 : vector<8xf32> to vector<8x1xf32>
    %52 = vector.broadcast %51 : vector<8x1xf32> to vector<8x8xf32>
    %53 = arith.subf %49, %52 : vector<8x8xf32>
    %54 = math.exp %53 : vector<8x8xf32>
    %cst_32 = arith.constant dense<0.000000e+00> : vector<8xf32>
    %55 = vector.multi_reduction <add>, %54, %cst_32 [1] : vector<8x8xf32> to vector<8xf32>
    %56 = vector.shape_cast %55 : vector<8xf32> to vector<8x1xf32>
    %57 = math.log %56 : vector<8x1xf32>
    %58 = arith.addf %51, %57 : vector<8x1xf32>
    %59 = arith.addf %46, %58 : vector<8x1xf32>
    %cst_33 = arith.constant dense<0.000000e+00> : vector<1xf32>
    %60 = vector.multi_reduction <add>, %59, %cst_33 [0] : vector<8x1xf32> to vector<1xf32>
    %61 = vector.shape_cast %60 : vector<1xf32> to vector<1x1xf32>
    %c0_34 = arith.constant 0 : index
    %c0_35 = arith.constant 0 : index
    %62 = vector.load %arg19[%c0_34, %c0_35] : memref<1x1xf32, #tpu.memory_space<vmem>>, vector<1x1xf32>
    tpu.vector_store %arg19[%c0_34, %c0_35], %61 {strides = array<i32>} : memref<1x1xf32, #tpu.memory_space<vmem>>, vector<1x1xf32>,
    %63 = arith.truncf %4 : vector<8x192xf32> to vector<8x192xbf16>
    %c0_36 = arith.constant 0 : index
    %c0_37 = arith.constant 0 : index
    %64 = vector.load %arg9[%c0_36, %c0_37] : memref<192x128xbf16, #tpu.memory_space<vmem>>, vector<192x128xbf16>
    %cst_38 = arith.constant dense<0.000000e+00> : vector<8x128xf32>
    %65 = tpu.matmul %63, %64, %cst_38 {dimension_numbers = #tpu.dot_dimension_numbers<[1], [0], [0], [1], [0, 0, 1, 1], [], []>} : vector<8x192xbf16>, vector<192x128xbf16>, vector<8x128xf32> -> vector<8x128xf32>
    %66 = arith.truncf %3 : vector<8x240xf32> to vector<8x240xbf16>
    %c0_39 = arith.constant 0 : index
    %c0_40 = arith.constant 0 : index
    %67 = vector.load %arg10[%c0_39, %c0_40] : memref<240x128xbf16, #tpu.memory_space<vmem>>, vector<240x128xbf16>
    %cst_41 = arith.constant dense<0.000000e+00> : vector<8x128xf32>
    %68 = tpu.matmul %66, %67, %cst_41 {dimension_numbers = #tpu.dot_dimension_numbers<[1], [0], [0], [1], [0, 0, 1, 1], [], []>} : vector<8x240xbf16>, vector<240x128xbf16>, vector<8x128xf32> -> vector<8x128xf32>
    %69 = arith.addf %65, %68 : vector<8x128xf32>
    %70 = arith.truncf %7 : vector<8x64xf32> to vector<8x64xbf16>
    %c0_42 = arith.constant 0 : index
    %c0_43 = arith.constant 0 : index
    %71 = vector.load %arg11[%c0_42, %c0_43] : memref<64x128xbf16, #tpu.memory_space<vmem>>, vector<64x128xbf16>
    %cst_44 = arith.constant dense<0.000000e+00> : vector<8x128xf32>
    %72 = tpu.matmul %70, %71, %cst_44 {dimension_numbers = #tpu.dot_dimension_numbers<[1], [0], [0], [1], [0, 0, 1, 1], [], []>} : vector<8x64xbf16>, vector<64x128xbf16>, vector<8x128xf32> -> vector<8x128xf32>
    %73 = arith.addf %69, %72 : vector<8x128xf32>
    %c0_45 = arith.constant 0 : index
    %c0_46 = arith.constant 0 : index
    %74 = vector.load %arg12[%c0_45, %c0_46] : memref<1x128xf32, #tpu.memory_space<vmem>>, vector<1x128xf32>
    %75 = vector.broadcast %74 : vector<1x128xf32> to vector<8x128xf32>
    %76 = arith.addf %73, %75 : vector<8x128xf32>
    %cst_47 = arith.constant 0.000000e+00 : f32
    %77 = vector.broadcast %cst_47 : f32 to vector<8x128xf32>
    %78 = arith.maximumf %76, %77 : vector<8x128xf32>
    %79 = arith.truncf %78 : vector<8x128xf32> to vector<8x128xbf16>
    %c0_48 = arith.constant 0 : index
    %c0_49 = arith.constant 0 : index
    %80 = vector.load %arg13[%c0_48, %c0_49] : memref<128x64xbf16, #tpu.memory_space<vmem>>, vector<128x64xbf16>
    %cst_50 = arith.constant dense<0.000000e+00> : vector<8x64xf32>
    %81 = tpu.matmul %79, %80, %cst_50 {dimension_numbers = #tpu.dot_dimension_numbers<[1], [0], [0], [1], [0, 0, 1, 1], [], []>} : vector<8x128xbf16>, vector<128x64xbf16>, vector<8x64xf32> -> vector<8x64xf32>
    %c0_51 = arith.constant 0 : index
    %c0_52 = arith.constant 0 : index
    %82 = vector.load %arg14[%c0_51, %c0_52] : memref<1x64xf32, #tpu.memory_space<vmem>>, vector<1x64xf32>
    %83 = vector.broadcast %82 : vector<1x64xf32> to vector<8x64xf32>
    %84 = arith.addf %81, %83 : vector<8x64xf32>
    %cst_53 = arith.constant 0.000000e+00 : f32
    %85 = vector.broadcast %cst_53 : f32 to vector<8x64xf32>
    %86 = arith.maximumf %84, %85 : vector<8x64xf32>
    %87 = arith.truncf %86 : vector<8x64xf32> to vector<8x64xbf16>
    %c0_54 = arith.constant 0 : index
    %c0_55 = arith.constant 0 : index
    %88 = vector.load %arg15[%c0_54, %c0_55] : memref<64x1xbf16, #tpu.memory_space<vmem>>, vector<64x1xbf16>
    %cst_56 = arith.constant dense<0.000000e+00> : vector<8x1xf32>
    %89 = tpu.matmul %87, %88, %cst_56 {dimension_numbers = #tpu.dot_dimension_numbers<[1], [0], [0], [1], [0, 0, 1, 1], [], []>} : vector<8x64xbf16>, vector<64x1xbf16>, vector<8x1xf32> -> vector<8x1xf32>
    %c0_57 = arith.constant 0 : index
    %c0_58 = arith.constant 0 : index
    %90 = vector.load %arg16[%c0_57, %c0_58] : memref<1x1xf32, #tpu.memory_space<vmem>>, vector<1x1xf32>
    %91 = vector.broadcast %90 : vector<1x1xf32> to vector<8x1xf32>
    %92 = arith.addf %89, %91 : vector<8x1xf32>
    %93 = arith.negf %92 : vector<8x1xf32>
    %94 = math.exp %93 : vector<8x1xf32>
    %cst_59 = arith.constant 1.000000e+00 : f32
    %95 = vector.broadcast %cst_59 : f32 to vector<8x1xf32>
    %96 = arith.addf %95, %94 : vector<8x1xf32>
    %97 = arith.divf %95, %96 : vector<8x1xf32>
    %cst_60 = arith.constant 1.000000e-07 : f32
    %cst_61 = arith.constant 0.99999988 : f32
    %98 = vector.broadcast %cst_60 : f32 to vector<8x1xf32>
    %99 = arith.maximumf %98, %97 : vector<8x1xf32>
    %100 = vector.broadcast %cst_61 : f32 to vector<8x1xf32>
    %101 = arith.minimumf %100, %99 : vector<8x1xf32>
    %c0_62 = arith.constant 0 : index
    %c0_63 = arith.constant 0 : index
    %102 = vector.load %arg17[%c0_62, %c0_63] : memref<8x1xf32, #tpu.memory_space<vmem>>, vector<8x1xf32>
    tpu.vector_store %arg17[%c0_62, %c0_63], %101 {strides = array<i32>} : memref<8x1xf32, #tpu.memory_space<vmem>>, vector<8x1xf32>,
    %c0_64 = arith.constant 0 : index
    %c0_65 = arith.constant 0 : index
    %103 = vector.load %arg3[%c0_64, %c0_65] : memref<8x1xf32, #tpu.memory_space<vmem>>, vector<8x1xf32>
    %104 = math.log %101 : vector<8x1xf32>
    %105 = arith.mulf %103, %104 : vector<8x1xf32>
    %cst_66 = arith.constant 1.000000e+00 : f32
    %106 = vector.broadcast %cst_66 : f32 to vector<8x1xf32>
    %107 = arith.subf %106, %103 : vector<8x1xf32>
    %cst_67 = arith.constant 1.000000e+00 : f32
    %108 = vector.broadcast %cst_67 : f32 to vector<8x1xf32>
    %109 = arith.subf %108, %101 : vector<8x1xf32>
    %110 = math.log %109 : vector<8x1xf32>
    %111 = arith.mulf %107, %110 : vector<8x1xf32>
    %112 = arith.addf %105, %111 : vector<8x1xf32>
    %cst_68 = arith.constant 0.000000e+00 : f32
    %113 = vector.broadcast %cst_68 : f32 to vector<8x1xf32>
    %114 = arith.subf %113, %112 : vector<8x1xf32>
    %cst_69 = arith.constant dense<0.000000e+00> : vector<1xf32>
    %115 = vector.multi_reduction <add>, %114, %cst_69 [0] : vector<8x1xf32> to vector<1xf32>
    %116 = vector.shape_cast %115 : vector<1xf32> to vector<1x1xf32>
    %cst_70 = arith.constant 1.250000e-01 : f32
    %117 = vector.broadcast %cst_70 : f32 to vector<1x1xf32>
    %118 = arith.mulf %116, %117 : vector<1x1xf32>
    %c0_71 = arith.constant 0 : index
    %c0_72 = arith.constant 0 : index
    %119 = vector.load %arg18[%c0_71, %c0_72] : memref<1x1xf32, #tpu.memory_space<vmem>>, vector<1x1xf32>
    tpu.vector_store %arg18[%c0_71, %c0_72], %118 {strides = array<i32>} : memref<1x1xf32, #tpu.memory_space<vmem>>, vector<1x1xf32>,
    return
  }
}

</mosaic_0001>

<bundles_post_ra>
// kernel: dnnegrec_forward.1
= control target key start
LH: loop header
LB: loop body
LE: loop exit
PB: predicated region body
PF: predicated region fallthrough
CT: control target
= control target key end

     0   :  { %s8347_s0 = inlined_call_operand.vmem [shape: f32[8,8,240], index: 0, kind: input, shape index: {}]   ;;  %s8348_s1 = inlined_call_operand.vmem [shape: f32[8,192], index: 1, kind: input, shape index: {}]   ;;  %s8349_s2 = inlined_call_operand.vmem [shape: bf16[8,1024], index: 2, kind: input, shape index: {}]   ;;  %s8350_s3 = inlined_call_operand.vmem [shape: f32[8,1], index: 3, kind: input, shape index: {}]   ;;  %s8351_s4 = inlined_call_operand.vmem [shape: bf16[1024,64], index: 4, kind: input, shape index: {}]   ;;  %s8352_s5 = inlined_call_operand.vmem [shape: bf16[1024,608], index: 5, kind: input, shape index: {}]   ;;  %s8353_s6 = inlined_call_operand.vmem [shape: f32[1,608], index: 6, kind: input, shape index: {}]   ;;  %s8354_s7 = inlined_call_operand.vmem [shape: bf16[608,192], index: 7, kind: input, shape index: {}]   ;;  %s8355_s8 = inlined_call_operand.vmem [shape: f32[1,192], index: 8, kind: input, shape index: {}]   ;;  %s8356_s9 = inlined_call_operand.vmem [shape: bf16[192,128], index: 9, kind: input, shape index: {}]   ;;  %s8357_s10 = inlined_call_operand.vmem [shape: bf16[240,128], index: 10, kind: input, shape index: {}]   ;;  %s8358_s11 = inlined_call_operand.vmem [shape: bf16[64,128], index: 11, kind: input, shape index: {}]   ;;  %s8359_s12 = inlined_call_operand.vmem [shape: f32[1,128], index: 12, kind: input, shape index: {}]   ;;  %s8360_s13 = inlined_call_operand.vmem [shape: bf16[128,64], index: 13, kind: input, shape index: {}]   ;;  %s8361_s14 = inlined_call_operand.vmem [shape: f32[1,64], index: 14, kind: input, shape index: {}]   ;;  %s8362_s15 = inlined_call_operand.vmem [shape: bf16[64,1], index: 15, kind: input, shape index: {}]   ;;  %s8363_s16 = inlined_call_operand.<no memory space> [shape: f32[1,1], index: 16, kind: input, shape index: {}]   ;;  %s8364_s17 = inlined_call_operand.vmem [shape: f32[8,1], index: 17, kind: output, shape index: {0}]   ;;  %s8365_s18 = inlined_call_operand.hbm [shape: f32[1,1], index: 18, kind: output, shape index: {1}]   ;;  %s8366_s19 = inlined_call_operand.hbm [shape: f32[1,1], index: 19, kind: output, shape index: {2}]  }
   0x1   :  { %8370 = sst [smem:[#allocation9_spill]] %s8347_s0  ;;  %v25_v0 = vstv %s8363_s16 }
   0x2   :  { %8371 = sst [smem:[#allocation10_spill]] %s8348_s1  ;;  %26 = vst [vmem:[#allocation2] sm:$0x1] %v25_v0 }
   0x3   :  { %8372 = sst [smem:[#allocation11_spill]] %s8349_s2 }
   0x4   :  { %8373 = sst [smem:[#allocation12_spill]] %s8350_s3 }
   0x5   :  { %27 = vsyncpa [#allocation4], 0  ;;  %v5697_v1 = vld [vmem:[%s8351_s4 + $0x78] sm:$0xff]   ;;  %v5701_v5 = vld [vmem:[%s8351_s4 + $0x70] sm:$0xff]   ;;  %s8374_s1 = sld [smem:[#allocation11_spill]] }
   0x6   :  { %v5698_v2 = vld [vmem:[%s8351_s4 + $0xf8] sm:$0xff]   ;;  %5453 = vmatprep.subr.bf16.mxu0 %v5697_v1  ;;  %v5702_v6 = vld [vmem:[%s8351_s4 + $0xf0] sm:$0xff]   ;;  %v5705_v9 = vld [vmem:[%s8351_s4 + $0x68] sm:$0xff]  }
   0x7   :  { %v5699_v3 = vld [vmem:[%s8351_s4 + $0x38] sm:$0xff]   ;;  %5475 = vmatprep.subr.bf16.mxu1 %v5698_v2  ;;  %v5703_v7 = vld [vmem:[%s8351_s4 + $0x30] sm:$0xff]   ;;  %v5706_v10 = vld [vmem:[%s8351_s4 + $0xe8] sm:$0xff]  }
   0x8   :  { %v5700_v4 = vld [vmem:[%s8351_s4 + $0xb8] sm:$0xff]   ;;  %5454 = vmatpush3.bf16.msra.mxu0 %v5699_v3  ;;  %v5704_v8 = vld [vmem:[%s8351_s4 + $0xb0] sm:$0xff]   ;;  %v5707_v11 = vld [vmem:[%s8351_s4 + $0x28] sm:$0xff]  }
   0x9   :  { %5476 = vmatpush3.bf16.msra.mxu1 %v5700_v4  ;;  %5455 = vmatprep.subr.bf16.mxu0 %v5701_v5  ;;  %v5708_v12 = vld [vmem:[%s8351_s4 + $0xa8] sm:$0xff]   ;;  %v5709_v13 = vld [vmem:[%s8351_s4 + $0x60] sm:$0xff]   ;;  %v5713_v17 = vld [vmem:[%s8351_s4 + $0x58] sm:$0xff]  }
   0xa   :  { %5477 = vmatprep.subr.bf16.mxu1 %v5702_v6  ;;  %v5710_v14 = vld [vmem:[%s8351_s4 + $0xe0] sm:$0xff]   ;;  %v5714_v18 = vld [vmem:[%s8351_s4 + $0xd8] sm:$0xff]   ;;  %v5717_v21 = vld [vmem:[%s8351_s4 + $0x50] sm:$0xff]  }
   0xb   :  { %v5711_v15 = vld [vmem:[%s8351_s4 + $0x20] sm:$0xff]   ;;  %v5715_v19 = vld [vmem:[%s8351_s4 + $0x18] sm:$0xff]   ;;  %v5718_v22 = vld [vmem:[%s8351_s4 + $0xd0] sm:$0xff]  }
   0xc   :  { %5456 = vmatpush3.bf16.msra.mxu0 %v5703_v7  ;;  %v5712_v16 = vld [vmem:[%s8351_s4 + $0xa0] sm:$0xff]   ;;  %v5716_v20 = vld [vmem:[%s8351_s4 + $0x98] sm:$0xff]   ;;  %v5719_v23 = vld [vmem:[%s8351_s4 + $0x10] sm:$0xff]  }
   0xd   :  { %5478 = vmatpush3.bf16.msra.mxu1 %v5704_v8  ;;  %5457 = vmatprep.subr.bf16.mxu0 %v5705_v9  ;;  %v5720_v24 = vld [vmem:[%s8351_s4 + $0x90] sm:$0xff]   ;;  %v5721_v25 = vld [vmem:[%s8351_s4 + $0x48] sm:$0xff]   ;;  %v5725_v29 = vld [vmem:[%s8351_s4 + $0x40] sm:$0xff]  }
   0xe   :  { %5479 = vmatprep.subr.bf16.mxu1 %v5706_v10  ;;  %v5722_v26 = vld [vmem:[%s8351_s4 + $0xc8] sm:$0xff]   ;;  %v5726_v30 = vld [vmem:[%s8351_s4 + $0xc0] sm:$0xff]   ;;  %v5733_v39 = vld [vmem:[%s8351_s4 + $0x178] sm:$0xff]  }
   0xf   :  { %v5723_v27 = vld [vmem:[%s8351_s4 + $0x8] sm:$0xff]   ;;  %v5727_v31 = vld [vmem:[%s8351_s4] sm:$0xff]   ;;  %v5734_v40 = vld [vmem:[%s8351_s4 + $0x1f8] sm:$0xff]  }
  0x10   :  { %5458 = vmatpush3.bf16.msra.mxu0 %v5707_v11  ;;  %v5724_v28 = vld [vmem:[%s8351_s4 + $0x88] sm:$0xff]   ;;  %v5728_v32 = vld [vmem:[%s8351_s4 + $0x80] sm:$0xff]   ;;  %v5735_v41 = vld [vmem:[%s8351_s4 + $0x138] sm:$0xff]  }
  0x11   :  { %5480 = vmatpush3.bf16.msra.mxu1 %v5708_v12  ;;  %5459 = vmatprep.subr.bf16.mxu0 %v5709_v13  ;;  %v203_v33 = vld [vmem:[%s8374_s1] sm:$0xff]  ;;  %v204_v34 = vld [vmem:[%s8374_s1 + $0x8] sm:$0xff]  ;;  %v5736_v42 = vld [vmem:[%s8351_s4 + $0x1b8] sm:$0xff]  }
  0x12   :  { %5481 = vmatprep.subr.bf16.mxu1 %v5710_v14  ;;  %v6645_v35 = vcombine.high %v203_v33, %v203_v33  ;;  %v6647_v36 = vcombine.high %v204_v34, %v204_v34  ;;  %v6649_v37 = vcombine.low %v203_v33, %v203_v33  ;;  %v6651_v38 = vcombine.low %v204_v34, %v204_v34  ;;  %v5737_v43 = vld [vmem:[%s8351_s4 + $0x170] sm:$0xff]   ;;  %v5741_v47 = vld [vmem:[%s8351_s4 + $0x168] sm:$0xff]   ;;  %v5745_v51 = vld [vmem:[%s8351_s4 + $0x160] sm:$0xff]  }
  0x13   :  { %v5738_v44 = vld [vmem:[%s8351_s4 + $0x1f0] sm:$0xff]   ;;  %v5742_v48 = vld [vmem:[%s8351_s4 + $0x1e8] sm:$0xff]   ;;  %v5746_v52 = vld [vmem:[%s8351_s4 + $0x1e0] sm:$0xff]  }
  0x14   :  { %5460 = vmatpush3.bf16.msra.mxu0 %v5711_v15  ;;  %779 = vmatprep.mubr.bf16.mxu0 %v6645_v35  ;;  %v5739_v45 = vld [vmem:[%s8351_s4 + $0x130] sm:$0xff]   ;;  %v5743_v49 = vld [vmem:[%s8351_s4 + $0x128] sm:$0xff]   ;;  %v5747_v53 = vld [vmem:[%s8351_s4 + $0x120] sm:$0xff]  }
  0x15   :  { %5482 = vmatpush3.bf16.msra.mxu1 %v5712_v16  ;;  %5461 = vmatprep.subr.bf16.mxu0 %v5713_v17  ;;  %v5740_v46 = vld [vmem:[%s8351_s4 + $0x1b0] sm:$0xff]   ;;  %v5744_v50 = vld [vmem:[%s8351_s4 + $0x1a8] sm:$0xff]   ;;  %v5748_v54 = vld [vmem:[%s8351_s4 + $0x1a0] sm:$0xff]  }
  0x16   :  { %5483 = vmatprep.subr.bf16.mxu1 %v5714_v18  ;;  %819 = vmatprep.mubr.bf16.mxu1 %v6647_v36  ;;  %v5749_v55 = vld [vmem:[%s8351_s4 + $0x158] sm:$0xff]   ;;  %v5753_v59 = vld [vmem:[%s8351_s4 + $0x150] sm:$0xff]   ;;  %v5757_v63 = vld [vmem:[%s8351_s4 + $0x148] sm:$0xff]  }
  0x17   :  { %v5750_v56 = vld [vmem:[%s8351_s4 + $0x1d8] sm:$0xff]   ;;  %v5754_v60 = vld [vmem:[%s8351_s4 + $0x1d0] sm:$0xff]   ;;  %v5758_v0 = vld [vmem:[%s8351_s4 + $0x1c8] sm:$0xff]  }
  0x18   :  { %5462 = vmatpush3.bf16.msra.mxu0 %v5715_v19  ;;  %v5751_v57 = vld [vmem:[%s8351_s4 + $0x118] sm:$0xff]   ;;  %v5755_v61 = vld [vmem:[%s8351_s4 + $0x110] sm:$0xff]   ;;  %v5759_v1 = vld [vmem:[%s8351_s4 + $0x108] sm:$0xff]  }
  0x19   :  { %5484 = vmatpush3.bf16.msra.mxu1 %v5716_v20  ;;  %5463 = vmatprep.subr.bf16.mxu0 %v5717_v21  ;;  %v5752_v58 = vld [vmem:[%s8351_s4 + $0x198] sm:$0xff]   ;;  %v5756_v62 = vld [vmem:[%s8351_s4 + $0x190] sm:$0xff]   ;;  %v5760_v2 = vld [vmem:[%s8351_s4 + $0x188] sm:$0xff]  }
  0x1a   :  { %5485 = vmatprep.subr.bf16.mxu1 %v5718_v22  ;;  %v5761_v3 = vld [vmem:[%s8351_s4 + $0x140] sm:$0xff]   ;;  %v205_v7 = vld [vmem:[%s8374_s1 + $0x10] sm:$0xff]  ;;  %v206_v9 = vld [vmem:[%s8374_s1 + $0x18] sm:$0xff] }
  0x1b   :  { %v5762_v4 = vld [vmem:[%s8351_s4 + $0x1c0] sm:$0xff]   ;;  %v6756_v8 = vcombine.high %v205_v7, %v205_v7  ;;  %v6761_v10 = vcombine.low %v205_v7, %v205_v7  ;;  %v6763_v11 = vcombine.high %v206_v9, %v206_v9  ;;  %v6765_v12 = vcombine.low %v206_v9, %v206_v9  ;;  %v5769_v13 = vld [vmem:[%s8352_s5 + $0x118] ss:$20 sps:$4 sm:$0xff]   ;;  %v5771_v14 = vld [vmem:[%s8352_s5 + $0x11c] ss:$20 sps:$4 sm:$0xff]  }
  0x1c   :  { %5464 = vmatpush3.bf16.msra.mxu0 %v5719_v23  ;;  %v5763_v5 = vld [vmem:[%s8351_s4 + $0x100] sm:$0xff]   ;;  %v5772_v15 = vld [vmem:[%s8352_s5 + $0x398] ss:$20 sps:$4 sm:$0xff]   ;;  %v5774_v16 = vld [vmem:[%s8352_s5 + $0x39c] ss:$20 sps:$4 sm:$0xff]  }
  0x1d   :  { %5486 = vmatpush3.bf16.msra.mxu1 %v5720_v24  ;;  %5465 = vmatprep.subr.bf16.mxu0 %v5721_v25  ;;  %v5764_v6 = vld [vmem:[%s8351_s4 + $0x180] sm:$0xff]   ;;  %v5777_v17 = vld [vmem:[%s8352_s5 + $0xf4] ss:$20 sps:$4 sm:$0xff]  }
  0x1e   :  { %5487 = vmatprep.subr.bf16.mxu1 %v5722_v26  ;;  %v5775_v18 = vld [vmem:[%s8352_s5 + $0xf0] ss:$20 sps:$4 sm:$0xff]   ;;  %v5780_v19 = vld [vmem:[%s8352_s5 + $0x374] ss:$20 sps:$4 sm:$0xff]   ;;  %v5783_v21 = vld [vmem:[%s8352_s5 + $0xcc] ss:$20 sps:$4 sm:$0xff]  }
  0x1f   :  { %v5778_v20 = vld [vmem:[%s8352_s5 + $0x370] ss:$20 sps:$4 sm:$0xff]   ;;  %v5786_v22 = vld [vmem:[%s8352_s5 + $0x34c] ss:$20 sps:$4 sm:$0xff]   ;;  %v5781_v23 = vld [vmem:[%s8352_s5 + $0xc8] ss:$20 sps:$4 sm:$0xff]  }
  0x20   :  { %5466 = vmatpush3.bf16.msra.mxu0 %v5723_v27  ;;  %v5784_v24 = vld [vmem:[%s8352_s5 + $0x348] ss:$20 sps:$4 sm:$0xff]   ;;  %v5789_v25 = vld [vmem:[%s8352_s5 + $0xa4] ss:$20 sps:$4 sm:$0xff]   ;;  %v5787_v27 = vld [vmem:[%s8352_s5 + $0xa0] ss:$20 sps:$4 sm:$0xff]  }
  0x21   :  { %5488 = vmatpush3.bf16.msra.mxu1 %v5724_v28  ;;  %5467 = vmatprep.subr.bf16.mxu0 %v5725_v29  ;;  %v5792_v26 = vld [vmem:[%s8352_s5 + $0x324] ss:$20 sps:$4 sm:$0xff]   ;;  %v5790_v28 = vld [vmem:[%s8352_s5 + $0x320] ss:$20 sps:$4 sm:$0xff]   ;;  %v5795_v29 = vld [vmem:[%s8352_s5 + $0x7c] ss:$20 sps:$4 sm:$0xff]  }
  0x22   :  { %5489 = vmatprep.subr.bf16.mxu1 %v5726_v30  ;;  %v5798_v30 = vld [vmem:[%s8352_s5 + $0x2fc] ss:$20 sps:$4 sm:$0xff]   ;;  %v5801_v33 = vld [vmem:[%s8352_s5 + $0x54] ss:$20 sps:$4 sm:$0xff]  }
  0x23   :  { %v5804_v34 = vld [vmem:[%s8352_s5 + $0x2d4] ss:$20 sps:$4 sm:$0xff]   ;;  %v5847_v7 = vld [vmem:[%s8352_s5 + $0x190] ss:$20 sps:$4 sm:$0xff]  }
  0x24   :  { %5468 = vmatpush3.bf16.msra.mxu0 %v5727_v31  ;;  %v5793_v31 = vld [vmem:[%s8352_s5 + $0x78] ss:$20 sps:$4 sm:$0xff]   ;;  %v5850_v9 = vld [vmem:[%s8352_s5 + $0x410] ss:$20 sps:$4 sm:$0xff]  }
  0x25   :  { %5490 = vmatpush3.bf16.msra.mxu1 %v5728_v32  ;;  %5497 = vmatprep.subr.bf16.mxu0 %v5733_v39  ;;  %v5796_v32 = vld [vmem:[%s8352_s5 + $0x2f8] ss:$20 sps:$4 sm:$0xff]   ;;  %v5799_v39 = vld [vmem:[%s8352_s5 + $0x50] ss:$20 sps:$4 sm:$0xff]  }
  0x26   :  { %5519 = vmatprep.subr.bf16.mxu1 %v5734_v40  ;;  %v5802_v40 = vld [vmem:[%s8352_s5 + $0x2d0] ss:$20 sps:$4 sm:$0xff]  }
  0x27   :  { %780 = vmatmul.mubr.bf16.vlgmr.msra.gmra.mxu0 %v6649_v37 }
  0x28   :  { %820 = vmatmul.mubr.bf16.vlgmr.msra.gmra.mxu1 %v6651_v38  ;;  %5498 = vmatpush3.bf16.msra.mxu0 %v5735_v41  ;;  %v5807_v41 = vld [vmem:[%s8352_s5 + $0x2c] ss:$20 sps:$4 sm:$0xff]  }
  0x29   :  { %5520 = vmatpush3.bf16.msra.mxu1 %v5736_v42  ;;  %5499 = vmatprep.subr.bf16.mxu0 %v5737_v43  ;;  %v5810_v42 = vld [vmem:[%s8352_s5 + $0x2ac] ss:$20 sps:$4 sm:$0xff]   ;;  %v5805_v43 = vld [vmem:[%s8352_s5 + $0x28] ss:$20 sps:$4 sm:$0xff]  }
  0x2a   :  { %5521 = vmatprep.subr.bf16.mxu1 %v5738_v44  ;;  %859 = vmatprep.mubr.bf16.mxu0 %v6756_v8  ;;  %v5808_v44 = vld [vmem:[%s8352_s5 + $0x2a8] ss:$20 sps:$4 sm:$0xff]  }
  0x2b   :  { %899 = vmatprep.mubr.bf16.mxu1 %v6763_v11 }
  0x2c   :  { %5500 = vmatpush3.bf16.msra.mxu0 %v5739_v45  ;;  %v5813_v45 = vld [vmem:[%s8352_s5 + $0x4] ss:$20 sps:$4 sm:$0xff]  }
  0x2d   :  { %5522 = vmatpush3.bf16.msra.mxu1 %v5740_v46  ;;  %5501 = vmatprep.subr.bf16.mxu0 %v5741_v47  ;;  %v5816_v46 = vld [vmem:[%s8352_s5 + $0x284] ss:$20 sps:$4 sm:$0xff]   ;;  %v5811_v47 = vld [vmem:[%s8352_s5] ss:$20 sps:$4 sm:$0xff]  }
  0x2e   :  { %5523 = vmatprep.subr.bf16.mxu1 %v5742_v48  ;;  %v5814_v48 = vld [vmem:[%s8352_s5 + $0x280] ss:$20 sps:$4 sm:$0xff]  }
  0x30   :  { %5502 = vmatpush3.bf16.msra.mxu0 %v5743_v49  ;;  %v5819_v49 = vld [vmem:[%s8352_s5 + $0x25c] ss:$20 sps:$4 sm:$0xff]  }
  0x31   :  { %5524 = vmatpush3.bf16.msra.mxu1 %v5744_v50  ;;  %5503 = vmatprep.subr.bf16.mxu0 %v5745_v51  ;;  %v5822_v50 = vld [vmem:[%s8352_s5 + $0x4dc] ss:$20 sps:$4 sm:$0xff]   ;;  %v5817_v51 = vld [vmem:[%s8352_s5 + $0x258] ss:$20 sps:$4 sm:$0xff]  }
  0x32   :  { %5525 = vmatprep.subr.bf16.mxu1 %v5746_v52  ;;  %v5820_v52 = vld [vmem:[%s8352_s5 + $0x4d8] ss:$20 sps:$4 sm:$0xff]  }
  0x34   :  { %5504 = vmatpush3.bf16.msra.mxu0 %v5747_v53  ;;  %v5825_v53 = vld [vmem:[%s8352_s5 + $0x234] ss:$20 sps:$4 sm:$0xff]  }
  0x35   :  { %5526 = vmatpush3.bf16.msra.mxu1 %v5748_v54  ;;  %5505 = vmatprep.subr.bf16.mxu0 %v5749_v55  ;;  %v5828_v54 = vld [vmem:[%s8352_s5 + $0x4b4] ss:$20 sps:$4 sm:$0xff]   ;;  %v5823_v55 = vld [vmem:[%s8352_s5 + $0x230] ss:$20 sps:$4 sm:$0xff]  }
  0x36   :  { %5527 = vmatprep.subr.bf16.mxu1 %v5750_v56  ;;  %v5826_v56 = vld [vmem:[%s8352_s5 + $0x4b0] ss:$20 sps:$4 sm:$0xff]  }
  0x38   :  { %5506 = vmatpush3.bf16.msra.mxu0 %v5751_v57  ;;  %v5831_v57 = vld [vmem:[%s8352_s5 + $0x20c] ss:$20 sps:$4 sm:$0xff]  }
  0x39   :  { %5528 = vmatpush3.bf16.msra.mxu1 %v5752_v58  ;;  %5507 = vmatprep.subr.bf16.mxu0 %v5753_v59  ;;  %v5834_v58 = vld [vmem:[%s8352_s5 + $0x48c] ss:$20 sps:$4 sm:$0xff]   ;;  %v5829_v59 = vld [vmem:[%s8352_s5 + $0x208] ss:$20 sps:$4 sm:$0xff]  }
  0x3a   :  { %5529 = vmatprep.subr.bf16.mxu1 %v5754_v60  ;;  %v5832_v60 = vld [vmem:[%s8352_s5 + $0x488] ss:$20 sps:$4 sm:$0xff]  }
  0x3c   :  { %5508 = vmatpush3.bf16.msra.mxu0 %v5755_v61  ;;  %v5837_v61 = vld [vmem:[%s8352_s5 + $0x1e4] ss:$20 sps:$4 sm:$0xff]  }
  0x3d   :  { %5530 = vmatpush3.bf16.msra.mxu1 %v5756_v62  ;;  %5509 = vmatprep.subr.bf16.mxu0 %v5757_v63  ;;  %v5840_v62 = vld [vmem:[%s8352_s5 + $0x464] ss:$20 sps:$4 sm:$0xff]   ;;  %v5835_v63 = vld [vmem:[%s8352_s5 + $0x1e0] ss:$20 sps:$4 sm:$0xff]  }
  0x3e   :  { %5531 = vmatprep.subr.bf16.mxu1 %v5758_v0  ;;  %v5838_v0 = vld [vmem:[%s8352_s5 + $0x460] ss:$20 sps:$4 sm:$0xff]  }
  0x40   :  { %5510 = vmatpush3.bf16.msra.mxu0 %v5759_v1  ;;  %v5843_v1 = vld [vmem:[%s8352_s5 + $0x1bc] ss:$20 sps:$4 sm:$0xff]  }
  0x41   :  { %5532 = vmatpush3.bf16.msra.mxu1 %v5760_v2  ;;  %5511 = vmatprep.subr.bf16.mxu0 %v5761_v3  ;;  %v5846_v2 = vld [vmem:[%s8352_s5 + $0x43c] ss:$20 sps:$4 sm:$0xff]   ;;  %v5841_v3 = vld [vmem:[%s8352_s5 + $0x1b8] ss:$20 sps:$4 sm:$0xff]  }
  0x42   :  { %5533 = vmatprep.subr.bf16.mxu1 %v5762_v4  ;;  %v5844_v4 = vld [vmem:[%s8352_s5 + $0x438] ss:$20 sps:$4 sm:$0xff]  }
  0x44   :  { %5512 = vmatpush3.bf16.msra.mxu0 %v5763_v5  ;;  %v5849_v5 = vld [vmem:[%s8352_s5 + $0x194] ss:$20 sps:$4 sm:$0xff]  }
  0x45   :  { %5534 = vmatpush3.bf16.msra.mxu1 %v5764_v6  ;;  %2982 = vmatprep.subr.bf16.mxu0 %v5771_v14  ;;  %v5852_v6 = vld [vmem:[%s8352_s5 + $0x414] ss:$20 sps:$4 sm:$0xff]   ;;  %v5858_v14 = vld [vmem:[%s8352_s5 + $0x3ec] ss:$20 sps:$4 sm:$0xff]  }
  0x46   :  { %3023 = vmatprep.subr.bf16.mxu1 %v5774_v16  ;;  %v5856_v16 = vld [vmem:[%s8352_s5 + $0x3e8] ss:$20 sps:$4 sm:$0xff]  }
  0x47   :  { %860 = vmatmul.mubr.bf16.vlgmr.msra.gmra.mxu0 %v6761_v10 }
  0x48   :  { %900 = vmatmul.mubr.bf16.vlgmr.msra.gmra.mxu1 %v6765_v12  ;;  %2983 = vmatpush1.bf16.msra.mxu0 %v5769_v13  ;;  %v5855_v13 = vld [vmem:[%s8352_s5 + $0x16c] ss:$20 sps:$4 sm:$0xff]  }
  0x49   :  { %3024 = vmatpush1.bf16.msra.mxu1 %v5772_v15  ;;  %2984 = vmatprep.subr.bf16.mxu0 %v5777_v17  ;;  %v5853_v15 = vld [vmem:[%s8352_s5 + $0x168] ss:$20 sps:$4 sm:$0xff]   ;;  %v5861_v17 = vld [vmem:[%s8352_s5 + $0x144] ss:$20 sps:$4 sm:$0xff]  }
  0x4a   :  { %3025 = vmatprep.subr.bf16.mxu1 %v5780_v19  ;;  %3014 = vmatprep.mubr.bf16.mxu0 %v6645_v35  ;;  %v5859_v19 = vld [vmem:[%s8352_s5 + $0x140] ss:$20 sps:$4 sm:$0xff]  }
  0x4b   :  { %3055 = vmatprep.mubr.bf16.mxu1 %v6647_v36 }
  0x4c   :  { %2985 = vmatpush1.bf16.msra.mxu0 %v5775_v18  ;;  %v5864_v18 = vld [vmem:[%s8352_s5 + $0x3c4] ss:$20 sps:$4 sm:$0xff]  }
  0x4d   :  { %3026 = vmatpush1.bf16.msra.mxu1 %v5778_v20  ;;  %2986 = vmatprep.subr.bf16.mxu0 %v5783_v21  ;;  %v5862_v20 = vld [vmem:[%s8352_s5 + $0x3c0] ss:$20 sps:$4 sm:$0xff]   ;;  %v5867_v21 = vld [vmem:[%s8352_s5 + $0x61c] ss:$20 sps:$4 sm:$0xff]  }
  0x4e   :  { %3027 = vmatprep.subr.bf16.mxu1 %v5786_v22  ;;  %v5870_v22 = vld [vmem:[%s8352_s5 + $0x89c] ss:$20 sps:$4 sm:$0xff]  }
  0x50   :  { %2987 = vmatpush1.bf16.msra.mxu0 %v5781_v23  ;;  %v5865_v23 = vld [vmem:[%s8352_s5 + $0x618] ss:$20 sps:$4 sm:$0xff]  }
  0x51   :  { %3028 = vmatpush1.bf16.msra.mxu1 %v5784_v24  ;;  %2988 = vmatprep.subr.bf16.mxu0 %v5789_v25  ;;  %v5868_v24 = vld [vmem:[%s8352_s5 + $0x898] ss:$20 sps:$4 sm:$0xff]   ;;  %v5873_v25 = vld [vmem:[%s8352_s5 + $0x5f4] ss:$20 sps:$4 sm:$0xff]  }
  0x52   :  { %3029 = vmatprep.subr.bf16.mxu1 %v5792_v26  ;;  %v5876_v26 = vld [vmem:[%s8352_s5 + $0x874] ss:$20 sps:$4 sm:$0xff]  }
  0x54   :  { %2989 = vmatpush1.bf16.msra.mxu0 %v5787_v27  ;;  %v5871_v27 = vld [vmem:[%s8352_s5 + $0x5f0] ss:$20 sps:$4 sm:$0xff]  }
  0x55   :  { %3030 = vmatpush1.bf16.msra.mxu1 %v5790_v28  ;;  %2990 = vmatprep.subr.bf16.mxu0 %v5795_v29  ;;  %v5874_v28 = vld [vmem:[%s8352_s5 + $0x870] ss:$20 sps:$4 sm:$0xff]   ;;  %v5879_v29 = vld [vmem:[%s8352_s5 + $0x5cc] ss:$20 sps:$4 sm:$0xff]  }
  0x56   :  { %3031 = vmatprep.subr.bf16.mxu1 %v5798_v30  ;;  %v5882_v30 = vld [vmem:[%s8352_s5 + $0x84c] ss:$20 sps:$4 sm:$0xff]  }
  0x58   :  { %2991 = vmatpush1.bf16.msra.mxu0 %v5793_v31  ;;  %v5877_v31 = vld [vmem:[%s8352_s5 + $0x5c8] ss:$20 sps:$4 sm:$0xff]  }
  0x59   :  { %3032 = vmatpush1.bf16.msra.mxu1 %v5796_v32  ;;  %2992 = vmatprep.subr.bf16.mxu0 %v5801_v33  ;;  %v5880_v32 = vld [vmem:[%s8352_s5 + $0x848] ss:$20 sps:$4 sm:$0xff]   ;;  %v5885_v33 = vld [vmem:[%s8352_s5 + $0x5a4] ss:$20 sps:$4 sm:$0xff]  }
  0x5a   :  { %3033 = vmatprep.subr.bf16.mxu1 %v5804_v34  ;;  %v5888_v34 = vld [vmem:[%s8352_s5 + $0x824] ss:$20 sps:$4 sm:$0xff]  }
  0x5c   :  { %2993 = vmatpush1.bf16.msra.mxu0 %v5799_v39  ;;  %v5883_v39 = vld [vmem:[%s8352_s5 + $0x5a0] ss:$20 sps:$4 sm:$0xff]  }
  0x5d   :  { %3034 = vmatpush1.bf16.msra.mxu1 %v5802_v40  ;;  %2994 = vmatprep.subr.bf16.mxu0 %v5807_v41  ;;  %v5886_v40 = vld [vmem:[%s8352_s5 + $0x820] ss:$20 sps:$4 sm:$0xff]   ;;  %v5891_v41 = vld [vmem:[%s8352_s5 + $0x57c] ss:$20 sps:$4 sm:$0xff]  }
  0x5e   :  { %3035 = vmatprep.subr.bf16.mxu1 %v5810_v42  ;;  %v5894_v42 = vld [vmem:[%s8352_s5 + $0x7fc] ss:$20 sps:$4 sm:$0xff]  }
  0x60   :  { %2995 = vmatpush1.bf16.msra.mxu0 %v5805_v43  ;;  %v5889_v43 = vld [vmem:[%s8352_s5 + $0x578] ss:$20 sps:$4 sm:$0xff]  }
  0x61   :  { %3036 = vmatpush1.bf16.msra.mxu1 %v5808_v44  ;;  %2996 = vmatprep.subr.bf16.mxu0 %v5813_v45  ;;  %v5892_v44 = vld [vmem:[%s8352_s5 + $0x7f8] ss:$20 sps:$4 sm:$0xff]   ;;  %v5897_v45 = vld [vmem:[%s8352_s5 + $0x554] ss:$20 sps:$4 sm:$0xff]  }
  0x62   :  { %3037 = vmatprep.subr.bf16.mxu1 %v5816_v46  ;;  %v5900_v46 = vld [vmem:[%s8352_s5 + $0x7d4] ss:$20 sps:$4 sm:$0xff]  }
  0x64   :  { %2997 = vmatpush1.bf16.msra.mxu0 %v5811_v47  ;;  %v5895_v47 = vld [vmem:[%s8352_s5 + $0x550] ss:$20 sps:$4 sm:$0xff]  }
  0x65   :  { %3038 = vmatpush1.bf16.msra.mxu1 %v5814_v48  ;;  %2998 = vmatprep.subr.bf16.mxu0 %v5819_v49  ;;  %v5898_v48 = vld [vmem:[%s8352_s5 + $0x7d0] ss:$20 sps:$4 sm:$0xff]   ;;  %v5903_v49 = vld [vmem:[%s8352_s5 + $0x52c] ss:$20 sps:$4 sm:$0xff]  }
  0x66   :  { %3039 = vmatprep.subr.bf16.mxu1 %v5822_v50  ;;  %v5906_v50 = vld [vmem:[%s8352_s5 + $0x7ac] ss:$20 sps:$4 sm:$0xff]  }
  0x68   :  { %2999 = vmatpush2.bf16.msra.mxu0 %v5817_v51  ;;  %v5901_v51 = vld [vmem:[%s8352_s5 + $0x528] ss:$20 sps:$4 sm:$0xff]  }
  0x69   :  { %3040 = vmatpush2.bf16.msra.mxu1 %v5820_v52  ;;  %3000 = vmatprep.subr.bf16.mxu0 %v5825_v53  ;;  %v5904_v52 = vld [vmem:[%s8352_s5 + $0x7a8] ss:$20 sps:$4 sm:$0xff]   ;;  %v5909_v53 = vld [vmem:[%s8352_s5 + $0x504] ss:$20 sps:$4 sm:$0xff]  }
  0x6a   :  { %3041 = vmatprep.subr.bf16.mxu1 %v5828_v54  ;;  %v5912_v54 = vld [vmem:[%s8352_s5 + $0x784] ss:$20 sps:$4 sm:$0xff]  }
  0x6c   :  { %3001 = vmatpush2.bf16.msra.mxu0 %v5823_v55  ;;  %v5907_v55 = vld [vmem:[%s8352_s5 + $0x500] ss:$20 sps:$4 sm:$0xff]  }
  0x6d   :  { %3042 = vmatpush2.bf16.msra.mxu1 %v5826_v56  ;;  %3002 = vmatprep.subr.bf16.mxu0 %v5831_v57  ;;  %v5910_v56 = vld [vmem:[%s8352_s5 + $0x780] ss:$20 sps:$4 sm:$0xff]   ;;  %v5915_v57 = vld [vmem:[%s8352_s5 + $0x75c] ss:$20 sps:$4 sm:$0xff]  }
  0x6e   :  { %3043 = vmatprep.subr.bf16.mxu1 %v5834_v58  ;;  %v5918_v58 = vld [vmem:[%s8352_s5 + $0x9dc] ss:$20 sps:$4 sm:$0xff]  }
  0x70   :  { %3003 = vmatpush2.bf16.msra.mxu0 %v5829_v59  ;;  %v5913_v59 = vld [vmem:[%s8352_s5 + $0x758] ss:$20 sps:$4 sm:$0xff]  }
  0x71   :  { %3044 = vmatpush2.bf16.msra.mxu1 %v5832_v60  ;;  %3004 = vmatprep.subr.bf16.mxu0 %v5837_v61  ;;  %v5916_v60 = vld [vmem:[%s8352_s5 + $0x9d8] ss:$20 sps:$4 sm:$0xff]   ;;  %v5921_v61 = vld [vmem:[%s8352_s5 + $0x734] ss:$20 sps:$4 sm:$0xff]  }
  0x72   :  { %3045 = vmatprep.subr.bf16.mxu1 %v5840_v62  ;;  %v5924_v62 = vld [vmem:[%s8352_s5 + $0x9b4] ss:$20 sps:$4 sm:$0xff]  }
  0x74   :  { %3005 = vmatpush2.bf16.msra.mxu0 %v5835_v63  ;;  %v5919_v63 = vld [vmem:[%s8352_s5 + $0x730] ss:$20 sps:$4 sm:$0xff]  }
  0x75   :  { %3046 = vmatpush2.bf16.msra.mxu1 %v5838_v0  ;;  %3006 = vmatprep.subr.bf16.mxu0 %v5843_v1  ;;  %v5922_v0 = vld [vmem:[%s8352_s5 + $0x9b0] ss:$20 sps:$4 sm:$0xff]   ;;  %v5927_v1 = vld [vmem:[%s8352_s5 + $0x70c] ss:$20 sps:$4 sm:$0xff]  }
  0x76   :  { %3047 = vmatprep.subr.bf16.mxu1 %v5846_v2  ;;  %v5930_v2 = vld [vmem:[%s8352_s5 + $0x98c] ss:$20 sps:$4 sm:$0xff]  }
  0x78   :  { %3007 = vmatpush2.bf16.msra.mxu0 %v5841_v3  ;;  %v5925_v3 = vld [vmem:[%s8352_s5 + $0x708] ss:$20 sps:$4 sm:$0xff]  }
  0x79   :  { %3048 = vmatpush2.bf16.msra.mxu1 %v5844_v4  ;;  %3008 = vmatprep.subr.bf16.mxu0 %v5849_v5  ;;  %v5928_v4 = vld [vmem:[%s8352_s5 + $0x988] ss:$20 sps:$4 sm:$0xff]   ;;  %v5933_v5 = vld [vmem:[%s8352_s5 + $0x6e4] ss:$20 sps:$4 sm:$0xff]  }
  0x7a   :  { %3049 = vmatprep.subr.bf16.mxu1 %v5852_v6  ;;  %v5936_v6 = vld [vmem:[%s8352_s5 + $0x964] ss:$20 sps:$4 sm:$0xff]  }
  0x7c   :  { %3009 = vmatpush2.bf16.msra.mxu0 %v5847_v7  ;;  %v5931_v7 = vld [vmem:[%s8352_s5 + $0x6e0] ss:$20 sps:$4 sm:$0xff]  }
  0x7d   :  { %3050 = vmatpush2.bf16.msra.mxu1 %v5850_v9  ;;  %3010 = vmatprep.subr.bf16.mxu0 %v5855_v13  ;;  %v5934_v9 = vld [vmem:[%s8352_s5 + $0x960] ss:$20 sps:$4 sm:$0xff]   ;;  %v5939_v13 = vld [vmem:[%s8352_s5 + $0x6bc] ss:$20 sps:$4 sm:$0xff]  }
  0x7e   :  { %3051 = vmatprep.subr.bf16.mxu1 %v5858_v14  ;;  %v5942_v14 = vld [vmem:[%s8352_s5 + $0x93c] ss:$20 sps:$4 sm:$0xff]  }
  0x80   :  { %3011 = vmatpush2.bf16.msra.mxu0 %v5853_v15  ;;  %v5937_v15 = vld [vmem:[%s8352_s5 + $0x6b8] ss:$20 sps:$4 sm:$0xff]  }
  0x81   :  { %3052 = vmatpush2.bf16.msra.mxu1 %v5856_v16  ;;  %3012 = vmatprep.subr.bf16.mxu0 %v5861_v17  ;;  %v5940_v16 = vld [vmem:[%s8352_s5 + $0x938] ss:$20 sps:$4 sm:$0xff]   ;;  %v5945_v17 = vld [vmem:[%s8352_s5 + $0x694] ss:$20 sps:$4 sm:$0xff]  }
  0x82   :  { %3053 = vmatprep.subr.bf16.mxu1 %v5864_v18  ;;  %v5948_v18 = vld [vmem:[%s8352_s5 + $0x914] ss:$20 sps:$4 sm:$0xff]  }
  0x84   :  { %3013 = vmatpush2.bf16.msra.mxu0 %v5859_v19  ;;  %v5943_v19 = vld [vmem:[%s8352_s5 + $0x690] ss:$20 sps:$4 sm:$0xff]  }
  0x85   :  { %3054 = vmatpush2.bf16.msra.mxu1 %v5862_v20  ;;  %3064 = vmatprep.subr.bf16.mxu0 %v5867_v21  ;;  %v5946_v20 = vld [vmem:[%s8352_s5 + $0x910] ss:$20 sps:$4 sm:$0xff]   ;;  %v5951_v21 = vld [vmem:[%s8352_s5 + $0x66c] ss:$20 sps:$4 sm:$0xff]  }
  0x86   :  { %3105 = vmatprep.subr.bf16.mxu1 %v5870_v22  ;;  %v5954_v22 = vld [vmem:[%s8352_s5 + $0x8ec] ss:$20 sps:$4 sm:$0xff]  }
  0x87   :  { %3015 = vmatmul.mubr.bf16.vlgmr.msra.gmra.mxu0 %v6649_v37 }
  0x88   :  { %3056 = vmatmul.mubr.bf16.vlgmr.msra.gmra.mxu1 %v6651_v38  ;;  %3065 = vmatpush1.bf16.msra.mxu0 %v5865_v23  ;;  %v5949_v23 = vld [vmem:[%s8352_s5 + $0x668] ss:$20 sps:$4 sm:$0xff]  }
  0x89   :  { %3106 = vmatpush1.bf16.msra.mxu1 %v5868_v24  ;;  %3066 = vmatprep.subr.bf16.mxu0 %v5873_v25  ;;  %v5952_v24 = vld [vmem:[%s8352_s5 + $0x8e8] ss:$20 sps:$4 sm:$0xff]   ;;  %v5957_v25 = vld [vmem:[%s8352_s5 + $0x644] ss:$20 sps:$4 sm:$0xff]  }
  0x8a   :  { %3107 = vmatprep.subr.bf16.mxu1 %v5876_v26  ;;  %3096 = vmatprep.mubr.bf16.mxu0 %v6756_v8  ;;  %v5960_v26 = vld [vmem:[%s8352_s5 + $0x8c4] ss:$20 sps:$4 sm:$0xff]  }
  0x8b   :  { %3137 = vmatprep.mubr.bf16.mxu1 %v6763_v11 }
  0x8c   :  { %3067 = vmatpush1.bf16.msra.mxu0 %v5871_v27  ;;  %v5955_v27 = vld [vmem:[%s8352_s5 + $0x640] ss:$20 sps:$4 sm:$0xff]  }
  0x8d   :  { %3108 = vmatpush1.bf16.msra.mxu1 %v5874_v28  ;;  %3068 = vmatprep.subr.bf16.mxu0 %v5879_v29  ;;  %v5958_v28 = vld [vmem:[%s8352_s5 + $0x8c0] ss:$20 sps:$4 sm:$0xff]   ;;  %v5963_v29 = vld [vmem:[%s8352_s5 + $0x124] ss:$20 sps:$4 sm:$0xff]  }
  0x8e   :  { %3109 = vmatprep.subr.bf16.mxu1 %v5882_v30  ;;  %v5966_v30 = vld [vmem:[%s8352_s5 + $0x3a4] ss:$20 sps:$4 sm:$0xff]  }
  0x90   :  { %3069 = vmatpush1.bf16.msra.mxu0 %v5877_v31  ;;  %v5961_v31 = vld [vmem:[%s8352_s5 + $0x120] ss:$20 sps:$4 sm:$0xff]  }
  0x91   :  { %3110 = vmatpush1.bf16.msra.mxu1 %v5880_v32  ;;  %3070 = vmatprep.subr.bf16.mxu0 %v5885_v33  ;;  %v5964_v32 = vld [vmem:[%s8352_s5 + $0x3a0] ss:$20 sps:$4 sm:$0xff]   ;;  %v5969_v33 = vld [vmem:[%s8352_s5 + $0xfc] ss:$20 sps:$4 sm:$0xff]  }
  0x92   :  { %3111 = vmatprep.subr.bf16.mxu1 %v5888_v34  ;;  %v5972_v34 = vld [vmem:[%s8352_s5 + $0x37c] ss:$20 sps:$4 sm:$0xff]  }
  0x94   :  { %3071 = vmatpush1.bf16.msra.mxu0 %v5883_v39  ;;  %v5967_v39 = vld [vmem:[%s8352_s5 + $0xf8] ss:$20 sps:$4 sm:$0xff]  }
  0x95   :  { %3112 = vmatpush1.bf16.msra.mxu1 %v5886_v40  ;;  %3072 = vmatprep.subr.bf16.mxu0 %v5891_v41  ;;  %v5970_v40 = vld [vmem:[%s8352_s5 + $0x378] ss:$20 sps:$4 sm:$0xff]   ;;  %v5975_v41 = vld [vmem:[%s8352_s5 + $0xd4] ss:$20 sps:$4 sm:$0xff]  }
  0x96   :  { %3113 = vmatprep.subr.bf16.mxu1 %v5894_v42  ;;  %v5978_v42 = vld [vmem:[%s8352_s5 + $0x354] ss:$20 sps:$4 sm:$0xff]  }
  0x98   :  { %3073 = vmatpush1.bf16.msra.mxu0 %v5889_v43  ;;  %v5973_v43 = vld [vmem:[%s8352_s5 + $0xd0] ss:$20 sps:$4 sm:$0xff]  }
  0x99   :  { %3114 = vmatpush1.bf16.msra.mxu1 %v5892_v44  ;;  %3074 = vmatprep.subr.bf16.mxu0 %v5897_v45  ;;  %v5976_v44 = vld [vmem:[%s8352_s5 + $0x350] ss:$20 sps:$4 sm:$0xff]   ;;  %v5981_v45 = vld [vmem:[%s8352_s5 + $0xac] ss:$20 sps:$4 sm:$0xff]  }
  0x9a   :  { %3115 = vmatprep.subr.bf16.mxu1 %v5900_v46  ;;  %v5984_v46 = vld [vmem:[%s8352_s5 + $0x32c] ss:$20 sps:$4 sm:$0xff]  }
  0x9c   :  { %3075 = vmatpush1.bf16.msra.mxu0 %v5895_v47  ;;  %v5979_v47 = vld [vmem:[%s8352_s5 + $0xa8] ss:$20 sps:$4 sm:$0xff]  }
  0x9d   :  { %3116 = vmatpush1.bf16.msra.mxu1 %v5898_v48  ;;  %3076 = vmatprep.subr.bf16.mxu0 %v5903_v49  ;;  %v5982_v48 = vld [vmem:[%s8352_s5 + $0x328] ss:$20 sps:$4 sm:$0xff]   ;;  %v5987_v49 = vld [vmem:[%s8352_s5 + $0x84] ss:$20 sps:$4 sm:$0xff]  }
  0x9e   :  { %3117 = vmatprep.subr.bf16.mxu1 %v5906_v50  ;;  %v5990_v50 = vld [vmem:[%s8352_s5 + $0x304] ss:$20 sps:$4 sm:$0xff]  }
  0xa0   :  { %3077 = vmatpush1.bf16.msra.mxu0 %v5901_v51  ;;  %v5985_v51 = vld [vmem:[%s8352_s5 + $0x80] ss:$20 sps:$4 sm:$0xff]  }
  0xa1   :  { %3118 = vmatpush1.bf16.msra.mxu1 %v5904_v52  ;;  %3078 = vmatprep.subr.bf16.mxu0 %v5909_v53  ;;  %v5988_v52 = vld [vmem:[%s8352_s5 + $0x300] ss:$20 sps:$4 sm:$0xff]   ;;  %v5993_v53 = vld [vmem:[%s8352_s5 + $0x5c] ss:$20 sps:$4 sm:$0xff]  }
  0xa2   :  { %3119 = vmatprep.subr.bf16.mxu1 %v5912_v54  ;;  %v5996_v54 = vld [vmem:[%s8352_s5 + $0x2dc] ss:$20 sps:$4 sm:$0xff]  }
  0xa4   :  { %3079 = vmatpush1.bf16.msra.mxu0 %v5907_v55  ;;  %v5991_v55 = vld [vmem:[%s8352_s5 + $0x58] ss:$20 sps:$4 sm:$0xff]  }
  0xa5   :  { %3120 = vmatpush1.bf16.msra.mxu1 %v5910_v56  ;;  %3080 = vmatprep.subr.bf16.mxu0 %v5915_v57  ;;  %v5994_v56 = vld [vmem:[%s8352_s5 + $0x2d8] ss:$20 sps:$4 sm:$0xff]   ;;  %v5999_v57 = vld [vmem:[%s8352_s5 + $0x34] ss:$20 sps:$4 sm:$0xff]  }
  0xa6   :  { %3121 = vmatprep.subr.bf16.mxu1 %v5918_v58  ;;  %v6002_v58 = vld [vmem:[%s8352_s5 + $0x2b4] ss:$20 sps:$4 sm:$0xff]  }
  0xa8   :  { %3081 = vmatpush2.bf16.msra.mxu0 %v5913_v59  ;;  %v5997_v59 = vld [vmem:[%s8352_s5 + $0x30] ss:$20 sps:$4 sm:$0xff]  }
  0xa9   :  { %3122 = vmatpush2.bf16.msra.mxu1 %v5916_v60  ;;  %3082 = vmatprep.subr.bf16.mxu0 %v5921_v61  ;;  %v6000_v60 = vld [vmem:[%s8352_s5 + $0x2b0] ss:$20 sps:$4 sm:$0xff]   ;;  %v6005_v61 = vld [vmem:[%s8352_s5 + $0xc] ss:$20 sps:$4 sm:$0xff]  }
  0xaa   :  { %3123 = vmatprep.subr.bf16.mxu1 %v5924_v62  ;;  %v6008_v62 = vld [vmem:[%s8352_s5 + $0x28c] ss:$20 sps:$4 sm:$0xff]  }
  0xac   :  { %3083 = vmatpush2.bf16.msra.mxu0 %v5919_v63  ;;  %v6003_v63 = vld [vmem:[%s8352_s5 + $0x8] ss:$20 sps:$4 sm:$0xff]  }
  0xad   :  { %3124 = vmatpush2.bf16.msra.mxu1 %v5922_v0  ;;  %3084 = vmatprep.subr.bf16.mxu0 %v5927_v1  ;;  %v6006_v0 = vld [vmem:[%s8352_s5 + $0x288] ss:$20 sps:$4 sm:$0xff]   ;;  %v6011_v1 = vld [vmem:[%s8352_s5 + $0x264] ss:$20 sps:$4 sm:$0xff]  }
  0xae   :  { %3125 = vmatprep.subr.bf16.mxu1 %v5930_v2  ;;  %v6014_v2 = vld [vmem:[%s8352_s5 + $0x4e4] ss:$20 sps:$4 sm:$0xff]  }
  0xb0   :  { %3085 = vmatpush2.bf16.msra.mxu0 %v5925_v3  ;;  %v6009_v3 = vld [vmem:[%s8352_s5 + $0x260] ss:$20 sps:$4 sm:$0xff]  }
  0xb1   :  { %3126 = vmatpush2.bf16.msra.mxu1 %v5928_v4  ;;  %3086 = vmatprep.subr.bf16.mxu0 %v5933_v5  ;;  %v6012_v4 = vld [vmem:[%s8352_s5 + $0x4e0] ss:$20 sps:$4 sm:$0xff]   ;;  %v6017_v5 = vld [vmem:[%s8352_s5 + $0x23c] ss:$20 sps:$4 sm:$0xff]  }
  0xb2   :  { %3127 = vmatprep.subr.bf16.mxu1 %v5936_v6 }
  0xb4   :  { %3087 = vmatpush2.bf16.msra.mxu0 %v5931_v7 }
  0xb5   :  { %3128 = vmatpush2.bf16.msra.mxu1 %v5934_v9  ;;  %3088 = vmatprep.subr.bf16.mxu0 %v5939_v13  ;;  %v6020_v9 = vld [vmem:[%s8352_s5 + $0x4bc] ss:$20 sps:$4 sm:$0xff]  }
  0xb6   :  { %3129 = vmatprep.subr.bf16.mxu1 %v5942_v14 }
  0xb8   :  { %3089 = vmatpush2.bf16.msra.mxu0 %v5937_v15  ;;  %v6015_v15 = vld [vmem:[%s8352_s5 + $0x238] ss:$20 sps:$4 sm:$0xff]  }
  0xb9   :  { %3130 = vmatpush2.bf16.msra.mxu1 %v5940_v16  ;;  %3090 = vmatprep.subr.bf16.mxu0 %v5945_v17 }
  0xba   :  { %3131 = vmatprep.subr.bf16.mxu1 %v5948_v18  ;;  %v6018_v18 = vld [vmem:[%s8352_s5 + $0x4b8] ss:$20 sps:$4 sm:$0xff]  }
  0xbc   :  { %3091 = vmatpush2.bf16.msra.mxu0 %v5943_v19  ;;  %v6023_v19 = vld [vmem:[%s8352_s5 + $0x214] ss:$20 sps:$4 sm:$0xff]  }
  0xbd   :  { %3132 = vmatpush2.bf16.msra.mxu1 %v5946_v20  ;;  %3092 = vmatprep.subr.bf16.mxu0 %v5951_v21 }
  0xbe   :  { %3133 = vmatprep.subr.bf16.mxu1 %v5954_v22  ;;  %v6026_v22 = vld [vmem:[%s8352_s5 + $0x494] ss:$20 sps:$4 sm:$0xff]  }
  0xc0   :  { %3093 = vmatpush2.bf16.msra.mxu0 %v5949_v23 }
  0xc1   :  { %3134 = vmatpush2.bf16.msra.mxu1 %v5952_v24  ;;  %3094 = vmatprep.subr.bf16.mxu0 %v5957_v25 }
  0xc2   :  { %3135 = vmatprep.subr.bf16.mxu1 %v5960_v26  ;;  %v6021_v26 = vld [vmem:[%s8352_s5 + $0x210] ss:$20 sps:$4 sm:$0xff]  }
  0xc4   :  { %3095 = vmatpush2.bf16.msra.mxu0 %v5955_v27  ;;  %v6024_v27 = vld [vmem:[%s8352_s5 + $0x490] ss:$20 sps:$4 sm:$0xff]  }
  0xc5   :  { %3136 = vmatpush2.bf16.msra.mxu1 %v5958_v28  ;;  %3146 = vmatprep.subr.bf16.mxu0 %v5963_v29  ;;  %v6029_v28 = vld [vmem:[%s8352_s5 + $0x1ec] ss:$20 sps:$4 sm:$0xff]  }
  0xc6   :  { %3187 = vmatprep.subr.bf16.mxu1 %v5966_v30  ;;  %v6032_v29 = vld [vmem:[%s8352_s5 + $0x46c] ss:$20 sps:$4 sm:$0xff]   ;;  %v6027_v30 = vld [vmem:[%s8352_s5 + $0x1e8] ss:$20 sps:$4 sm:$0xff]  }
  0xc7   :  { %3097 = vmatmul.mubr.bf16.vlgmr.msra.gmra.mxu0 %v6761_v10 }
  0xc8   :  { %3138 = vmatmul.mubr.bf16.vlgmr.msra.gmra.mxu1 %v6765_v12  ;;  %3147 = vmatpush1.bf16.msra.mxu0 %v5961_v31  ;;  %v6030_v31 = vld [vmem:[%s8352_s5 + $0x468] ss:$20 sps:$4 sm:$0xff]  }
  0xc9   :  { %3188 = vmatpush1.bf16.msra.mxu1 %v5964_v32  ;;  %3148 = vmatprep.subr.bf16.mxu0 %v5969_v33  ;;  %v6035_v32 = vld [vmem:[%s8352_s5 + $0x1c4] ss:$20 sps:$4 sm:$0xff]  }
  0xca   :  { %3189 = vmatprep.subr.bf16.mxu1 %v5972_v34  ;;  %3178 = vmatprep.mubr.bf16.mxu0 %v6645_v35  ;;  %v6038_v33 = vld [vmem:[%s8352_s5 + $0x444] ss:$20 sps:$4 sm:$0xff]   ;;  %v6033_v34 = vld [vmem:[%s8352_s5 + $0x1c0] ss:$20 sps:$4 sm:$0xff]  }
  0xcb   :  { %3219 = vmatprep.mubr.bf16.mxu1 %v6647_v36 }
  0xcc   :  { %3149 = vmatpush1.bf16.msra.mxu0 %v5967_v39  ;;  %v6036_v39 = vld [vmem:[%s8352_s5 + $0x440] ss:$20 sps:$4 sm:$0xff]  }
  0xcd   :  { %3190 = vmatpush1.bf16.msra.mxu1 %v5970_v40  ;;  %3150 = vmatprep.subr.bf16.mxu0 %v5975_v41  ;;  %v6041_v40 = vld [vmem:[%s8352_s5 + $0x19c] ss:$20 sps:$4 sm:$0xff]  }
  0xce   :  { %3191 = vmatprep.subr.bf16.mxu1 %v5978_v42  ;;  %v6044_v41 = vld [vmem:[%s8352_s5 + $0x41c] ss:$20 sps:$4 sm:$0xff]   ;;  %v6039_v42 = vld [vmem:[%s8352_s5 + $0x198] ss:$20 sps:$4 sm:$0xff]  }
  0xd0   :  { %3151 = vmatpush1.bf16.msra.mxu0 %v5973_v43  ;;  %v6042_v43 = vld [vmem:[%s8352_s5 + $0x418] ss:$20 sps:$4 sm:$0xff]  }
  0xd1   :  { %3192 = vmatpush1.bf16.msra.mxu1 %v5976_v44  ;;  %3152 = vmatprep.subr.bf16.mxu0 %v5981_v45  ;;  %v6047_v44 = vld [vmem:[%s8352_s5 + $0x174] ss:$20 sps:$4 sm:$0xff]  }
  0xd2   :  { %3193 = vmatprep.subr.bf16.mxu1 %v5984_v46  ;;  %v6050_v45 = vld [vmem:[%s8352_s5 + $0x3f4] ss:$20 sps:$4 sm:$0xff]   ;;  %v6045_v46 = vld [vmem:[%s8352_s5 + $0x170] ss:$20 sps:$4 sm:$0xff]  }
  0xd4   :  { %3153 = vmatpush1.bf16.msra.mxu0 %v5979_v47  ;;  %v6048_v47 = vld [vmem:[%s8352_s5 + $0x3f0] ss:$20 sps:$4 sm:$0xff]  }
  0xd5   :  { %3194 = vmatpush1.bf16.msra.mxu1 %v5982_v48  ;;  %3154 = vmatprep.subr.bf16.mxu0 %v5987_v49  ;;  %v6053_v48 = vld [vmem:[%s8352_s5 + $0x14c] ss:$20 sps:$4 sm:$0xff]  }
  0xd6   :  { %3195 = vmatprep.subr.bf16.mxu1 %v5990_v50  ;;  %v6056_v49 = vld [vmem:[%s8352_s5 + $0x3cc] ss:$20 sps:$4 sm:$0xff]   ;;  %v6051_v50 = vld [vmem:[%s8352_s5 + $0x148] ss:$20 sps:$4 sm:$0xff]  }
  0xd8   :  { %3155 = vmatpush1.bf16.msra.mxu0 %v5985_v51  ;;  %v6054_v51 = vld [vmem:[%s8352_s5 + $0x3c8] ss:$20 sps:$4 sm:$0xff]  }
  0xd9   :  { %3196 = vmatpush1.bf16.msra.mxu1 %v5988_v52  ;;  %3156 = vmatprep.subr.bf16.mxu0 %v5993_v53  ;;  %v6059_v52 = vld [vmem:[%s8352_s5 + $0x624] ss:$20 sps:$4 sm:$0xff]  }
  0xda   :  { %3197 = vmatprep.subr.bf16.mxu1 %v5996_v54  ;;  %v6062_v53 = vld [vmem:[%s8352_s5 + $0x8a4] ss:$20 sps:$4 sm:$0xff]   ;;  %v6057_v54 = vld [vmem:[%s8352_s5 + $0x620] ss:$20 sps:$4 sm:$0xff]  }
  0xdc   :  { %3157 = vmatpush1.bf16.msra.mxu0 %v5991_v55  ;;  %v6060_v55 = vld [vmem:[%s8352_s5 + $0x8a0] ss:$20 sps:$4 sm:$0xff]  }
  0xdd   :  { %3198 = vmatpush1.bf16.msra.mxu1 %v5994_v56  ;;  %3158 = vmatprep.subr.bf16.mxu0 %v5999_v57  ;;  %v6065_v56 = vld [vmem:[%s8352_s5 + $0x5fc] ss:$20 sps:$4 sm:$0xff]  }
  0xde   :  { %3199 = vmatprep.subr.bf16.mxu1 %v6002_v58  ;;  %v6068_v57 = vld [vmem:[%s8352_s5 + $0x87c] ss:$20 sps:$4 sm:$0xff]  }
  0xe0   :  { %3159 = vmatpush1.bf16.msra.mxu0 %v5997_v59 }
  0xe1   :  { %3200 = vmatpush1.bf16.msra.mxu1 %v6000_v60  ;;  %3160 = vmatprep.subr.bf16.mxu0 %v6005_v61  ;;  %v6063_v60 = vld [vmem:[%s8352_s5 + $0x5f8] ss:$20 sps:$4 sm:$0xff]  }
  0xe2   :  { %3201 = vmatprep.subr.bf16.mxu1 %v6008_v62  ;;  %v6066_v61 = vld [vmem:[%s8352_s5 + $0x878] ss:$20 sps:$4 sm:$0xff]  }
  0xe4   :  { %3161 = vmatpush1.bf16.msra.mxu0 %v6003_v63 }
  0xe5   :  { %3202 = vmatpush1.bf16.msra.mxu1 %v6006_v0  ;;  %3162 = vmatprep.subr.bf16.mxu0 %v6011_v1  ;;  %v6071_v0 = vld [vmem:[%s8352_s5 + $0x5d4] ss:$20 sps:$4 sm:$0xff]  }
  0xe6   :  { %3203 = vmatprep.subr.bf16.mxu1 %v6014_v2 }
  0xe7   :  { %v5469_v6 = vpop.f32.mrf.mxu0 }
  0xe8   :  { %v5491_v7 = vpop.f32.mrf.mxu1  ;;  %3163 = vmatpush2.bf16.msra.mxu0 %v6009_v3  ;;  %v6074_v3 = vld [vmem:[%s8352_s5 + $0x854] ss:$20 sps:$4 sm:$0xff]  }
  0xe9   :  { %v5470_v13 = vpop.f32.mrf.mxu0  ;;  %3204 = vmatpush2.bf16.msra.mxu1 %v6012_v4  ;;  %3164 = vmatprep.subr.bf16.mxu0 %v6017_v5 }
  0xea   :  { %v5492_v14 = vpop.f32.mrf.mxu1  ;;  %v5471_v16 = vadd.f32 %v5470_v13, %v5469_v6  ;;  %3205 = vmatprep.subr.bf16.mxu1 %v6020_v9  ;;  %v6069_v6 = vld [vmem:[%s8352_s5 + $0x5d0] ss:$20 sps:$4 sm:$0xff]  }
  0xeb   :  { %v5493_v17 = vadd.f32 %v5492_v14, %v5491_v7  ;;  %v5472_v20 = vpop.f32.mrf.mxu0  ;;  %v6072_v9 = vld [vmem:[%s8352_s5 + $0x850] ss:$20 sps:$4 sm:$0xff]  }
  0xec   :  { %v5494_v21 = vpop.f32.mrf.mxu1  ;;  %3165 = vmatpush2.bf16.msra.mxu0 %v6015_v15  ;;  %v6077_v15 = vld [vmem:[%s8352_s5 + $0x5ac] ss:$20 sps:$4 sm:$0xff]   ;;  %v6083_v20 = vld [vmem:[%s8352_s5 + $0x584] ss:$20 sps:$4 sm:$0xff]  }
  0xed   :  { %v7291_v23 = vadd.f32 %v5493_v17, %v5471_v16  ;;  %v5473_v24 = vpop.f32.mrf.mxu0  ;;  %3206 = vmatpush2.bf16.msra.mxu1 %v6018_v18  ;;  %3166 = vmatprep.subr.bf16.mxu0 %v6023_v19  ;;  %v6080_v17 = vld [vmem:[%s8352_s5 + $0x82c] ss:$20 sps:$4 sm:$0xff]   ;;  %v6075_v18 = vld [vmem:[%s8352_s5 + $0x5a8] ss:$20 sps:$4 sm:$0xff]   ;;  %v6086_v21 = vld [vmem:[%s8352_s5 + $0x804] ss:$20 sps:$4 sm:$0xff]  }
  0xee   :  { %v5495_v25 = vpop.f32.mrf.mxu1  ;;  %3207 = vmatprep.subr.bf16.mxu1 %v6026_v22  ;;  %v6078_v19 = vld [vmem:[%s8352_s5 + $0x828] ss:$20 sps:$4 sm:$0xff]   ;;  %v6081_v22 = vld [vmem:[%s8352_s5 + $0x580] ss:$20 sps:$4 sm:$0xff]  }
  0xef   :  { %v6089_v24 = vld [vmem:[%s8352_s5 + $0x55c] ss:$20 sps:$4 sm:$0xff]  }
  0xf0   :  { %3167 = vmatpush2.bf16.msra.mxu0 %v6021_v26  ;;  %v6092_v25 = vld [vmem:[%s8352_s5 + $0x7dc] ss:$20 sps:$4 sm:$0xff]   ;;  %v6087_v26 = vld [vmem:[%s8352_s5 + $0x558] ss:$20 sps:$4 sm:$0xff]  }
  0xf1   :  { %3208 = vmatpush2.bf16.msra.mxu1 %v6024_v27  ;;  %3168 = vmatprep.subr.bf16.mxu0 %v6029_v28  ;;  %v6090_v27 = vld [vmem:[%s8352_s5 + $0x7d8] ss:$20 sps:$4 sm:$0xff]   ;;  %v6095_v28 = vld [vmem:[%s8352_s5 + $0x534] ss:$20 sps:$4 sm:$0xff]  }
  0xf2   :  { %3209 = vmatprep.subr.bf16.mxu1 %v6032_v29  ;;  %v6098_v29 = vld [vmem:[%s8352_s5 + $0x7b4] ss:$20 sps:$4 sm:$0xff]  }
  0xf4   :  { %3169 = vmatpush2.bf16.msra.mxu0 %v6027_v30  ;;  %v6093_v30 = vld [vmem:[%s8352_s5 + $0x530] ss:$20 sps:$4 sm:$0xff]  }
  0xf5   :  { %3210 = vmatpush2.bf16.msra.mxu1 %v6030_v31  ;;  %3170 = vmatprep.subr.bf16.mxu0 %v6035_v32  ;;  %v6096_v31 = vld [vmem:[%s8352_s5 + $0x7b0] ss:$20 sps:$4 sm:$0xff]   ;;  %v6101_v32 = vld [vmem:[%s8352_s5 + $0x50c] ss:$20 sps:$4 sm:$0xff]  }
  0xf6   :  { %3211 = vmatprep.subr.bf16.mxu1 %v6038_v33  ;;  %v6104_v33 = vld [vmem:[%s8352_s5 + $0x78c] ss:$20 sps:$4 sm:$0xff]  }
  0xf8   :  { %3171 = vmatpush2.bf16.msra.mxu0 %v6033_v34  ;;  %v6099_v34 = vld [vmem:[%s8352_s5 + $0x508] ss:$20 sps:$4 sm:$0xff]  }
  0xf9   :  { %3212 = vmatpush2.bf16.msra.mxu1 %v6036_v39  ;;  %3172 = vmatprep.subr.bf16.mxu0 %v6041_v40  ;;  %v6102_v39 = vld [vmem:[%s8352_s5 + $0x788] ss:$20 sps:$4 sm:$0xff]   ;;  %v6107_v40 = vld [vmem:[%s8352_s5 + $0x764] ss:$20 sps:$4 sm:$0xff]  }
  0xfa   :  { %3213 = vmatprep.subr.bf16.mxu1 %v6044_v41  ;;  %v6110_v41 = vld [vmem:[%s8352_s5 + $0x9e4] ss:$20 sps:$4 sm:$0xff]  }
  0xfc   :  { %3173 = vmatpush2.bf16.msra.mxu0 %v6039_v42  ;;  %v6105_v42 = vld [vmem:[%s8352_s5 + $0x760] ss:$20 sps:$4 sm:$0xff]  }
  0xfd   :  { %3214 = vmatpush2.bf16.msra.mxu1 %v6042_v43  ;;  %3174 = vmatprep.subr.bf16.mxu0 %v6047_v44  ;;  %v6108_v43 = vld [vmem:[%s8352_s5 + $0x9e0] ss:$20 sps:$4 sm:$0xff]   ;;  %v6113_v44 = vld [vmem:[%s8352_s5 + $0x73c] ss:$20 sps:$4 sm:$0xff]  }
  0xfe   :  { %3215 = vmatprep.subr.bf16.mxu1 %v6050_v45  ;;  %v6116_v45 = vld [vmem:[%s8352_s5 + $0x9bc] ss:$20 sps:$4 sm:$0xff]  }
 0x100   :  { %3175 = vmatpush2.bf16.msra.mxu0 %v6045_v46  ;;  %v6111_v46 = vld [vmem:[%s8352_s5 + $0x738] ss:$20 sps:$4 sm:$0xff]  }
 0x101   :  { %3216 = vmatpush2.bf16.msra.mxu1 %v6048_v47  ;;  %3176 = vmatprep.subr.bf16.mxu0 %v6053_v48  ;;  %v6114_v47 = vld [vmem:[%s8352_s5 + $0x9b8] ss:$20 sps:$4 sm:$0xff]   ;;  %v6119_v48 = vld [vmem:[%s8352_s5 + $0x714] ss:$20 sps:$4 sm:$0xff]  }
 0x102   :  { %3217 = vmatprep.subr.bf16.mxu1 %v6056_v49  ;;  %v6122_v49 = vld [vmem:[%s8352_s5 + $0x994] ss:$20 sps:$4 sm:$0xff]  }
 0x104   :  { %3177 = vmatpush2.bf16.msra.mxu0 %v6051_v50  ;;  %v6117_v50 = vld [vmem:[%s8352_s5 + $0x710] ss:$20 sps:$4 sm:$0xff]  }
 0x105   :  { %3218 = vmatpush2.bf16.msra.mxu1 %v6054_v51  ;;  %3228 = vmatprep.subr.bf16.mxu0 %v6059_v52  ;;  %v6120_v51 = vld [vmem:[%s8352_s5 + $0x990] ss:$20 sps:$4 sm:$0xff]   ;;  %v6125_v52 = vld [vmem:[%s8352_s5 + $0x6ec] ss:$20 sps:$4 sm:$0xff]  }
 0x106   :  { %3269 = vmatprep.subr.bf16.mxu1 %v6062_v53  ;;  %v6128_v53 = vld [vmem:[%s8352_s5 + $0x96c] ss:$20 sps:$4 sm:$0xff]  }
 0x107   :  { %v5513_v58 = vpop.f32.mrf.mxu0  ;;  %3179 = vmatmul.mubr.bf16.vlgmr.msra.gmra.mxu0 %v6649_v37 }
 0x108   :  { %v5535_v59 = vpop.f32.mrf.mxu1  ;;  %3220 = vmatmul.mubr.bf16.vlgmr.msra.gmra.mxu1 %v6651_v38  ;;  %3229 = vmatpush1.bf16.msra.mxu0 %v6057_v54  ;;  %v6123_v54 = vld [vmem:[%s8352_s5 + $0x6e8] ss:$20 sps:$4 sm:$0xff]  }
 0x109   :  { %3270 = vmatpush1.bf16.msra.mxu1 %v6060_v55  ;;  %v5514_v62 = vpop.f32.mrf.mxu0  ;;  %3230 = vmatprep.subr.bf16.mxu0 %v6065_v56  ;;  %v6126_v55 = vld [vmem:[%s8352_s5 + $0x968] ss:$20 sps:$4 sm:$0xff]   ;;  %v6131_v56 = vld [vmem:[%s8352_s5 + $0x6c4] ss:$20 sps:$4 sm:$0xff]  }
 0x10a   :  { %v5536_v63 = vpop.f32.mrf.mxu1  ;;  %v5515_v1 = vadd.f32 %v5514_v62, %v5513_v58  ;;  %3271 = vmatprep.subr.bf16.mxu1 %v6068_v57  ;;  %3260 = vmatprep.mubr.bf16.mxu0 %v6756_v8  ;;  %v6134_v57 = vld [vmem:[%s8352_s5 + $0x944] ss:$20 sps:$4 sm:$0xff]   ;;  %v6129_v58 = vld [vmem:[%s8352_s5 + $0x6c0] ss:$20 sps:$4 sm:$0xff]  }
 0x10b   :  { %v5537_v2 = vadd.f32 %v5536_v63, %v5535_v59  ;;  %v5516_v4 = vpop.f32.mrf.mxu0  ;;  %3301 = vmatprep.mubr.bf16.mxu1 %v6763_v11  ;;  %v6132_v59 = vld [vmem:[%s8352_s5 + $0x940] ss:$20 sps:$4 sm:$0xff]   ;;  %v6135_v62 = vld [vmem:[%s8352_s5 + $0x698] ss:$20 sps:$4 sm:$0xff]  }
 0x10c   :  { %v5538_v5 = vpop.f32.mrf.mxu1  ;;  %v862_v7 = vadd.f32 %v5515_v1, %v7291_v23  ;;  %3231 = vmatpush1.bf16.msra.mxu0 %v6063_v60  ;;  %v6084_v23 = vld [vmem:[%s8352_s5 + $0x800] ss:$20 sps:$4 sm:$0xff]   ;;  %v6137_v60 = vld [vmem:[%s8352_s5 + $0x69c] ss:$20 sps:$4 sm:$0xff]   ;;  %v6138_v63 = vld [vmem:[%s8352_s5 + $0x918] ss:$20 sps:$4 sm:$0xff]  }
 0x10d   :  { %3272 = vmatpush1.bf16.msra.mxu1 %v6066_v61  ;;  %v5517_v13 = vpop.f32.mrf.mxu0  ;;  %3232 = vmatprep.subr.bf16.mxu0 %v6071_v0  ;;  %v6140_v61 = vld [vmem:[%s8352_s5 + $0x91c] ss:$20 sps:$4 sm:$0xff]   ;;  %v1293_v0 = vlaneseq  ;;  %v6143_v1 = vld [vmem:[%s8352_s5 + $0x674] ss:$20 sps:$4 sm:$0xff]  }
 0x10e   :  { %v5539_v14 = vpop.f32.mrf.mxu1  ;;  %v7403_v16 = vadd.f32 %v5537_v2, %v862_v7  ;;  %3273 = vmatprep.subr.bf16.mxu1 %v6074_v3  ;;  %v6146_v2 = vld [vmem:[%s8352_s5 + $0x8f4] ss:$20 sps:$4 sm:$0xff]   ;;  %v6141_v3 = vld [vmem:[%s8352_s5 + $0x670] ss:$20 sps:$4 sm:$0xff]   ;;  %v6152_v7 = vld [vmem:[%s8352_s5 + $0x8cc] ss:$20 sps:$4 sm:$0xff]  }
 0x10f   :  { %v6144_v4 = vld [vmem:[%s8352_s5 + $0x8f0] ss:$20 sps:$4 sm:$0xff]   ;;  %v7546_v5 = vshrl.u32 %v1293_v0, 7  ;;  %v6150_v13 = vld [vmem:[%s8352_s5 + $0x8c8] ss:$20 sps:$4 sm:$0xff]  }
 0x110   :  { %3233 = vmatpush1.bf16.msra.mxu0 %v6069_v6  ;;  %v6149_v6 = vld [vmem:[%s8352_s5 + $0x64c] ss:$20 sps:$4 sm:$0xff]   ;;  %v6187_v0 = vld [vmem:[%s8352_s5 + $0x628] ss:$20 sps:$4 sm:$0xff]  }
 0x111   :  { %3274 = vmatpush1.bf16.msra.mxu1 %v6072_v9  ;;  %3234 = vmatprep.subr.bf16.mxu0 %v6077_v15  ;;  %v6147_v9 = vld [vmem:[%s8352_s5 + $0x648] ss:$20 sps:$4 sm:$0xff]   ;;  %v7563_v14 = vld [vmem:[%s8353_s6] sm:$0x1f]  ;;  %v1295_v15 = vsub.s32 0, %v7546_v5 }
 0x112   :  { %3275 = vmatprep.subr.bf16.mxu1 %v6080_v17  ;;  %v6153_v17 = vld [vmem:[%s8352_s5 + $0x268] ss:$20 sps:$4 sm:$0xff]  }
 0x114   :  { %3235 = vmatpush1.bf16.msra.mxu0 %v6075_v18  ;;  %v6154_v18 = vld [vmem:[%s8352_s5 + $0x4e8] ss:$20 sps:$4 sm:$0xff]  }
 0x115   :  { %3276 = vmatpush1.bf16.msra.mxu1 %v6078_v19  ;;  %3236 = vmatprep.subr.bf16.mxu0 %v6083_v20  ;;  %v6155_v19 = vld [vmem:[%s8352_s5 + $0x128] ss:$20 sps:$4 sm:$0xff]  }
 0x116   :  { %3277 = vmatprep.subr.bf16.mxu1 %v6086_v21  ;;  %v6156_v20 = vld [vmem:[%s8352_s5 + $0x3a8] ss:$20 sps:$4 sm:$0xff]   ;;  %v6157_v21 = vld [vmem:[%s8352_s5 + $0x240] ss:$20 sps:$4 sm:$0xff]  }
 0x118   :  { %3237 = vmatpush1.bf16.msra.mxu0 %v6081_v22  ;;  %v1296_v22 = vrot.slane %v7563_v14, %v1295_v15 }
 0x119   :  { %3278 = vmatpush1.bf16.msra.mxu1 %v6084_v23  ;;  %3238 = vmatprep.subr.bf16.mxu0 %v6089_v24  ;;  %v6158_v23 = vld [vmem:[%s8352_s5 + $0x4c0] ss:$20 sps:$4 sm:$0xff]  }
 0x11a   :  { %3279 = vmatprep.subr.bf16.mxu1 %v6092_v25  ;;  %v6159_v24 = vld [vmem:[%s8352_s5 + $0x100] ss:$20 sps:$4 sm:$0xff]  }
 0x11c   :  { %3239 = vmatpush1.bf16.msra.mxu0 %v6087_v26  ;;  %v6160_v26 = vld [vmem:[%s8352_s5 + $0x380] ss:$20 sps:$4 sm:$0xff]  }
 0x11d   :  { %3280 = vmatpush1.bf16.msra.mxu1 %v6090_v27  ;;  %3240 = vmatprep.subr.bf16.mxu0 %v6095_v28  ;;  %v6161_v27 = vld [vmem:[%s8352_s5 + $0x218] ss:$20 sps:$4 sm:$0xff]  }
 0x11e   :  { %3281 = vmatprep.subr.bf16.mxu1 %v6098_v29 }
 0x120   :  { %3241 = vmatpush1.bf16.msra.mxu0 %v6093_v30  ;;  %v6162_v30 = vld [vmem:[%s8352_s5 + $0x498] ss:$20 sps:$4 sm:$0xff]  }
 0x121   :  { %3282 = vmatpush1.bf16.msra.mxu1 %v6096_v31  ;;  %3242 = vmatprep.subr.bf16.mxu0 %v6101_v32 }
 0x122   :  { %3283 = vmatprep.subr.bf16.mxu1 %v6104_v33 }
 0x124   :  { %3243 = vmatpush1.bf16.msra.mxu0 %v6099_v34  ;;  %v6163_v34 = vld [vmem:[%s8352_s5 + $0xd8] ss:$20 sps:$4 sm:$0xff]  }
 0x125   :  { %3284 = vmatpush1.bf16.msra.mxu1 %v6102_v39  ;;  %3244 = vmatprep.subr.bf16.mxu0 %v6107_v40  ;;  %v6164_v40 = vld [vmem:[%s8352_s5 + $0x358] ss:$20 sps:$4 sm:$0xff]  }
 0x126   :  { %3285 = vmatprep.subr.bf16.mxu1 %v6110_v41  ;;  %v6165_v41 = vld [vmem:[%s8352_s5 + $0x1f0] ss:$20 sps:$4 sm:$0xff]  }
 0x128   :  { %3245 = vmatpush2.bf16.msra.mxu0 %v6105_v42 }
 0x129   :  { %3286 = vmatpush2.bf16.msra.mxu1 %v6108_v43  ;;  %3246 = vmatprep.subr.bf16.mxu0 %v6113_v44 }
 0x12a   :  { %3287 = vmatprep.subr.bf16.mxu1 %v6116_v45  ;;  %v6167_v45 = vld [vmem:[%s8352_s5 + $0xb0] ss:$20 sps:$4 sm:$0xff]  }
 0x12c   :  { %3247 = vmatpush2.bf16.msra.mxu0 %v6111_v46  ;;  %v6169_v46 = vld [vmem:[%s8352_s5 + $0x1c8] ss:$20 sps:$4 sm:$0xff]  }
 0x12d   :  { %3288 = vmatpush2.bf16.msra.mxu1 %v6114_v47  ;;  %3248 = vmatprep.subr.bf16.mxu0 %v6119_v48  ;;  %v6170_v47 = vld [vmem:[%s8352_s5 + $0x448] ss:$20 sps:$4 sm:$0xff]  }
 0x12e   :  { %3289 = vmatprep.subr.bf16.mxu1 %v6122_v49  ;;  %v6171_v48 = vld [vmem:[%s8352_s5 + $0x88] ss:$20 sps:$4 sm:$0xff]  }
 0x12f   :  { %v6172_v49 = vld [vmem:[%s8352_s5 + $0x308] ss:$20 sps:$4 sm:$0xff]  }
 0x130   :  { %3249 = vmatpush2.bf16.msra.mxu0 %v6117_v50  ;;  %v6173_v50 = vld [vmem:[%s8352_s5 + $0x1a0] ss:$20 sps:$4 sm:$0xff]  }
 0x131   :  { %3290 = vmatpush2.bf16.msra.mxu1 %v6120_v51  ;;  %3250 = vmatprep.subr.bf16.mxu0 %v6125_v52  ;;  %v6174_v51 = vld [vmem:[%s8352_s5 + $0x420] ss:$20 sps:$4 sm:$0xff]  }
 0x132   :  { %3291 = vmatprep.subr.bf16.mxu1 %v6128_v53  ;;  %v6175_v52 = vld [vmem:[%s8352_s5 + $0x60] ss:$20 sps:$4 sm:$0xff]  }
 0x133   :  { %v6176_v53 = vld [vmem:[%s8352_s5 + $0x2e0] ss:$20 sps:$4 sm:$0xff]  }
 0x134   :  { %3251 = vmatpush2.bf16.msra.mxu0 %v6123_v54  ;;  %v6177_v54 = vld [vmem:[%s8352_s5 + $0x178] ss:$20 sps:$4 sm:$0xff]  }
 0x135   :  { %3292 = vmatpush2.bf16.msra.mxu1 %v6126_v55  ;;  %3252 = vmatprep.subr.bf16.mxu0 %v6131_v56  ;;  %v6178_v55 = vld [vmem:[%s8352_s5 + $0x3f8] ss:$20 sps:$4 sm:$0xff]  }
 0x136   :  { %3293 = vmatprep.subr.bf16.mxu1 %v6134_v57  ;;  %v6179_v56 = vld [vmem:[%s8352_s5 + $0x38] ss:$20 sps:$4 sm:$0xff]  }
 0x137   :  { %v6180_v57 = vld [vmem:[%s8352_s5 + $0x2b8] ss:$20 sps:$4 sm:$0xff]  }
 0x138   :  { %3253 = vmatpush2.bf16.msra.mxu0 %v6129_v58  ;;  %v6181_v58 = vld [vmem:[%s8352_s5 + $0x150] ss:$20 sps:$4 sm:$0xff]  }
 0x139   :  { %3294 = vmatpush2.bf16.msra.mxu1 %v6132_v59  ;;  %3254 = vmatprep.subr.bf16.mxu0 %v6137_v60  ;;  %v6182_v59 = vld [vmem:[%s8352_s5 + $0x3d0] ss:$20 sps:$4 sm:$0xff]  }
 0x13a   :  { %3295 = vmatprep.subr.bf16.mxu1 %v6140_v61  ;;  %v6183_v60 = vld [vmem:[%s8352_s5 + $0x10] ss:$20 sps:$4 sm:$0xff]  }
 0x13b   :  { %v6184_v61 = vld [vmem:[%s8352_s5 + $0x290] ss:$20 sps:$4 sm:$0xff]  }
 0x13c   :  { %3255 = vmatpush2.bf16.msra.mxu0 %v6135_v62  ;;  %v6185_v62 = vld [vmem:[%s8352_s5 + $0x768] ss:$20 sps:$4 sm:$0xff]  }
 0x13d   :  { %3296 = vmatpush2.bf16.msra.mxu1 %v6138_v63  ;;  %3256 = vmatprep.subr.bf16.mxu0 %v6143_v1  ;;  %v6186_v63 = vld [vmem:[%s8352_s5 + $0x9e8] ss:$20 sps:$4 sm:$0xff]  }
 0x13e   :  { %3297 = vmatprep.subr.bf16.mxu1 %v6146_v2  ;;  %v6188_v1 = vld [vmem:[%s8352_s5 + $0x8a8] ss:$20 sps:$4 sm:$0xff]   ;;  %v6189_v2 = vld [vmem:[%s8352_s5 + $0x740] ss:$20 sps:$4 sm:$0xff]  }
 0x140   :  { %3257 = vmatpush2.bf16.msra.mxu0 %v6141_v3  ;;  %v6190_v3 = vld [vmem:[%s8352_s5 + $0x9c0] ss:$20 sps:$4 sm:$0xff]  }
 0x141   :  { %3298 = vmatpush2.bf16.msra.mxu1 %v6144_v4  ;;  %3258 = vmatprep.subr.bf16.mxu0 %v6149_v6  ;;  %v6191_v4 = vld [vmem:[%s8352_s5 + $0x600] ss:$20 sps:$4 sm:$0xff]  }
 0x142   :  { %3299 = vmatprep.subr.bf16.mxu1 %v6152_v7  ;;  %v6192_v6 = vld [vmem:[%s8352_s5 + $0x880] ss:$20 sps:$4 sm:$0xff]   ;;  %v6193_v7 = vld [vmem:[%s8352_s5 + $0x718] ss:$20 sps:$4 sm:$0xff]  }
 0x144   :  { %3259 = vmatpush2.bf16.msra.mxu0 %v6147_v9  ;;  %v6194_v9 = vld [vmem:[%s8352_s5 + $0x998] ss:$20 sps:$4 sm:$0xff]  }
 0x145   :  { %3300 = vmatpush2.bf16.msra.mxu1 %v6150_v13  ;;  %5541 = vmatprep.subr.bf16.mxu0 %v6153_v17  ;;  %v6196_v13 = vld [vmem:[%s8352_s5 + $0x858] ss:$20 sps:$4 sm:$0xff]   ;;  %v6198_v17 = vld [vmem:[%s8352_s5 + $0x970] ss:$20 sps:$4 sm:$0xff]  }
 0x146   :  { %5563 = vmatprep.subr.bf16.mxu1 %v6154_v18  ;;  %v6200_v18 = vld [vmem:[%s8352_s5 + $0x830] ss:$20 sps:$4 sm:$0xff]  }
 0x147   :  { %v3016_v25 = vpop.f32.mrf.mxu0  ;;  %3261 = vmatmul.mubr.bf16.vlgmr.msra.gmra.mxu0 %v6761_v10 }
 0x148   :  { %v3017_v28 = vadd.f32 %v3016_v25, %v1296_v22  ;;  %v3057_v29 = vpop.f32.mrf.mxu1  ;;  %3302 = vmatmul.mubr.bf16.vlgmr.msra.gmra.mxu1 %v6765_v12  ;;  %5542 = vmatpush3.bf16.msra.mxu0 %v6155_v19  ;;  %v6202_v19 = vld [vmem:[%s8352_s5 + $0x948] ss:$20 sps:$4 sm:$0xff]   ;;  %v6205_v22 = vld [vmem:[%s8352_s5 + $0x6a0] ss:$20 sps:$4 sm:$0xff]  }
 0x149   :  { %5564 = vmatpush3.bf16.msra.mxu1 %v6156_v20  ;;  %v7601_v31 = vpop.f32.mrf.mxu0  ;;  %5543 = vmatprep.subr.bf16.mxu0 %v6157_v21  ;;  %v6203_v20 = vld [vmem:[%s8352_s5 + $0x588] ss:$20 sps:$4 sm:$0xff]  }
 0x14a   :  { %v7603_v32 = vadd.f32 %v3057_v29, %v3017_v28  ;;  %v7605_v33 = vpop.f32.mrf.mxu1  ;;  %5565 = vmatprep.subr.bf16.mxu1 %v6158_v23  ;;  %3342 = vmatprep.mubr.bf16.mxu0 %v6645_v35  ;;  %v6166_v35 = vld [vmem:[%s8352_s5 + $0x470] ss:$20 sps:$4 sm:$0xff]   ;;  %v6204_v21 = vld [vmem:[%s8352_s5 + $0x808] ss:$20 sps:$4 sm:$0xff]   ;;  %v6206_v23 = vld [vmem:[%s8352_s5 + $0x920] ss:$20 sps:$4 sm:$0xff]  }
 0x14b   :  { %v3020_v39 = vpop.f32.mrf.mxu0  ;;  %3382 = vmatprep.mubr.bf16.mxu1 %v6647_v36  ;;  %v6168_v36 = vld [vmem:[%s8352_s5 + $0x330] ss:$20 sps:$4 sm:$0xff]  }
 0x14c   :  { %v3061_v42 = vpop.f32.mrf.mxu1  ;;  %5544 = vmatpush3.bf16.msra.mxu0 %v6159_v24 }
 0x14d   :  { %5566 = vmatpush3.bf16.msra.mxu1 %v6160_v26  ;;  %v3021_v43 = vpop.f32.mrf.mxu0  ;;  %5545 = vmatprep.subr.bf16.mxu0 %v6161_v27 }
 0x14e   :  { %v3062_v44 = vpop.f32.mrf.mxu1  ;;  %5567 = vmatprep.subr.bf16.mxu1 %v6162_v30 }
 0x150   :  { %5546 = vmatpush3.bf16.msra.mxu0 %v6163_v34 }
 0x151   :  { %5568 = vmatpush3.bf16.msra.mxu1 %v6164_v40  ;;  %5547 = vmatprep.subr.bf16.mxu0 %v6165_v41 }
 0x152   :  { %5569 = vmatprep.subr.bf16.mxu1 %v6166_v35 }
 0x154   :  { %5548 = vmatpush3.bf16.msra.mxu0 %v6167_v45 }
 0x155   :  { %5570 = vmatpush3.bf16.msra.mxu1 %v6168_v36  ;;  %5549 = vmatprep.subr.bf16.mxu0 %v6169_v46 }
 0x156   :  { %5571 = vmatprep.subr.bf16.mxu1 %v6170_v47 }
 0x158   :  { %5550 = vmatpush3.bf16.msra.mxu0 %v6171_v48 }
 0x159   :  { %5572 = vmatpush3.bf16.msra.mxu1 %v6172_v49  ;;  %5551 = vmatprep.subr.bf16.mxu0 %v6173_v50 }
 0x15a   :  { %5573 = vmatprep.subr.bf16.mxu1 %v6174_v51 }
 0x15c   :  { %5552 = vmatpush3.bf16.msra.mxu0 %v6175_v52 }
 0x15d   :  { %5574 = vmatpush3.bf16.msra.mxu1 %v6176_v53  ;;  %5553 = vmatprep.subr.bf16.mxu0 %v6177_v54 }
 0x15e   :  { %5575 = vmatprep.subr.bf16.mxu1 %v6178_v55 }
 0x160   :  { %5554 = vmatpush3.bf16.msra.mxu0 %v6179_v56 }
 0x161   :  { %5576 = vmatpush3.bf16.msra.mxu1 %v6180_v57  ;;  %5555 = vmatprep.subr.bf16.mxu0 %v6181_v58 }
 0x162   :  { %5577 = vmatprep.subr.bf16.mxu1 %v6182_v59 }
 0x164   :  { %5556 = vmatpush3.bf16.msra.mxu0 %v6183_v60 }
 0x165   :  { %5578 = vmatpush3.bf16.msra.mxu1 %v6184_v61  ;;  %5585 = vmatprep.subr.bf16.mxu0 %v6185_v62 }
 0x166   :  { %5607 = vmatprep.subr.bf16.mxu1 %v6186_v63 }
 0x167   :  { %3343 = vmatmul.mubr.bf16.vlgmr.msra.gmra.mxu0 %v6649_v37  ;;  %v6195_v37 = vld [vmem:[%s8352_s5 + $0x5d8] ss:$20 sps:$4 sm:$0xff]  }
 0x168   :  { %3383 = vmatmul.mubr.bf16.vlgmr.msra.gmra.mxu1 %v6651_v38  ;;  %5586 = vmatpush3.bf16.msra.mxu0 %v6187_v0  ;;  %v6197_v38 = vld [vmem:[%s8352_s5 + $0x6f0] ss:$20 sps:$4 sm:$0xff]  }
 0x169   :  { %5608 = vmatpush3.bf16.msra.mxu1 %v6188_v1  ;;  %5587 = vmatprep.subr.bf16.mxu0 %v6189_v2 }
 0x16a   :  { %5609 = vmatprep.subr.bf16.mxu1 %v6190_v3  ;;  %3422 = vmatprep.mubr.bf16.mxu0 %v6756_v8  ;;  %v6199_v8 = vld [vmem:[%s8352_s5 + $0x5b0] ss:$20 sps:$4 sm:$0xff]  }
 0x16b   :  { %3462 = vmatprep.mubr.bf16.mxu1 %v6763_v11  ;;  %v6201_v11 = vld [vmem:[%s8352_s5 + $0x6c8] ss:$20 sps:$4 sm:$0xff]  }
 0x16c   :  { %5588 = vmatpush3.bf16.msra.mxu0 %v6191_v4 }
 0x16d   :  { %5610 = vmatpush3.bf16.msra.mxu1 %v6192_v6  ;;  %5589 = vmatprep.subr.bf16.mxu0 %v6193_v7 }
 0x16e   :  { %5611 = vmatprep.subr.bf16.mxu1 %v6194_v9 }
 0x170   :  { %5590 = vmatpush3.bf16.msra.mxu0 %v6195_v37 }
 0x171   :  { %5612 = vmatpush3.bf16.msra.mxu1 %v6196_v13  ;;  %5591 = vmatprep.subr.bf16.mxu0 %v6197_v38 }
 0x172   :  { %5613 = vmatprep.subr.bf16.mxu1 %v6198_v17 }
 0x174   :  { %5592 = vmatpush3.bf16.msra.mxu0 %v6199_v8 }
 0x175   :  { %5614 = vmatpush3.bf16.msra.mxu1 %v6200_v18  ;;  %5593 = vmatprep.subr.bf16.mxu0 %v6201_v11 }
 0x176   :  { %5615 = vmatprep.subr.bf16.mxu1 %v6202_v19 }
 0x177   :  { %28 = vsyncpa [#allocation6], 0  ;;  %v6207_v24 = vld [vmem:[%s8352_s5 + $0x560] ss:$20 sps:$4 sm:$0xff]   ;;  %v6209_v26 = vld [vmem:[%s8352_s5 + $0x678] ss:$20 sps:$4 sm:$0xff]  }
 0x178   :  { %5594 = vmatpush3.bf16.msra.mxu0 %v6203_v20  ;;  %v6208_v25 = vld [vmem:[%s8352_s5 + $0x7e0] ss:$20 sps:$4 sm:$0xff]   ;;  %v6210_v27 = vld [vmem:[%s8352_s5 + $0x8f8] ss:$20 sps:$4 sm:$0xff]   ;;  %v1299_v28 = vsub.s32 1, %v7546_v5  ;;  %vm3958_vm5 = vcmask 785408  }
 0x179   :  { %5616 = vmatpush3.bf16.msra.mxu1 %v6204_v21  ;;  %5595 = vmatprep.subr.bf16.mxu0 %v6205_v22  ;;  %v6211_v29 = vld [vmem:[%s8352_s5 + $0x538] ss:$20 sps:$4 sm:$0xff]   ;;  %v6213_v34 = vld [vmem:[%s8352_s5 + $0x650] ss:$20 sps:$4 sm:$0xff]   ;;  %v6219_v43 = vld [vmem:[%s8354_s7 + $0x74] ss:$8 sps:$4 sm:$0xff]  }
 0x17a   :  { %5617 = vmatprep.subr.bf16.mxu1 %v6206_v23  ;;  %v6212_v30 = vld [vmem:[%s8352_s5 + $0x7b8] ss:$20 sps:$4 sm:$0xff]   ;;  %v6214_v39 = vld [vmem:[%s8352_s5 + $0x8d0] ss:$20 sps:$4 sm:$0xff]   ;;  %v1300_v40 = vrot.slane %v7563_v14, %v1299_v28  ;;  %v6267_v44 = vld [vmem:[%s8354_s7 + $0x174] ss:$8 sps:$4 sm:$0xff]  }
 0x17b   :  { %v6215_v41 = vld [vmem:[%s8352_s5 + $0x510] ss:$20 sps:$4 sm:$0xff]   ;;  %v6220_v50 = vld [vmem:[%s8354_s7 + $0x60] ss:$8 sps:$4 sm:$0xff]   ;;  %v6225_v52 = vld [vmem:[%s8354_s7 + $0x54] ss:$8 sps:$4 sm:$0xff]  }
 0x17c   :  { %5596 = vmatpush3.bf16.msra.mxu0 %v6207_v24  ;;  %v6216_v42 = vld [vmem:[%s8352_s5 + $0x790] ss:$20 sps:$4 sm:$0xff]   ;;  %v3019_v35 = vadd.f32 %v7601_v31, %v1300_v40  ;;  %v6226_v0 = vld [vmem:[%s8354_s7 + $0x40] ss:$8 sps:$4 sm:$0xff]   ;;  %v6231_v3 = vld [vmem:[%s8354_s7 + $0x34] ss:$8 sps:$4 sm:$0xff]  }
 0x17d   :  { %5618 = vmatpush3.bf16.msra.mxu1 %v6208_v25  ;;  %5597 = vmatprep.subr.bf16.mxu0 %v6209_v26  ;;  %v6217_v45 = vld [vmem:[%s8354_s7 + $0x70] ss:$8 sps:$4 sm:$0xff]   ;;  %v6222_v36 = vld [vmem:[%s8354_s7 + $0x64] ss:$8 sps:$4 sm:$0xff]   ;;  %v6274_v4 = vld [vmem:[%s8354_s7 + $0x140] ss:$8 sps:$4 sm:$0xff]  }
 0x17e   :  { %5619 = vmatprep.subr.bf16.mxu1 %v6210_v27  ;;  %v6265_v46 = vld [vmem:[%s8354_s7 + $0x170] ss:$8 sps:$4 sm:$0xff]   ;;  %v6270_v31 = vld [vmem:[%s8354_s7 + $0x164] ss:$8 sps:$4 sm:$0xff]   ;;  %v3060_v48 = vadd.f32 %v7605_v33, %v3019_v35  ;;  %v6279_v6 = vld [vmem:[%s8354_s7 + $0x134] ss:$8 sps:$4 sm:$0xff]  }
 0x17f   :  { %v6223_v57 = vld [vmem:[%s8354_s7 + $0x50] ss:$8 sps:$4 sm:$0xff]   ;;  %v6228_v59 = vld [vmem:[%s8354_s7 + $0x44] ss:$8 sps:$4 sm:$0xff]   ;;  %v6232_v38 = vld [vmem:[%s8354_s7 + $0x20] ss:$8 sps:$4 sm:$0xff]  }
 0x180   :  { %5598 = vmatpush3.bf16.msra.mxu0 %v6211_v29  ;;  %v6271_v60 = vld [vmem:[%s8354_s7 + $0x150] ss:$8 sps:$4 sm:$0xff]   ;;  %v6276_v63 = vld [vmem:[%s8354_s7 + $0x144] ss:$8 sps:$4 sm:$0xff]   ;;  %v6237_v17 = vld [vmem:[%s8354_s7 + $0x14] ss:$8 sps:$4 sm:$0xff]  }
 0x181   :  { %5620 = vmatpush3.bf16.msra.mxu1 %v6212_v30  ;;  %5599 = vmatprep.subr.bf16.mxu0 %v6213_v34  ;;  %v6229_v7 = vld [vmem:[%s8354_s7 + $0x30] ss:$8 sps:$4 sm:$0xff]   ;;  %v6234_v9 = vld [vmem:[%s8354_s7 + $0x24] ss:$8 sps:$4 sm:$0xff]   ;;  %v6280_v8 = vld [vmem:[%s8354_s7 + $0x120] ss:$8 sps:$4 sm:$0xff]  }
 0x182   :  { %5621 = vmatprep.subr.bf16.mxu1 %v6214_v39  ;;  %v6277_v37 = vld [vmem:[%s8354_s7 + $0x130] ss:$8 sps:$4 sm:$0xff]   ;;  %v6282_v13 = vld [vmem:[%s8354_s7 + $0x124] ss:$8 sps:$4 sm:$0xff]   ;;  %v6285_v18 = vld [vmem:[%s8354_s7 + $0x114] ss:$8 sps:$4 sm:$0xff]  }
 0x183   :  { %v6235_v11 = vld [vmem:[%s8354_s7 + $0x10] ss:$8 sps:$4 sm:$0xff]   ;;  %v6240_v19 = vld [vmem:[%s8354_s7 + $0x4] ss:$8 sps:$4 sm:$0xff]   ;;  %v6238_v22 = vld [vmem:[%s8354_s7] ss:$8 sps:$4 sm:$0xff]  }
 0x184   :  { %5600 = vmatpush3.bf16.msra.mxu0 %v6215_v41  ;;  %v6283_v20 = vld [vmem:[%s8354_s7 + $0x110] ss:$8 sps:$4 sm:$0xff]   ;;  %v6288_v21 = vld [vmem:[%s8354_s7 + $0x104] ss:$8 sps:$4 sm:$0xff]   ;;  %v6243_v23 = vld [vmem:[%s8354_s7 + $0xf4] ss:$8 sps:$4 sm:$0xff]  }
 0x185   :  { %5622 = vmatpush3.bf16.msra.mxu1 %v6216_v42  ;;  %3962 = vmatprep.subr.bf16.mxu0 %v6219_v43  ;;  %v6286_v24 = vld [vmem:[%s8354_s7 + $0x100] ss:$8 sps:$4 sm:$0xff]   ;;  %v6291_v25 = vld [vmem:[%s8354_s7 + $0x1f4] ss:$8 sps:$4 sm:$0xff]   ;;  %v6241_v26 = vld [vmem:[%s8354_s7 + $0xf0] ss:$8 sps:$4 sm:$0xff]  }
 0x186   :  { %4003 = vmatprep.subr.bf16.mxu1 %v6267_v44  ;;  %v6246_v27 = vld [vmem:[%s8354_s7 + $0xe4] ss:$8 sps:$4 sm:$0xff]   ;;  %v6289_v29 = vld [vmem:[%s8354_s7 + $0x1f0] ss:$8 sps:$4 sm:$0xff]   ;;  %v6244_v34 = vld [vmem:[%s8354_s7 + $0xe0] ss:$8 sps:$4 sm:$0xff]  }
 0x187   :  { %v7798_v47 = vpop.f32.mrf.mxu0  ;;  %3423 = vmatmul.mubr.bf16.vlgmr.msra.gmra.mxu0 %v6761_v10  ;;  %v6268_v10 = vld [vmem:[%s8354_s7 + $0x160] ss:$8 sps:$4 sm:$0xff]   ;;  %v6294_v30 = vld [vmem:[%s8354_s7 + $0x1e4] ss:$8 sps:$4 sm:$0xff]   ;;  %v6249_v39 = vld [vmem:[%s8354_s7 + $0xd4] ss:$8 sps:$4 sm:$0xff]  }
 0x188   :  { %v7802_v49 = vpop.f32.mrf.mxu1  ;;  %3463 = vmatmul.mubr.bf16.vlgmr.msra.gmra.mxu1 %v6765_v12  ;;  %3963 = vmatpush1.bf16.msra.mxu0 %v6217_v45  ;;  %v6273_v12 = vld [vmem:[%s8354_s7 + $0x154] ss:$8 sps:$4 sm:$0xff]   ;;  %v6292_v40 = vld [vmem:[%s8354_s7 + $0x1e0] ss:$8 sps:$4 sm:$0xff]   ;;  %v6247_v42 = vld [vmem:[%s8354_s7 + $0xd0] ss:$8 sps:$4 sm:$0xff]  }
 0x189   :  { %v3100_v51 = vpop.f32.mrf.mxu0  ;;  %3964 = vmatprep.subr.bf16.mxu0 %v6222_v36  ;;  %4004 = vmatpush1.bf16.msra.mxu1 %v6265_v46  ;;  %v6297_v41 = vld [vmem:[%s8354_s7 + $0x1d4] ss:$8 sps:$4 sm:$0xff]   ;;  %v6252_v43 = vld [vmem:[%s8354_s7 + $0xc4] ss:$8 sps:$4 sm:$0xff]   ;;  %v6295_v44 = vld [vmem:[%s8354_s7 + $0x1d0] ss:$8 sps:$4 sm:$0xff]  }
 0x18a   :  { %v3101_v33 = vadd.f32 %v3100_v51, %v3060_v48  ;;  %v3141_v53 = vpop.f32.mrf.mxu1  ;;  %4005 = vmatprep.subr.bf16.mxu1 %v6270_v31  ;;  %v6300_v35 = vld [vmem:[%s8354_s7 + $0x1c4] ss:$8 sps:$4 sm:$0xff]   ;;  %v6250_v45 = vld [vmem:[%s8354_s7 + $0xc0] ss:$8 sps:$4 sm:$0xff]   ;;  %v6255_v36 = vld [vmem:[%s8354_s7 + $0xb4] ss:$8 sps:$4 sm:$0xff]  }
 0x18b   :  { %v3102_v54 = vpop.f32.mrf.mxu0  ;;  %v6298_v46 = vld [vmem:[%s8354_s7 + $0x1c0] ss:$8 sps:$4 sm:$0xff]   ;;  %v6303_v31 = vld [vmem:[%s8354_s7 + $0x1b4] ss:$8 sps:$4 sm:$0xff]   ;;  %v6253_v48 = vld [vmem:[%s8354_s7 + $0xb0] ss:$8 sps:$4 sm:$0xff]  }
 0x18c   :  { %v3142_v55 = vadd.f32 %v3141_v53, %v3101_v33  ;;  %v3143_v56 = vpop.f32.mrf.mxu1  ;;  %3965 = vmatpush1.bf16.msra.mxu0 %v6220_v50  ;;  %v6258_v50 = vld [vmem:[%s8354_s7 + $0xa4] ss:$8 sps:$4 sm:$0xff]   ;;  %v6301_v51 = vld [vmem:[%s8354_s7 + $0x1b0] ss:$8 sps:$4 sm:$0xff]   ;;  %v6256_v33 = vld [vmem:[%s8354_s7 + $0xa0] ss:$8 sps:$4 sm:$0xff]  }
 0x18d   :  { %v3103_v58 = vpop.f32.mrf.mxu0  ;;  %3966 = vmatprep.subr.bf16.mxu0 %v6225_v52  ;;  %4006 = vmatpush1.bf16.msra.mxu1 %v6268_v10  ;;  %v3099_v52 = vadd.f32 %v7798_v47, %v7603_v32  ;;  %v6306_v10 = vld [vmem:[%s8354_s7 + $0x1a4] ss:$8 sps:$4 sm:$0xff]   ;;  %v6261_v53 = vld [vmem:[%s8354_s7 + $0x94] ss:$8 sps:$4 sm:$0xff]   ;;  %v6304_v32 = vld [vmem:[%s8354_s7 + $0x1a0] ss:$8 sps:$4 sm:$0xff]  }
 0x18e   :  { %vm3471_vm0 = vcmp.ge.f32.partialorder %v3142_v55, 0.0  ;;  %v3476_v61 = vmul.f32 0.01, %v3142_v55  ;;  %v3144_v62 = vpop.f32.mrf.mxu1  ;;  %4007 = vmatprep.subr.bf16.mxu1 %v6273_v12  ;;  %v6309_v12 = vld [vmem:[%s8354_s7 + $0x194] ss:$8 sps:$4 sm:$0xff]   ;;  %s8375_s22 = sld [smem:[#allocation10_spill]] }
 0x18f   :  { %v3140_v47 = vadd.f32 %v7802_v49, %v3099_v52  ;;  %v6259_v54 = vld [vmem:[%s8354_s7 + $0x90] ss:$8 sps:$4 sm:$0xff]   ;;  %v6262_v58 = vld [vmem:[%s8354_s7 + $0x80] ss:$8 sps:$4 sm:$0xff]   ;;  %vm4087_vm6 = vcmask 523264   ;;  %s8376_s26 = sld [smem:[#allocation9_spill]] }
 0x190   :  { %3967 = vmatpush1.bf16.msra.mxu0 %v6223_v57  ;;  %v3481_v1 = vsel %vm3471_vm0, %v3142_v55, %v3476_v61  ;;  %v6264_v55 = vld [vmem:[%s8354_s7 + $0x84] ss:$8 sps:$4 sm:$0xff]   ;;  %v6307_v49 = vld [vmem:[%s8354_s7 + $0x190] ss:$8 sps:$4 sm:$0xff]   ;;  %vm86_vm7 = vcmask 916480   ;;  %vm6437_vm8 = vmmov 0  }
 0x191   :  { %3968 = vmatprep.subr.bf16.mxu0 %v6228_v59  ;;  %v3486_v2 = vpack.c.bf16 %v3481_v1, %v3481_v1  ;;  %4008 = vmatpush1.bf16.msra.mxu1 %v6271_v60  ;;  %v3475_v56 = vmul.f32 0.01, %v3140_v47  ;;  %v6312_v57 = vld [vmem:[%s8354_s7 + $0x184] ss:$8 sps:$4 sm:$0xff]   ;;  %vm3470_vm1 = vcmp.ge.f32.partialorder %v3140_v47, 0.0  ;;  %vm4315_vm9 = vcmask 1041409  }
 0x192   :  { %4009 = vmatprep.subr.bf16.mxu1 %v6276_v63  ;;  %v6310_v59 = vld [vmem:[%s8354_s7 + $0x180] ss:$8 sps:$4 sm:$0xff]   ;;  %v6315_v60 = vld [vmem:[%s8354_s7 + $0x254] ss:$8 sps:$4 sm:$0xff]   ;;  %v6313_v62 = vld [vmem:[%s8354_s7 + $0x250] ss:$8 sps:$4 sm:$0xff]  }
 0x193   :  { %3994 = vmatprep.mubr.bf16.mxu0 %v3486_v2  ;;  %v3480_v61 = vsel %vm3470_vm1, %v3140_v47, %v3475_v56  ;;  %vm4317_vm10 = vcmask 1042434   ;;  %vm4319_vm11 = vcmask 1043459   ;;  %vm4321_vm12 = vcmask 1044484  }
 0x194   :  { %3969 = vmatpush1.bf16.msra.mxu0 %v6226_v0  ;;  %v3485_v63 = vpack.c.bf16 %v3480_v61, %v3480_v61  ;;  %v6318_v0 = vld [vmem:[%s8354_s7 + $0x244] ss:$8 sps:$4 sm:$0xff]   ;;  %vm4323_vm13 = vcmask 1045509   ;;  %vm4325_vm14 = vcmask 1046534   ;;  %vm4327_vm15 = vcmask 1047559  }
 0x195   :  { %3970 = vmatprep.subr.bf16.mxu0 %v6231_v3  ;;  %4010 = vmatpush1.bf16.msra.mxu1 %v6274_v4  ;;  %v6316_v3 = vld [vmem:[%s8354_s7 + $0x240] ss:$8 sps:$4 sm:$0xff]   ;;  %vm4189_vm0 = vcmask 64512   ;;  %vm4209_vm1 = vcmask 0  }
 0x196   :  { %4011 = vmatprep.subr.bf16.mxu1 %v6279_v6  ;;  %v6321_v6 = vld [vmem:[%s8354_s7 + $0x234] ss:$8 sps:$4 sm:$0xff]  }
 0x198   :  { %3971 = vmatpush1.bf16.msra.mxu0 %v6229_v7 }
 0x199   :  { %3972 = vmatprep.subr.bf16.mxu0 %v6234_v9  ;;  %4012 = vmatpush1.bf16.msra.mxu1 %v6277_v37 }
 0x19a   :  { %4013 = vmatprep.subr.bf16.mxu1 %v6282_v13  ;;  %v6319_v13 = vld [vmem:[%s8354_s7 + $0x230] ss:$8 sps:$4 sm:$0xff]  }
 0x19c   :  { %3973 = vmatpush1.bf16.msra.mxu0 %v6232_v38 }
 0x19d   :  { %3974 = vmatprep.subr.bf16.mxu0 %v6237_v17  ;;  %4014 = vmatpush1.bf16.msra.mxu1 %v6280_v8  ;;  %v6324_v17 = vld [vmem:[%s8354_s7 + $0x224] ss:$8 sps:$4 sm:$0xff]  }
 0x19e   :  { %4015 = vmatprep.subr.bf16.mxu1 %v6285_v18  ;;  %v6322_v18 = vld [vmem:[%s8354_s7 + $0x220] ss:$8 sps:$4 sm:$0xff]  }
 0x1a0   :  { %3975 = vmatpush1.bf16.msra.mxu0 %v6235_v11  ;;  %v6327_v11 = vld [vmem:[%s8354_s7 + $0x214] ss:$8 sps:$4 sm:$0xff]  }
 0x1a1   :  { %3976 = vmatprep.subr.bf16.mxu0 %v6240_v19  ;;  %4016 = vmatpush1.bf16.msra.mxu1 %v6283_v20  ;;  %v6325_v19 = vld [vmem:[%s8354_s7 + $0x210] ss:$8 sps:$4 sm:$0xff]   ;;  %v6435_v20 = vmov 0  }
 0x1a2   :  { %4017 = vmatprep.subr.bf16.mxu1 %v6288_v21  ;;  %v6330_v21 = vld [vmem:[%s8354_s7 + $0x204] ss:$8 sps:$4 sm:$0xff]  }
 0x1a4   :  { %3977 = vmatpush1.bf16.msra.mxu0 %v6238_v22  ;;  %v6328_v22 = vld [vmem:[%s8354_s7 + $0x200] ss:$8 sps:$4 sm:$0xff]  }
 0x1a5   :  { %3978 = vmatprep.subr.bf16.mxu0 %v6243_v23  ;;  %4018 = vmatpush1.bf16.msra.mxu1 %v6286_v24  ;;  %v1303_v23 = vsub.s32 2, %v7546_v5  ;;  %v1307_v24 = vsub.s32 3, %v7546_v5 }
 0x1a6   :  { %4019 = vmatprep.subr.bf16.mxu1 %v6291_v25 }
 0x1a7   :  { %v1304_v25 = vrot.slane %v7563_v14, %v1303_v23 }
 0x1a8   :  { %3979 = vmatpush2.bf16.msra.mxu0 %v6241_v26  ;;  %v1308_v26 = vrot.slane %v7563_v14, %v1307_v24  ;;  %v3566_v24 = vld [vmem:[%s8355_s8] sm:$0x3] }
 0x1a9   :  { %3980 = vmatprep.subr.bf16.mxu0 %v6246_v27  ;;  %4020 = vmatpush2.bf16.msra.mxu1 %v6289_v29 }
 0x1aa   :  { %4021 = vmatprep.subr.bf16.mxu1 %v6294_v30 }
 0x1ac   :  { %3981 = vmatpush2.bf16.msra.mxu0 %v6244_v34 }
 0x1ad   :  { %3982 = vmatprep.subr.bf16.mxu0 %v6249_v39  ;;  %4022 = vmatpush2.bf16.msra.mxu1 %v6292_v40 }
 0x1ae   :  { %4023 = vmatprep.subr.bf16.mxu1 %v6297_v41 }
 0x1b0   :  { %3983 = vmatpush2.bf16.msra.mxu0 %v6247_v42 }
 0x1b1   :  { %3984 = vmatprep.subr.bf16.mxu0 %v6252_v43  ;;  %4024 = vmatpush2.bf16.msra.mxu1 %v6295_v44 }
 0x1b2   :  { %4025 = vmatprep.subr.bf16.mxu1 %v6300_v35 }
 0x1b4   :  { %3985 = vmatpush2.bf16.msra.mxu0 %v6250_v45 }
 0x1b5   :  { %3986 = vmatprep.subr.bf16.mxu0 %v6255_v36  ;;  %4026 = vmatpush2.bf16.msra.mxu1 %v6298_v46 }
 0x1b6   :  { %4027 = vmatprep.subr.bf16.mxu1 %v6303_v31 }
 0x1b8   :  { %3987 = vmatpush2.bf16.msra.mxu0 %v6253_v48 }
 0x1b9   :  { %3988 = vmatprep.subr.bf16.mxu0 %v6258_v50  ;;  %4028 = vmatpush2.bf16.msra.mxu1 %v6301_v51 }
 0x1ba   :  { %4029 = vmatprep.subr.bf16.mxu1 %v6306_v10 }
 0x1bc   :  { %3989 = vmatpush2.bf16.msra.mxu0 %v6256_v33 }
 0x1bd   :  { %3990 = vmatprep.subr.bf16.mxu0 %v6261_v53  ;;  %4030 = vmatpush2.bf16.msra.mxu1 %v6304_v32 }
 0x1be   :  { %4031 = vmatprep.subr.bf16.mxu1 %v6309_v12 }
 0x1c0   :  { %3991 = vmatpush2.bf16.msra.mxu0 %v6259_v54 }
 0x1c1   :  { %3992 = vmatprep.subr.bf16.mxu0 %v6264_v55  ;;  %4032 = vmatpush2.bf16.msra.mxu1 %v6307_v49 }
 0x1c2   :  { %4033 = vmatprep.subr.bf16.mxu1 %v6312_v57  ;;  %v1311_v57 = vsub.s32 4, %v7546_v5 }
 0x1c4   :  { %3993 = vmatpush2.bf16.msra.mxu0 %v6262_v58  ;;  %v6390_v58 = vld [vmem:[%s8353_s6] sm:$0x1f] }
 0x1c5   :  { %4034 = vmatpush2.bf16.msra.mxu1 %v6310_v59  ;;  %4048 = vmatprep.subr.bf16.mxu0 %v6315_v60  ;;  %v1312_v59 = vrot.slane %v6390_v58, %v1311_v57  ;;  %v6354_v57 = vld [vmem:[%s8356_s9 + $0x50] sm:$0xff]   ;;  %v6356_v58 = vld [vmem:[%s8356_s9 + $0x48] sm:$0xff]  }
 0x1c7   :  { %v3180_v1 = vpop.f32.mrf.mxu0  ;;  %3995 = vmatmul.mubr.bf16.vlgmr.msra.gmra.mxu0 %v3485_v63 }
 0x1c8   :  { %v3221_v2 = vpop.f32.mrf.mxu1  ;;  %4049 = vmatpush1.bf16.msra.mxu0 %v6313_v62  ;;  %4076 = vmatprep.mubr.bf16.mxu0 %v6435_v20  ;;  %v3181_v27 = vadd.f32 %v3180_v1, %v1304_v25  ;;  %v3571_v25 = vrot.slane %v3566_v24, %v1295_v15 }
 0x1c9   :  { %v3182_v4 = vpop.f32.mrf.mxu0  ;;  %4050 = vmatprep.subr.bf16.mxu0 %v6318_v0 }
 0x1ca   :  { %v3223_v7 = vpop.f32.mrf.mxu1  ;;  %v3183_v29 = vadd.f32 %v3182_v4, %v1308_v26  ;;  %v3222_v30 = vadd.f32 %v3221_v2, %v3181_v27 }
 0x1cb   :  { %v3184_v9 = vpop.f32.mrf.mxu0 }
 0x1cc   :  { %v3225_v37 = vpop.f32.mrf.mxu1  ;;  %4051 = vmatpush1.bf16.msra.mxu0 %v6316_v3  ;;  %v3224_v39 = vadd.f32 %v3223_v7, %v3183_v29 }
 0x1cd   :  { %v3185_v38 = vpop.f32.mrf.mxu0  ;;  %4052 = vmatprep.subr.bf16.mxu0 %v6321_v6 }
 0x1ce   :  { %v3226_v8 = vpop.f32.mrf.mxu1 }
 0x1d0   :  { %4053 = vmatpush1.bf16.msra.mxu0 %v6319_v13 }
 0x1d1   :  { %4054 = vmatprep.subr.bf16.mxu0 %v6324_v17 }
 0x1d4   :  { %4055 = vmatpush1.bf16.msra.mxu0 %v6322_v18 }
 0x1d5   :  { %4056 = vmatprep.subr.bf16.mxu0 %v6327_v11 }
 0x1d8   :  { %4057 = vmatpush1.bf16.msra.mxu0 %v6325_v19 }
 0x1d9   :  { %4058 = vmatprep.subr.bf16.mxu0 %v6330_v21 }
 0x1dc   :  { %4059 = vmatpush1.bf16.msra.mxu0 %v6328_v22 }
 0x1dd   :  { %4547 = vmatprep.subr.bf16.mxu0 %v6435_v20 }
 0x207   :  { %v3262_v34 = vpop.f32.mrf.mxu0 }
 0x208   :  { %v3263_v40 = vadd.f32 %v3262_v34, %v3222_v30  ;;  %v3303_v41 = vpop.f32.mrf.mxu1 }
 0x209   :  { %v3264_v42 = vpop.f32.mrf.mxu0 }
 0x20a   :  { %v3304_v43 = vadd.f32 %v3303_v41, %v3263_v40  ;;  %v3265_v44 = vadd.f32 %v3264_v42, %v3224_v39  ;;  %v3305_v35 = vpop.f32.mrf.mxu1  ;;  %v3575_v40 = vrot.slane %v3566_v24, %v1299_v28  ;;  %v77_v24 = vld [vmem:[%s8376_s26 + $0x68] sm:$0xff] }
 0x20b   :  { %v3266_v45 = vpop.f32.mrf.mxu0 }
 0x20c   :  { %vm3472_vm2 = vcmp.ge.f32.partialorder %v3304_v43, 0.0  ;;  %v3477_v36 = vmul.f32 0.01, %v3304_v43  ;;  %v3306_v46 = vadd.f32 %v3305_v35, %v3265_v44  ;;  %v3307_v31 = vpop.f32.mrf.mxu1 }
 0x20d   :  { %v3267_v48 = vpop.f32.mrf.mxu0 }
 0x20e   :  { %vm3473_vm3 = vcmp.ge.f32.partialorder %v3306_v46, 0.0  ;;  %v3478_v50 = vmul.f32 0.01, %v3306_v46  ;;  %v3308_v14 = vpop.f32.mrf.mxu1  ;;  %v3482_v51 = vsel %vm3472_vm2, %v3304_v43, %v3477_v36  ;;  %v8038_v43 = vld [vmem:[%s8375_s22 + $0x8] sm:$0xff]  ;;  %v8047_v36 = vld [vmem:[%s8375_s22] sm:$0xff] }
 0x20f   :  { %v3487_v33 = vpack.c.bf16 %v3482_v51, %v3482_v51  ;;  %v4086_v5 = vmul.f32 %v8038_v43, %v8038_v43 }
 0x210   :  { %v3483_v52 = vsel %vm3473_vm3, %v3306_v46, %v3478_v50  ;;  %v4085_v50 = vmul.f32 %v8047_v36, %v8047_v36 }
 0x211   :  { %v3488_v10 = vpack.c.bf16 %v3483_v52, %v3483_v52  ;;  %v4088_v51 = vsel %vm4087_vm6, %v4086_v5, 0.0 }
 0x213   :  { %4035 = vmatprep.mubr.bf16.mxu1 %v3488_v10  ;;  %v4089_v10 = vadd.f32 %v4088_v51, %v4085_v50 }
 0x214   :  { %4036 = vmatmul.mubr.bf16.vlgmr.msra.gmra.mxu1 %v3487_v33  ;;  %v6336_v33 = vld [vmem:[%s8356_s9 + $0x38] sm:$0xff]  }
 0x227   :  { %v5557_v53 = vpop.f32.mrf.mxu0 }
 0x228   :  { %v5579_v32 = vpop.f32.mrf.mxu1 }
 0x229   :  { %v5558_v47 = vpop.f32.mrf.mxu0 }
 0x22a   :  { %v5580_v12 = vpop.f32.mrf.mxu1  ;;  %v5559_v60 = vadd.f32 %v5558_v47, %v5557_v53  ;;  %v6338_v53 = vld [vmem:[%s8356_s9 + $0x30] sm:$0xff]   ;;  %v6342_v47 = vld [vmem:[%s8356_s9 + $0x20] sm:$0xff]  }
 0x22b   :  { %v5560_v54 = vpop.f32.mrf.mxu0  ;;  %v5581_v62 = vadd.f32 %v5580_v12, %v5579_v32  ;;  %v6340_v32 = vld [vmem:[%s8356_s9 + $0x28] sm:$0xff]   ;;  %v6344_v12 = vld [vmem:[%s8356_s9 + $0x18] sm:$0xff]  }
 0x22c   :  { %v5582_v55 = vpop.f32.mrf.mxu1  ;;  %v3345_v61 = vadd.f32 %v5559_v60, %v1312_v59  ;;  %v6346_v54 = vld [vmem:[%s8356_s9 + $0x10] sm:$0xff]   ;;  %v6358_v59 = vld [vmem:[%s8356_s9 + $0x40] sm:$0xff]   ;;  %v65_v60 = vld [vmem:[%s8376_s26 + $0x8] sm:$0xff] }
 0x22d   :  { %v5561_v49 = vpop.f32.mrf.mxu0  ;;  %v6348_v55 = vld [vmem:[%s8356_s9 + $0x8] sm:$0xff]  }
 0x22e   :  { %v5583_v56 = vpop.f32.mrf.mxu1  ;;  %v3385_v2 = vadd.f32 %v5581_v62, %v3345_v61  ;;  %v6350_v49 = vld [vmem:[%s8356_s9] sm:$0xff]   ;;  %v67_v61 = vld [vmem:[%s8376_s26 + $0x18] sm:$0xff]  ;;  %v69_v62 = vld [vmem:[%s8376_s26 + $0x28] sm:$0xff] }
 0x22f   :  { %v6352_v56 = vld [vmem:[%s8356_s9 + $0x58] sm:$0xff]  }
 0x247   :  { %v5601_v63 = vpop.f32.mrf.mxu0 }
 0x248   :  { %v5623_v0 = vpop.f32.mrf.mxu1 }
 0x249   :  { %v5602_v1 = vpop.f32.mrf.mxu0 }
 0x24a   :  { %v5603_v3 = vadd.f32 %v5602_v1, %v5601_v63  ;;  %v5624_v4 = vpop.f32.mrf.mxu1  ;;  %v87_v63 = vsel %vm86_vm7, %v65_v60, 0.0  ;;  %v71_v1 = vld [vmem:[%s8376_s26 + $0x38] sm:$0xff] }
 0x24b   :  { %v5604_v6 = vpop.f32.mrf.mxu0  ;;  %v5625_v9 = vadd.f32 %v5624_v4, %v5623_v0  ;;  %v100_v0 = vsel %vm86_vm7, %v67_v61, 0.0  ;;  %v113_v4 = vsel %vm86_vm7, %v69_v62, 0.0 }
 0x24c   :  { %v3425_v7 = vadd.f32 %v5603_v3, %v3385_v2  ;;  %v5626_v37 = vpop.f32.mrf.mxu1  ;;  %v88_v2 = vrot.slane %v87_v63, 4  ;;  %v101_v3 = vrot.slane %v100_v0, 4  ;;  %v6436_v6 = vmov 0.0  }
 0x24d   :  { %v5605_v13 = vpop.f32.mrf.mxu0  ;;  %v114_v37 = vrot.slane %v113_v4, 4 }
 0x24e   :  { %v3465_v38 = vadd.f32 %v5625_v9, %v3425_v7  ;;  %v5627_v17 = vpop.f32.mrf.mxu1  ;;  %v4212_v7 = vpack.c.bf16 %v8038_v43, %v8038_v43  ;;  %v73_v9 = vld [vmem:[%s8376_s26 + $0x48] sm:$0xff]  ;;  %v126_v13 = vsel %vm86_vm7, %v71_v1, 0.0 }
 0x24f   :  { %v89_v17 = vadd.f32 %v88_v2, %v87_v63 }
 0x250   :  { %vm3474_vm4 = vcmp.ge.f32.partialorder %v3465_v38, 0.0  ;;  %v3479_v8 = vmul.f32 0.01, %v3465_v38 }
 0x252   :  { %v3484_v18 = vsel %vm3474_vm4, %v3465_v38, %v3479_v8  ;;  %v4211_v38 = vpack.c.bf16 %v8047_v36, %v8047_v36  ;;  %v102_v8 = vadd.f32 %v101_v3, %v100_v0 }
 0x253   :  { %v3489_v11 = vpack.c.bf16 %v3484_v18, %v3484_v18  ;;  %v75_v18 = vld [vmem:[%s8376_s26 + $0x58] sm:$0xff] }
 0x255   :  { %5399 = vmatmul.mubr.msk.bf16.vlgmr.msra.gmra.mxu0 %vm3958_vm5, %v3489_v11  ;;  %v127_v11 = vrot.slane %v126_v13, 4 }
 0x256   :  { %4548 = vmatpush1.bf16.msra.mxu0 %v6336_v33  ;;  %5430 = vmatprep.mubr.msk.bf16.mxu0 %vm4087_vm6, %v4212_v7 }
 0x257   :  { %4549 = vmatprep.subr.bf16.mxu0 %v6435_v20 }
 0x25a   :  { %4550 = vmatpush1.bf16.msra.mxu0 %v6338_v53 }
 0x25b   :  { %4551 = vmatprep.subr.bf16.mxu0 %v6435_v20 }
 0x25e   :  { %4552 = vmatpush1.bf16.msra.mxu0 %v6340_v32 }
 0x25f   :  { %4553 = vmatprep.subr.bf16.mxu0 %v6435_v20 }
 0x262   :  { %4554 = vmatpush1.bf16.msra.mxu0 %v6342_v47 }
 0x263   :  { %4555 = vmatprep.subr.bf16.mxu0 %v6435_v20 }
 0x266   :  { %4556 = vmatpush1.bf16.msra.mxu0 %v6344_v12 }
 0x267   :  { %4557 = vmatprep.subr.bf16.mxu0 %v6435_v20 }
 0x26a   :  { %4558 = vmatpush1.bf16.msra.mxu0 %v6346_v54 }
 0x26b   :  { %4559 = vmatprep.subr.bf16.mxu0 %v6435_v20 }
 0x26e   :  { %4560 = vmatpush1.bf16.msra.mxu0 %v6348_v55 }
 0x26f   :  { %4561 = vmatprep.subr.bf16.mxu0 %v6435_v20 }
 0x272   :  { %4562 = vmatpush1.bf16.msra.mxu0 %v6350_v49 }
 0x273   :  { %4571 = vmatprep.subr.bf16.mxu0 %v6435_v20 }
 0x276   :  { %4572 = vmatpush2.bf16.msra.mxu0 %v6352_v56 }
 0x277   :  { %4573 = vmatprep.subr.bf16.mxu0 %v6435_v20 }
 0x27a   :  { %4574 = vmatpush2.bf16.msra.mxu0 %v6354_v57 }
 0x27b   :  { %4575 = vmatprep.subr.bf16.mxu0 %v6435_v20 }
 0x27e   :  { %4576 = vmatpush2.bf16.msra.mxu0 %v6356_v58 }
 0x27f   :  { %4577 = vmatprep.subr.bf16.mxu0 %v6435_v20 }
 0x282   :  { %4578 = vmatpush2.bf16.msra.mxu0 %v6358_v59 }
 0x283   :  { %5660 = vmatprep.subr.bf16.mxu0 %v6436_v6 }
 0x285   :  { %4580 = vmatmul.mubr.bf16.vlgmr.msra.gmra.mxu0 %v4211_v38 }
 0x286   :  { %5676 = vmatprep.mubr.msk.bf16.mxu0 %vm6437_vm8, %v6436_v6 }
 0x287   :  { %v3996_v19 = vpop.f32.mrf.mxu0 }
 0x288   :  { %v3997_v26 = vadd.f32 %v3996_v19, %v3571_v25  ;;  %v139_v19 = vsel %vm86_vm7, %v73_v9, 0.0 }
 0x289   :  { %v3998_v21 = vpop.f32.mrf.mxu0  ;;  %v140_v25 = vrot.slane %v139_v19, 4 }
 0x28a   :  { %v3999_v41 = vadd.f32 %v3998_v21, %v3575_v40  ;;  %v115_v21 = vadd.f32 %v114_v37, %v113_v4 }
 0x28b   :  { %v4000_v22 = vpop.f32.mrf.mxu0 }
 0x28c   :  { %v90_v22 = vrot.slane %v89_v17, 2 }
 0x28d   :  { %v4001_v23 = vpop.f32.mrf.mxu0 }
 0x28e   :  { %v103_v23 = vrot.slane %v102_v8, 2 }
 0x2d4   :  { %v4037_v27 = vpop.f32.mrf.mxu1 }
 0x2d5   :  { %v4038_v29 = vadd.f32 %v4037_v27, %v3997_v26  ;;  %v152_v26 = vsel %vm86_vm7, %v75_v18, 0.0  ;;  %v128_v27 = vadd.f32 %v127_v11, %v126_v13 }
 0x2d6   :  { %v4039_v30 = vpop.f32.mrf.mxu1  ;;  %v153_v40 = vrot.slane %v152_v26, 4 }
 0x2d7   :  { %v4040_v44 = vadd.f32 %v4039_v30, %v3999_v41  ;;  %v79_v30 = vld [vmem:[%s8376_s26 + $0x78] sm:$0xff]  ;;  %v165_v41 = vsel %vm86_vm7, %v77_v24, 0.0 }
 0x2d8   :  { %v4041_v34 = vpop.f32.mrf.mxu1  ;;  %v166_v5 = vrot.slane %v165_v41, 4 }
 0x2d9   :  { %v91_v34 = vadd.f32 %v90_v22, %v89_v17 }
 0x2da   :  { %v4042_v39 = vpop.f32.mrf.mxu1 }
 0x2db   :  { %v104_v39 = vadd.f32 %v103_v23, %v102_v8 }
 0x315   :  { %v4078_v42 = vpop.f32.mrf.mxu0 }
 0x316   :  { %v8040_v35 = vadd.f32 %v4078_v42, %v4038_v29  ;;  %v116_v29 = vrot.slane %v115_v21, 2  ;;  %v141_v42 = vadd.f32 %v140_v25, %v139_v19 }
 0x317   :  { %v4080_v15 = vpop.f32.mrf.mxu0 }
 0x318   :  { %v8042_v45 = vadd.f32 %v4080_v15, %v4040_v44  ;;  %v4096_v48 = vmul.f32 %v8040_v35, %v8040_v35  ;;  %v129_v44 = vrot.slane %v128_v27, 2  ;;  %v117_v15 = vadd.f32 %v116_v29, %v115_v21 }
 0x319   :  { %v4082_v28 = vpop.f32.mrf.mxu0  ;;  %v142_v50 = vrot.slane %v141_v42, 2 }
 0x31a   :  { %v4097_v46 = vmul.f32 %v8042_v45, %v8042_v45  ;;  %v178_v28 = vsel %vm86_vm7, %v79_v30, 0.0 }
 0x31b   :  { %v4083_v31 = vpop.f32.mrf.mxu0  ;;  %v179_v51 = vrot.slane %v178_v28, 4  ;;  %v143_v47 = vadd.f32 %v142_v50, %v141_v42 }
 0x31c   :  { %v4098_v14 = vsel %vm4087_vm6, %v4097_v46, 0.0  ;;  %v92_v46 = vrot.slane %v91_v34, 1  ;;  %v105_v31 = vrot.slane %v104_v39, 1 }
 0x31d   :  { %v4099_v52 = vadd.f32 %v4098_v14, %v4096_v48  ;;  %v154_v48 = vadd.f32 %v153_v40, %v152_v26  ;;  %v130_v14 = vadd.f32 %v129_v44, %v128_v27  ;;  %v180_v54 = vadd.f32 %v179_v51, %v178_v28 }
 0x31e   :  { %v93_v33 = vadd.f32 %v92_v46, %v91_v34  ;;  %v106_v53 = vadd.f32 %v105_v31, %v104_v39  ;;  %v144_v59 = vrot.slane %v143_v47, 1 }
 0x31f   :  { %4100 = vadd.xlane.f32.xlu0 %v4099_v52  ;;  %v118_v52 = vrot.slane %v117_v15, 1  ;;  %v155_v32 = vrot.slane %v154_v48, 2  ;;  %v131_v12 = vrot.slane %v130_v14, 1  ;;  %v181_v61 = vrot.slane %v180_v54, 2 }
 0x320   :  { %v186_v57 = vmul.f32 0.125, %v93_v33  ;;  %v188_v58 = vmul.f32 0.125, %v106_v53  ;;  %v145_v3 = vadd.f32 %v144_v59, %v143_v47  ;;  %v64_v47 = vld [vmem:[%s8376_s26] sm:$0xff] }
 0x321   :  { %v119_v55 = vadd.f32 %v118_v52, %v117_v15  ;;  %v156_v56 = vadd.f32 %v155_v32, %v154_v48  ;;  %v132_v60 = vadd.f32 %v131_v12, %v130_v14  ;;  %v182_v4 = vadd.f32 %v181_v61, %v180_v54  ;;  %v66_v12 = vld [vmem:[%s8376_s26 + $0x10] sm:$0xff] }
 0x322   :  { %v4238_v1 = vpack.c.bf16 %v186_v57, %v186_v57  ;;  %v4240_v2 = vpack.c.bf16 %v188_v58, %v188_v58  ;;  %v194_v8 = vmul.f32 0.125, %v145_v3  ;;  %v68_v57 = vld [vmem:[%s8376_s26 + $0x20] sm:$0xff]  ;;  %v80_v58 = vrot.slane %v64_v47, 4  ;;  %v70_v61 = vld [vmem:[%s8376_s26 + $0x30] sm:$0xff] }
 0x323   :  { %4090 = vadd.xlane.f32.xlu0 %v4089_v10  ;;  %v167_v10 = vadd.f32 %v166_v5, %v165_v41  ;;  %v190_v63 = vmul.f32 0.125, %v119_v55  ;;  %v157_v0 = vrot.slane %v156_v56, 1  ;;  %v192_v7 = vmul.f32 0.125, %v132_v60 }
 0x324   :  { %v4300_v38 = vunpack.c.l.b16 %v4238_v1  ;;  %v4302_v17 = vunpack.c.l.b16 %v4240_v2  ;;  %v183_v18 = vrot.slane %v182_v4, 1  ;;  %v4246_v26 = vpack.c.bf16 %v194_v8, %v194_v8  ;;  %v6333_v1 = vld [vmem:[%s8357_s10 + $0x28] sm:$0xff]   ;;  %v72_v2 = vld [vmem:[%s8376_s26 + $0x40] sm:$0xff] }
 0x325   :  { %v168_v49 = vrot.slane %v167_v10, 2  ;;  %v4242_v37 = vpack.c.bf16 %v190_v63, %v190_v63  ;;  %v158_v13 = vadd.f32 %v157_v0, %v156_v56  ;;  %v4244_v11 = vpack.c.bf16 %v192_v7, %v192_v7 }
 0x326   :  { %v4329_v24 = vsel %vm4315_vm9, %v4302_v17, %v4300_v38  ;;  %v184_v27 = vadd.f32 %v183_v18, %v182_v4  ;;  %v4308_v42 = vunpack.c.l.b16 %v4246_v26  ;;  %v94_v59 = vrot.slane %v66_v12, 4  ;;  %v6334_v38 = vld [vmem:[%s8357_s10 + $0x20] sm:$0xff]  }
 0x327   :  { %v169_v62 = vadd.f32 %v168_v49, %v167_v10  ;;  %v4304_v21 = vunpack.c.l.b16 %v4242_v37  ;;  %v196_v23 = vmul.f32 0.125, %v158_v13  ;;  %v4306_v29 = vunpack.c.l.b16 %v4244_v11  ;;  %v74_v37 = vld [vmem:[%s8376_s26 + $0x50] sm:$0xff]  ;;  %v76_v18 = vld [vmem:[%s8376_s26 + $0x60] sm:$0xff] }
 0x328   :  { %v200_v44 = vmul.f32 0.125, %v184_v27  ;;  %v81_v63 = vadd.f32 %v80_v58, %v64_v47  ;;  %v95_v0 = vadd.f32 %v94_v59, %v66_v12  ;;  %v120_v3 = vrot.slane %v70_v61, 4  ;;  %v6341_v47 = vld [vmem:[%s8357_s10] sm:$0xff]   ;;  %v6343_v58 = vld [vmem:[%s8357_s10 + $0x70] sm:$0xff]  }
 0x329   :  { %v170_v9 = vrot.slane %v169_v62, 1  ;;  %v4330_v34 = vsel %vm4317_vm10, %v4304_v21, %v4329_v24  ;;  %v4248_v40 = vpack.c.bf16 %v196_v23, %v196_v23  ;;  %v133_v13 = vrot.slane %v72_v2, 4  ;;  %v6335_v23 = vld [vmem:[%s8357_s10 + $0x18] sm:$0xff]  }
 0x32a   :  { %v4331_v15 = vsel %vm4319_vm11, %v4306_v29, %v4330_v34  ;;  %v4252_v31 = vpack.c.bf16 %v200_v44, %v200_v44  ;;  %v82_v7 = vrot.slane %v81_v63, 2  ;;  %v121_v17 = vadd.f32 %v120_v3, %v70_v61 }
 0x32b   :  { %v171_v19 = vadd.f32 %v170_v9, %v169_v62  ;;  %v4310_v28 = vunpack.c.l.b16 %v4248_v40  ;;  %v4332_v46 = vsel %vm4321_vm12, %v4308_v42, %v4331_v15  ;;  %v107_v62 = vrot.slane %v68_v57, 4  ;;  %v6337_v40 = vld [vmem:[%s8357_s10 + $0x10] sm:$0xff]  }
 0x32c   :  { %v4314_v14 = vunpack.c.l.b16 %v4252_v31  ;;  %v96_v9 = vrot.slane %v95_v0, 2  ;;  %v83_v11 = vadd.f32 %v82_v7, %v81_v63  ;;  %v146_v21 = vrot.slane %v74_v37, 4 }
 0x32d   :  { %v198_v30 = vmul.f32 0.125, %v171_v19  ;;  %v4333_v50 = vsel %vm4323_vm13, %v4310_v28, %v4332_v46  ;;  %v108_v4 = vadd.f32 %v107_v62, %v68_v57  ;;  %v122_v24 = vrot.slane %v121_v17, 2 }
 0x32e   :  { %v97_v19 = vadd.f32 %v96_v9, %v95_v0  ;;  %v159_v27 = vrot.slane %v76_v18, 4  ;;  %v84_v29 = vrot.slane %v83_v11, 1  ;;  %v147_v34 = vadd.f32 %v146_v21, %v74_v37 }
 0x32f   :  { %v4250_v5 = vpack.c.bf16 %v198_v30, %v198_v30  ;;  %v109_v8 = vrot.slane %v108_v4, 2 }
 0x330   :  { %v98_v30 = vrot.slane %v97_v19, 1  ;;  %v160_v15 = vadd.f32 %v159_v27, %v76_v18  ;;  %v148_v46 = vrot.slane %v147_v34, 2 }
 0x331   :  { %v4312_v48 = vunpack.c.l.b16 %v4250_v5  ;;  %v110_v26 = vadd.f32 %v109_v8, %v108_v4  ;;  %v85_v5 = vadd.f32 %v84_v29, %v83_v11  ;;  %v6351_v29 = vld [vmem:[%s8357_s10 + $0x50] sm:$0xff]  }
 0x332   :  { %v99_v28 = vadd.f32 %v98_v30, %v97_v19 }
 0x333   :  { %v4334_v51 = vsel %vm4325_vm14, %v4312_v48, %v4333_v50  ;;  %v111_v44 = vrot.slane %v110_v26, 1  ;;  %v6339_v48 = vld [vmem:[%s8357_s10 + $0x8] sm:$0xff]  }
 0x334   :  { %v4335_v53 = vsel %vm4327_vm15, %v4314_v14, %v4334_v51 }
 0x335   :  { %v4337_v55 = vpack.c.b16 %v4335_v53, %v4335_v53  ;;  %v112_v51 = vadd.f32 %v111_v44, %v110_v26  ;;  %v187_v53 = vmul.f32 0.125, %v99_v28  ;;  %v6355_v44 = vld [vmem:[%s8357_s10 + $0x40] sm:$0xff]   ;;  %v6357_v28 = vld [vmem:[%s8358_s11 + $0x18] sm:$0xff]  }
 0x3a8   :  { %v4101_v22 = vpop.xlane.xlu0 %4100 }
 0x3a9   :  { %v4102_v25 = vadd.f32 1e-08, %v4101_v22  ;;  %v134_v22 = vadd.f32 %v133_v13, %v72_v2 }
 0x3ab   :  { %6374 = vrsqrt.f32 %v4102_v25  ;;  %v78_v25 = vld [vmem:[%s8376_s26 + $0x70] sm:$0xff] }
 0x3ac   :  { %v4091_v39 = vpop.xlane.xlu0 %4090  ;;  %v172_v42 = vrot.slane %v78_v25, 4 }
 0x3ad   :  { %v4092_v41 = vadd.f32 1e-08, %v4091_v39  ;;  %v135_v39 = vrot.slane %v134_v22, 2 }
 0x3ae   :  { %v173_v14 = vadd.f32 %v172_v42, %v78_v25 }
 0x3af   :  { %6376 = vrsqrt.f32 %v4092_v41  ;;  %v123_v41 = vadd.f32 %v122_v24, %v121_v17  ;;  %v136_v31 = vadd.f32 %v135_v39, %v134_v22  ;;  %v6349_v22 = vld [vmem:[%s8357_s10 + $0x58] sm:$0xff]  }
 0x3b1   :  { %v124_v50 = vrot.slane %v123_v41, 1 }
 0x3b3   :  { %v125_v12 = vadd.f32 %v124_v50, %v123_v41  ;;  %v6361_v50 = vld [vmem:[%s8358_s11] sm:$0xff]  }
 0x3b8   :  { %v6375_v52 = vpop.eup %6374 }
 0x3b9   :  { %v4105_v10 = vmul.f32 %v6375_v52, %v8042_v45  ;;  %v4104_v33 = vmul.f32 %v6375_v52, %v8040_v35  ;;  %v6331_v45 = vld [vmem:[%s8357_s10 + $0x38] sm:$0xff]   ;;  %v161_v52 = vrot.slane %v160_v15, 2 }
 0x3bb   :  { %5400 = vmatprep.subr.msk.mxu1 %vm4087_vm6, %v4105_v10 }
 0x3bc   :  { %v6377_v32 = vpop.eup %6376  ;;  %4150 = vmatpush1.xpose.msra.mxu1 %v4104_v33 }
 0x3bd   :  { %v4095_v54 = vmul.f32 %v6377_v32, %v8038_v43  ;;  %4432 = vmatprep.subr.bf16.mxu1 %v6435_v20  ;;  %v4094_v35 = vmul.f32 %v6377_v32, %v8047_v36  ;;  %v6332_v43 = vld [vmem:[%s8357_s10 + $0x30] sm:$0xff]   ;;  %v137_v32 = vrot.slane %v136_v31, 1 }
 0x3bf   :  { %5401 = vmatprep.mubr.msk.f32.mxu1 %vm4087_vm6, %v4095_v54  ;;  %v4106_v49 = vmul.f32 %v4104_v33, %v4094_v35  ;;  %v4107_v56 = vmul.f32 %v4105_v10, %v4095_v54  ;;  %v149_v10 = vadd.f32 %v148_v46, %v147_v34  ;;  %v185_v33 = vmul.f32 0.125, %v85_v5  ;;  %v6359_v46 = vld [vmem:[%s8358_s11 + $0x10] sm:$0xff]  }
 0x3c0   :  { %4184 = vmatmul.mubr.f32.vlgmr.msra.gmra.mxu1 %v4094_v35  ;;  %v174_v54 = vrot.slane %v173_v14, 2  ;;  %v162_v35 = vadd.f32 %v161_v52, %v160_v15  ;;  %v138_v57 = vadd.f32 %v137_v32, %v136_v31  ;;  %v6362_v31 = vld [vmem:[%s8360_s13 + $0x38] sm:$0xff]   ;;  %v6365_v52 = vld [vmem:[%s8360_s13 + $0x20] sm:$0xff]   ;;  %v6368_v32 = vld [vmem:[%s8360_s13 + $0x8] sm:$0xff]  }
 0x3c1   :  { %4433 = vmatpush1.bf16.msra.mxu1 %v6331_v45  ;;  %v4108_v36 = vsel %vm4087_vm6, %v4107_v56, 0.0  ;;  %5417 = vmatprep.mubr.msk.bf16.mxu1 %vm86_vm7, %v4337_v55  ;;  %v189_v45 = vmul.f32 0.125, %v112_v51  ;;  %v150_v55 = vrot.slane %v149_v10, 1  ;;  %v4239_v56 = vpack.c.bf16 %v187_v53, %v187_v53  ;;  %v6364_v51 = vld [vmem:[%s8360_s13 + $0x28] sm:$0xff]  }
 0x3c2   :  { %4434 = vmatprep.subr.bf16.mxu1 %v6435_v20  ;;  %v4109_v60 = vadd.f32 %v4108_v36, %v4106_v49  ;;  %v4237_v49 = vpack.c.bf16 %v185_v33, %v185_v33  ;;  %v175_v59 = vadd.f32 %v174_v54, %v173_v14  ;;  %v163_v36 = vrot.slane %v162_v35, 1  ;;  %5661 = vmatpush3.bf16.msra.mxu0 %v6362_v31  ;;  %v4581_v33 = vpop.f32.mrf.mxu0  ;;  %v6369_v54 = vld [vmem:[%s8360_s13] sm:$0xff]  }
 0x3c3   :  { %v151_v61 = vadd.f32 %v150_v55, %v149_v10  ;;  %v4301_v63 = vunpack.c.l.b16 %v4239_v56  ;;  %v193_v0 = vmul.f32 0.125, %v138_v57  ;;  %5662 = vmatprep.subr.bf16.mxu0 %v6436_v6  ;;  %v4587_v14 = vpack.c.bf16 %v7403_v16, %v7403_v16  ;;  %v6366_v16 = vld [vmem:[%s8360_s13 + $0x18] sm:$0xff]   ;;  %v6367_v10 = vld [vmem:[%s8360_s13 + $0x10] sm:$0xff]  }
 0x3c4   :  { %4110 = vadd.xlane.f32.xlu0 %v4109_v60  ;;  %v4241_v60 = vpack.c.bf16 %v189_v45, %v189_v45  ;;  %v4299_v62 = vunpack.c.l.b16 %v4237_v49  ;;  %v176_v2 = vrot.slane %v175_v59, 1  ;;  %v164_v4 = vadd.f32 %v163_v36, %v162_v35  ;;  %v4583_v53 = vpop.f32.mrf.mxu0  ;;  %v6370_v49 = vld [vmem:[%s8362_s15 + $0x18] sm:$0xff]   ;;  %v6371_v56 = vld [vmem:[%s8362_s15 + $0x10] sm:$0xff]  }
 0x3c5   :  { %4435 = vmatpush1.bf16.msra.mxu1 %v6332_v43  ;;  %v191_v43 = vmul.f32 0.125, %v125_v12  ;;  %v195_v9 = vmul.f32 0.125, %v151_v61  ;;  %v4245_v13 = vpack.c.bf16 %v193_v0, %v193_v0  ;;  %v5436_v61 = vld [vmem:[%s8359_s12] ss:$0 sm:$0xff] }
 0x3c6   :  { %4436 = vmatprep.subr.bf16.mxu1 %v6435_v20  ;;  %v4303_v7 = vunpack.c.l.b16 %v4241_v60  ;;  %v4316_v37 = vsel %vm4315_vm9, %v4301_v63, %v4299_v62  ;;  %v177_v17 = vadd.f32 %v176_v2, %v175_v59  ;;  %v197_v18 = vmul.f32 0.125, %v164_v4 }
 0x3c7   :  { %v4243_v3 = vpack.c.bf16 %v191_v43, %v191_v43  ;;  %v4247_v19 = vpack.c.bf16 %v195_v9, %v195_v9  ;;  %v4307_v21 = vunpack.c.l.b16 %v4245_v13  ;;  %v6372_v13 = vld [vmem:[%s8362_s15 + $0x8] sm:$0xff]  }
 0x3c8   :  { %v4318_v11 = vsel %vm4317_vm10, %v4303_v7, %v4316_v37  ;;  %v4249_v25 = vpack.c.bf16 %v197_v18, %v197_v18  ;;  %v5437_v18 = vld [vmem:[%s8361_s14] ss:$0 sm:$0xff]  ;;  %s6438_s14 = smov [#allocation5]  }
 0x3c9   :  { %4437 = vmatpush1.bf16.msra.mxu1 %v6333_v1  ;;  %v6345_v1 = vld [vmem:[%s8357_s10 + $0x68] sm:$0xff]   ;;  %v4305_v8 = vunpack.c.l.b16 %v4243_v3  ;;  %v4309_v26 = vunpack.c.l.b16 %v4247_v19 }
 0x3ca   :  { %4438 = vmatprep.subr.bf16.mxu1 %v6435_v20  ;;  %v4311_v34 = vunpack.c.l.b16 %v4249_v25 }
 0x3cb   :  { %v4320_v24 = vsel %vm4319_vm11, %v4305_v8, %v4318_v11 }
 0x3cc   :  { %v4322_v27 = vsel %vm4321_vm12, %v4307_v21, %v4320_v24 }
 0x3cd   :  { %4439 = vmatpush1.bf16.msra.mxu1 %v6334_v38  ;;  %v6347_v38 = vld [vmem:[%s8357_s10 + $0x60] sm:$0xff]   ;;  %v4324_v39 = vsel %vm4323_vm13, %v4309_v26, %v4322_v27 }
 0x3ce   :  { %4440 = vmatprep.subr.bf16.mxu1 %v6435_v20  ;;  %v4326_v42 = vsel %vm4325_vm14, %v4311_v34, %v4324_v39 }
 0x3d1   :  { %4441 = vmatpush1.bf16.msra.mxu1 %v6335_v23  ;;  %v199_v23 = vmul.f32 0.125, %v177_v17 }
 0x3d2   :  { %4442 = vmatprep.subr.bf16.mxu1 %v6435_v20 }
 0x3d3   :  { %v4251_v30 = vpack.c.bf16 %v199_v23, %v199_v23 }
 0x3d5   :  { %4443 = vmatpush1.bf16.msra.mxu1 %v6337_v40  ;;  %v6353_v40 = vld [vmem:[%s8357_s10 + $0x48] sm:$0xff]   ;;  %v4313_v41 = vunpack.c.l.b16 %v4251_v30 }
 0x3d6   :  { %4444 = vmatprep.subr.bf16.mxu1 %v6435_v20 }
 0x3d7   :  { %v4328_v15 = vsel %vm4327_vm15, %v4313_v41, %v4326_v42 }
 0x3d8   :  { %v4336_v5 = vpack.c.b16 %v4328_v15, %v4328_v15 }
 0x3d9   :  { %4445 = vmatpush1.bf16.msra.mxu1 %v6339_v48  ;;  %v6363_v48 = vld [vmem:[%s8360_s13 + $0x30] sm:$0xff]  }
 0x3da   :  { %4446 = vmatprep.subr.bf16.mxu1 %v6435_v20  ;;  %5663 = vmatpush3.bf16.msra.mxu0 %v6363_v48 }
 0x3db   :  { %5664 = vmatprep.subr.bf16.mxu0 %v6436_v6 }
 0x3dd   :  { %4447 = vmatpush1.bf16.msra.mxu1 %v6341_v47  ;;  %v4584_v47 = vpop.f32.mrf.mxu0 }
 0x3de   :  { %4450 = vmatprep.subr.bf16.mxu1 %v6435_v20  ;;  %5665 = vmatpush3.bf16.msra.mxu0 %v6364_v51 }
 0x3df   :  { %5666 = vmatprep.subr.bf16.mxu0 %v6436_v6  ;;  %v4585_v12 = vpop.f32.mrf.mxu0 }
 0x3e1   :  { %4451 = vmatpush2.bf16.msra.mxu1 %v6343_v58 }
 0x3e2   :  { %4452 = vmatprep.subr.bf16.mxu1 %v6435_v20  ;;  %5667 = vmatpush3.bf16.msra.mxu0 %v6365_v52 }
 0x3e3   :  { %5668 = vmatprep.subr.bf16.mxu0 %v6436_v6 }
 0x3e5   :  { %4453 = vmatpush2.bf16.msra.mxu1 %v6345_v1 }
 0x3e6   :  { %4454 = vmatprep.subr.bf16.mxu1 %v6435_v20  ;;  %5669 = vmatpush3.bf16.msra.mxu0 %v6366_v16 }
 0x3e7   :  { %5670 = vmatprep.subr.bf16.mxu0 %v6436_v6 }
 0x3e9   :  { %4455 = vmatpush2.bf16.msra.mxu1 %v6347_v38  ;;  %v6373_v38 = vld [vmem:[%s8362_s15] sm:$0xff]   ;;  %s4917_s15 = sshll.u32 %s6438_s14, 4  ;;  %s4918_s15 = int_to_ptr.vmem [resolvable:$true] %s4917_s15 }
 0x3ea   :  { %4456 = vmatprep.subr.bf16.mxu1 %v6435_v20  ;;  %5671 = vmatpush3.bf16.msra.mxu0 %v6367_v10  ;;  %s6391_s0 = scalar_lea.vmem %s4918_s15, 16  ;;  %s6395_s9 = scalar_lea.vmem %s4918_s15, 32 }
 0x3eb   :  { %5672 = vmatprep.subr.bf16.mxu0 %v6436_v6  ;;  %p6392_p0 = scmp.ne.s32.totalorder %s4918_s15, %s6391_s0  ;;  %p6396_p1 = scmp.lt.s32.totalorder %s4918_s15, %s4918_s15 }
 0x3ec   :  { %p6397_p2 = scmp.lt.s32.totalorder %s6395_s9, %s6391_s0 }
 0x3ed   :  { %4457 = vmatpush2.bf16.msra.mxu1 %v6349_v22 }
 0x3ee   :  { %4458 = vmatprep.subr.bf16.mxu1 %v6435_v20  ;;  %5673 = vmatpush3.bf16.msra.mxu0 %v6368_v32  ;;  %p6398_p3 = por %p6397_p2, %p6396_p1 }
 0x3ef   :  { %5674 = vmatprep.subr.bf16.mxu0 %v6436_v6 }
 0x3f0   :  { %p6399_p4 = pnand %p6398_p3, %p6392_p0 }
 0x3f1   :  { %4459 = vmatpush2.bf16.msra.mxu1 %v6351_v29 }
 0x3f2   :  { %4460 = vmatprep.subr.bf16.mxu1 %v6435_v20  ;;  %5675 = vmatpush3.bf16.msra.mxu0 %v6369_v54 }
 0x3f5   :  { %4461 = vmatpush2.bf16.msra.mxu1 %v6353_v40 }
 0x3f6   :  { %4462 = vmatprep.subr.bf16.mxu1 %v6435_v20  ;;  %v6360_v20 = vld [vmem:[%s8358_s11 + $0x8] sm:$0xff]  }
 0x3f9   :  { %4463 = vmatpush2.bf16.msra.mxu1 %v6355_v44 }
 0x3fa   :  { %5648 = vmatprep.subr.bf16.mxu1 %v6436_v6 }
 0x3fc   :  { %4465 = vmatmul.mubr.bf16.vlgmr.msra.gmra.mxu1 %v4336_v5 }
 0x3fd   :  { %5649 = vmatpush3.bf16.msra.mxu1 %v6357_v28  ;;  %5656 = vmatprep.mubr.msk.bf16.mxu1 %vm6437_vm8, %v6436_v6 }
 0x3fe   :  { %5650 = vmatprep.subr.bf16.mxu1 %v6436_v6 }
 0x401   :  { %5651 = vmatpush3.bf16.msra.mxu1 %v6359_v46 }
 0x402   :  { %5652 = vmatprep.subr.bf16.mxu1 %v6436_v6 }
 0x405   :  { %5653 = vmatpush3.bf16.msra.mxu1 %v6360_v20 }
 0x406   :  { %5654 = vmatprep.subr.bf16.mxu1 %v6436_v6 }
 0x409   :  { %5655 = vmatpush3.bf16.msra.mxu1 %v6361_v50 }
 0x40a   :  { %5680 = vmatprep.subr.bf16.mxu1 %v6436_v6 }
 0x40c   :  { %5657 = vmatmul.mubr.msk.bf16.vlgmr.msra.gmra.mxu1 %vm4087_vm6, %v4587_v14 }
 0x40d   :  { %5688 = vmatprep.mubr.msk.bf16.mxu1 %vm6437_vm8, %v6436_v6  ;;  %5681 = vmatpush3.bf16.msra.mxu1 %v6370_v49 }
 0x40e   :  { %5682 = vmatprep.subr.bf16.mxu1 %v6436_v6 }
 0x411   :  { %5683 = vmatpush3.bf16.msra.mxu1 %v6371_v56 }
 0x412   :  { %5684 = vmatprep.subr.bf16.mxu1 %v6436_v6 }
 0x415   :  { %5685 = vmatpush3.bf16.msra.mxu1 %v6372_v13 }
 0x416   :  { %5686 = vmatprep.subr.bf16.mxu1 %v6436_v6 }
 0x419   :  { %5687 = vmatpush3.bf16.msra.mxu1 %v6373_v38 }
 0x44d   :  { %v4111_v27 = vpop.xlane.xlu0 %4110 }
 0x44e   :  { %v4112_v30 = vsub.f32 0.0, %v4111_v27 }
 0x480   :  { %v4185_v35 = vpop.f32.mrf.mxu1 }
 0x481   :  { %v4190_v45 = vsel %vm4189_vm0, %v4185_v35, -inf }
 0x482   :  { %4191 = vmax.xlane.f32.xlu1 %v4190_v45  ;;  %v4187_v55 = vpop.f32.mrf.mxu1 }
 0x4bc   :  { %v4466_v57 = vpop.f32.mrf.mxu1 }
 0x4bd   :  { %v4582_v36 = vadd.f32 %v4581_v33, %v4466_v57 }
 0x4be   :  { %v4468_v58 = vpop.f32.mrf.mxu1 }
 0x4c0   :  { %v4469_v59 = vpop.f32.mrf.mxu1 }
 0x4c2   :  { %v4470_v43 = vpop.f32.mrf.mxu1 }
 0x4cc   :  { %v4657_v60 = vpop.f32.mrf.mxu1 }
 0x4cd   :  { %v4663_v62 = vadd.f32 %v4657_v60, %v4582_v36 }
 0x4ce   :  { %v5658_v63 = vpop.f32.mrf.mxu1 }
 0x4cf   :  { %v4671_v0 = vadd.f32 %v5436_v61, %v4663_v62 }
 0x4d0   :  { %v4660_v1 = vpop.f32.mrf.mxu1 }
 0x4d1   :  { %v4672_v2 = vmax.f32 %v4671_v0, 0.0 }
 0x4d2   :  { %v5659_v3 = vpop.f32.mrf.mxu1 }
 0x4d3   :  { %v4673_v4 = vpack.c.bf16 %v4672_v2, %v4672_v2 }
 0x4d5   :  { %5677 = vmatmul.mubr.bf16.vlgmr.msra.gmra.mxu0 %v4673_v4 }
 0x50b   :  { %v4192_v7 = vpop.xlane.xlu1 %4191 }
 0x50c   :  { %v4193_v9 = vsub.f32 %v4185_v35, %v4192_v7 }
 0x50e   :  { %v4194_v37 = vmul.f32 1.442695, %v4193_v9 }
 0x510   :  { %6378 = vpow2.f32 %v4194_v37 }
 0x51d   :  { %v6379_v17 = vpop.eup %6378 }
 0x51e   :  { %v4196_v8 = vsel %vm4189_vm0, %v6379_v17, 0.0 }
 0x51f   :  { %4197 = vadd.xlane.f32.xlu1 %v4196_v8 }
 0x595   :  { %v4779_v11 = vpop.f32.mrf.mxu0 }
 0x596   :  { %v4780_v19 = vadd.f32 %v5437_v18, %v4779_v11 }
 0x597   :  { %v5678_v21 = vpop.f32.mrf.mxu0 }
 0x598   :  { %v4785_v22 = vmax.f32 %v4780_v19, 0.0 }
 0x599   :  { %v4782_v23 = vpop.f32.mrf.mxu0 }
 0x59a   :  { %v4786_v24 = vpack.c.bf16 %v4785_v22, %v4785_v22 }
 0x59b   :  { %v5679_v6 = vpop.f32.mrf.mxu0 }
 0x59c   :  { %5689 = vmatmul.mubr.msk.bf16.vlgmr.msra.gmra.mxu1 %vm4087_vm6, %v4786_v24 }
 0x5a8   :  { %v4198_v25 = vpop.xlane.xlu1 %4197 }
 0x5a9   :  { %6380 = vlog2.f32 %v4198_v25 }
 0x5b6   :  { %v6381_v26 = vpop.eup %6380 }
 0x5b7   :  { %v4200_v29 = vmul.f32 0.6931472, %v6381_v26 }
 0x5b9   :  { %v4201_v34 = vadd.f32 %v4200_v29, %v4192_v7 }
 0x5bb   :  { %v4202_v39 = vadd.f32 %v4201_v34, %v4112_v30 }
 0x5bd   :  { %v4203_v40 = vrot.slane %v4202_v39, 4 }
 0x5bf   :  { %v4204_v41 = vadd.f32 %v4203_v40, %v4202_v39 }
 0x5c1   :  { %v4205_v42 = vrot.slane %v4204_v41, 2 }
 0x5c3   :  { %v4206_v44 = vadd.f32 %v4205_v42, %v4204_v41 }
 0x5c5   :  { %v4207_v15 = vrot.slane %v4206_v44, 1 }
 0x5c7   :  { %v4208_v5 = vadd.f32 %v4207_v15, %v4206_v44 }
 0x5c9   :  { %4210 = vst.msk [vmem:[#allocation5] sm:$0x1] %vm4209_vm1, %v4208_v5 }
 0x5ca   :  { %6402 = shalt.err (!%p6399_p4)
}
 0x5cb   :  { %4920 = dma.vmem_to_hbm [thread:$0]  %s4918_s15, 16, %s8366_s19, [#allocation6]   ;;  %v5446_v28 = vld [vmem:[#allocation2] ss:$0 sm:$0xff]  ;;  %vm4877_vm2 = vcmask 7168  }
 0x5cc   :  { %s8377_s20 = sld [smem:[#allocation12_spill]] }
 0x5d2   :  { %v4879_v32 = vld [vmem:[%s8377_s20] sm:$0xff] }
 0x5d3   :  { %v4883_v54 = vsub.f32 1.0, %v4879_v32 }
 0x65c   :  { %v4863_v46 = vpop.f32.mrf.mxu1 }
 0x65d   :  { %v4864_v20 = vadd.f32 %v5446_v28, %v4863_v46 }
 0x65e   :  { %v5690_v31 = vpop.f32.mrf.mxu1 }
 0x65f   :  { %v5452_v48 = vmul.f32 -1.442695, %v4864_v20 }
 0x660   :  { %v4866_v50 = vpop.f32.mrf.mxu1 }
 0x661   :  { %6382 = vpow2.f32 %v5452_v48 }
 0x662   :  { %v5691_v14 = vpop.f32.mrf.mxu1 }
 0x66e   :  { %v6383_v51 = vpop.eup %6382 }
 0x66f   :  { %v4872_v52 = vadd.f32 1.0, %v6383_v51 }
 0x671   :  { %6384 = vrcp.f32 %v4872_v52 }
 0x67e   :  { %v6385_v16 = vpop.eup %6384 }
 0x67f   :  { %v4875_v10 = vmax.f32 %v6385_v16, 1e-07 }
 0x681   :  { %v4876_v33 = vmin.f32 %v4875_v10, 0.9999999 }
 0x683   :  { %6386 = vlog2.f32 %v4876_v33  ;;  %v4884_v53 = vsub.f32 1.0, %v4876_v33  ;;  %4878 = vst.msk [vmem:[%s8364_s17] sm:$0xff] %vm4877_vm2, %v4876_v33  ;;  %s6439_s17 = smov [#allocation3]  }
 0x684   :  { %s4907_s1 = sshll.u32 %s6439_s17, 4  ;;  %s4908_s1 = int_to_ptr.vmem [resolvable:$true] %s4907_s1 }
 0x685   :  { %6388 = vlog2.f32 %v4884_v53  ;;  %s6411_s21 = scalar_lea.vmem %s4908_s1, 16  ;;  %s6415_s22 = scalar_lea.vmem %s4908_s1, 32 }
 0x686   :  { %p6412_p5 = scmp.ne.s32.totalorder %s4908_s1, %s6411_s21  ;;  %p6416_p6 = scmp.lt.s32.totalorder %s4908_s1, %s4908_s1 }
 0x687   :  { %p6417_p7 = scmp.lt.s32.totalorder %s6415_s22, %s6411_s21 }
 0x689   :  { %p6418_p8 = por %p6417_p7, %p6416_p6 }
 0x68b   :  { %p6419_p9 = pnand %p6418_p8, %p6412_p5 }
 0x690   :  { %v6387_v47 = vpop.eup %6386 }
 0x691   :  { %v4881_v12 = vmul.f32 0.6931472, %v6387_v47 }
 0x692   :  { %v6389_v35 = vpop.eup %6388 }
 0x693   :  { %v4886_v45 = vmul.f32 0.6931472, %v6389_v35  ;;  %v4882_v55 = vmul.f32 %v4881_v12, %v4879_v32 }
 0x695   :  { %v4887_v49 = vmul.f32 %v4886_v45, %v4883_v54 }
 0x697   :  { %v4888_v56 = vadd.f32 %v4887_v49, %v4882_v55 }
 0x699   :  { %v4889_v57 = vsub.f32 0.0, %v4888_v56 }
 0x69b   :  { %v4890_v58 = vsel %vm4877_vm2, %v4889_v57, 0.0 }
 0x69c   :  { %v4891_v59 = vrot.slane %v4890_v58, 4 }
 0x69e   :  { %v4892_v43 = vadd.f32 %v4891_v59, %v4890_v58 }
 0x6a0   :  { %v4893_v36 = vrot.slane %v4892_v43, 2 }
 0x6a2   :  { %v4894_v60 = vadd.f32 %v4893_v36, %v4892_v43 }
 0x6a4   :  { %v4895_v61 = vrot.slane %v4894_v60, 1 }
 0x6a6   :  { %v4896_v62 = vadd.f32 %v4895_v61, %v4894_v60 }
 0x6a8   :  { %v4897_v63 = vmul.f32 0.125, %v4896_v62 }
 0x6aa   :  { %4898 = vst.msk [vmem:[#allocation3] sm:$0x1] %vm4209_vm1, %v4897_v63 }
 0x6ab   :  { %6422 = shalt.err (!%p6419_p9)
}
 0x6ac   :  { %4910 = dma.vmem_to_hbm [thread:$0]  %s4908_s1, 16, %s8365_s18, [#allocation4]  }
 0x6ad   :  { %6431 = dma.done.wait [#allocation4], 16  }
 0x6ae   :  { %6432 = vsyncadd [#allocation4], 4294967280 }
 0x6af   :  { %6433 = dma.done.wait [#allocation6], 16  }
 0x6b0   :  { %6434 = vsyncadd [#allocation6], 4294967280 }
 0x6b1   :  { %4929 = vsyncpa [#allocation4], 1 }
 0x6b2   :  { %4930 = vsyncpa [#allocation6], 1 }

</bundles_post_ra>
